<compile_context>
chip_gen: v7x
topology: tpu7x:2x2x1
jax: 0.10.0
libtpu: 0.0.40
codegen_flags: <defaults>
</compile_context>

<pallas_src>
import functools
import math

import jax
import jax.numpy as jnp
from jax.experimental import pallas as pl
from jax.experimental.pallas import tpu as pltpu


def _gat_mgc_kernel(e_dst_ref, e_src_ref, adj_ref, h_j_ref, bias_ref, o_ref,
                    m_sc, acc_sc, *, denom_col):
    j = pl.program_id(1)

    @pl.when(j == 0)
    def _init():
        m_sc[...] = jnp.full(m_sc.shape, -1e30, jnp.float32)
        acc_sc[...] = jnp.zeros(acc_sc.shape, jnp.float32)

    # adj_ref already holds mask[i, j] = (edge j->i) | (i == j), int8.
    mask = adj_ref[...] != 0                                        # (TI, TJ)
    raw = e_dst_ref[...] + e_src_ref[...]                           # (TI, TJ)
    logits = jnp.where(mask, jnp.maximum(raw, 0.2 * raw), -1e30)

    # Online softmax update.
    m_prev = m_sc[...]
    m_new = jnp.maximum(m_prev, jnp.max(logits, axis=-1, keepdims=True))
    # Load-bearing select: a row with no edges in this block has
    # logits - m_new == 0 for masked entries (m_new stays -1e30) and would
    # otherwise contribute exp(0) = 1.  Do not remove.
    p = jnp.where(mask, jnp.exp(logits - m_new), 0.0)               # (TI, TJ)
    corr = jnp.exp(m_prev - m_new)                                  # (TI, 1)

    # p @ h_j on the MXU (bf16 operands, f32 accumulation).  Column `denom_col`
    # of h is all ones, so the softmax denominator accumulates for free.
    acc_sc[...] = corr * acc_sc[...] + jnp.dot(
        p.astype(jnp.bfloat16), h_j_ref[...],
        preferred_element_type=jnp.float32)
    m_sc[...] = m_new

    @pl.when(j == pl.num_programs(1) - 1)
    def _finalize():
        acc = acc_sc[...]
        l = acc[:, denom_col:denom_col + 1]                         # (TI, 1)
        inv_l = pl.reciprocal(l, approx=True)                       # EUP vrcp
        out = acc * inv_l + bias_ref[...]
        o_ref[...] = jnp.maximum(out, 0.0).astype(o_ref.dtype)


def mgc_layer_forward(x, adj, w_t, att_src, att_dst, bias, *,
                      tile_i=256, tile_j=512):
    """Returns (1, N, out_features), matching MultiGraphConvolution_Layer."""
    n, f = x.shape
    o = w_t.shape[1]
    f32, bf16 = jnp.float32, jnp.bfloat16

    # Clamp tiles for small graphs (avoid massive padding), then pad N so every
    # block is full.  tile_i stays a multiple of 32 for the int8 adjacency tile.
    n_128 = ((n + 127) // 128) * 128
    tile_i = min(tile_i, n_128)
    tile_j = min(tile_j, n_128)
    blk = math.lcm(tile_i, tile_j)
    n_pad = ((n + blk - 1) // blk) * blk

    # Reserve at least one zero-padded column of h for the folded denominator.
    o_pad = ((o + 1 + 127) // 128) * 128
    denom_col = o

    # ---- wrapper-side precompute (one small XLA matmul + reductions) -------
    h = jnp.dot(x.astype(bf16), w_t.astype(bf16),
                preferred_element_type=f32)                          # (n, o)
    e_src = jnp.sum(h * att_src.astype(f32), axis=-1)                # (n,)
    e_dst = jnp.sum(h * att_dst.astype(f32), axis=-1)                # (n,)

    h_p = jnp.zeros((n_pad, o_pad), bf16).at[:n, :o].set(h.astype(bf16))
    h_p = h_p.at[:, denom_col].set(1.0)                # ones column -> denom
    e_src_p = jnp.zeros((1, n_pad), f32).at[0, :n].set(e_src)
    e_dst_p = jnp.zeros((n_pad, 1), f32).at[:n, 0].set(e_dst)
    bias_p = jnp.zeros((1, o_pad), f32).at[:, :o].set(bias.astype(f32))

    # mask[i, j] = 1 <=> edge j->i exists (adj[j, i] != 0) or i == j (forced
    # self-loop, matching GATConv remove-then-add).  Pre-transposed + int8.
    # TODO(synk): the scipy COO -> edge_index conversion of the original code
    # is replaced by this equivalent dense masking (edge_weight is unused by
    # GATConv with edge_dim=None).
    adj_t = jnp.zeros((n_pad, n_pad), jnp.int8).at[:n, :n].set(
        (adj.T != 0).astype(jnp.int8))
    adj_t = jnp.maximum(adj_t, jnp.eye(n_pad, dtype=jnp.int8))

    grid_i, grid_j = n_pad // tile_i, n_pad // tile_j

    grid_spec = pltpu.PrefetchScalarGridSpec(
        num_scalar_prefetch=0,
        grid=(grid_i, grid_j),
        in_specs=[
            pl.BlockSpec((tile_i, 1), lambda i, j: (i, 0)),       # e_dst
            pl.BlockSpec((1, tile_j), lambda i, j: (0, j)),       # e_src
            pl.BlockSpec((tile_i, tile_j), lambda i, j: (i, j)),  # adj^T int8
            pl.BlockSpec((tile_j, o_pad), lambda i, j: (j, 0)),   # h (sources)
            pl.BlockSpec((1, o_pad), lambda i, j: (0, 0)),        # bias
        ],
        out_specs=pl.BlockSpec((tile_i, o_pad), lambda i, j: (i, 0)),
        scratch_shapes=[
            pltpu.VMEM((tile_i, 1), jnp.float32),      # running max m
            pltpu.VMEM((tile_i, o_pad), jnp.float32),  # output + denom acc
        ],
    )

    flops = int(2 * n_pad * n_pad * o_pad)             # p @ h (denom folded in)
    bytes_accessed = int(n_pad * n_pad                 # int8 adjacency
                         + grid_i * n_pad * o_pad * 2  # streamed bf16 h
                         + n_pad * o_pad * 4           # f32 output
                         + grid_i * n_pad * 4 + n_pad * 4 + o_pad * 4)
    cost = pl.CostEstimate(flops=flops,
                           transcendentals=int(n_pad * n_pad + n_pad * grid_j),
                           bytes_accessed=bytes_accessed)

    kernel = functools.partial(_gat_mgc_kernel, denom_col=denom_col)
    out_p = pl.pallas_call(
        kernel,
        out_shape=jax.ShapeDtypeStruct((n_pad, o_pad), jnp.float32),
        grid_spec=grid_spec,
        compiler_params=pltpu.CompilerParams(
            dimension_semantics=("parallel", "arbitrary")),
        cost_estimate=cost,
    )(e_dst_p, e_src_p, adj_t, h_p, bias_p)

    return out_p[:n, :o][None, :, :]


# ----------------------------- references ----------------------------------

def _reference_f32(x, adj, w_t, att_src, att_dst, bias):
    """Pure-f32 reference of the GATConv-layer math."""
    h = x @ w_t
    e_src = jnp.sum(h * att_src, axis=-1, keepdims=True)
    e_dst = jnp.sum(h * att_dst, axis=-1, keepdims=True)
    raw = e_dst + e_src.T
    lrelu = jnp.where(raw > 0, raw, 0.2 * raw)
    mask = (adj.T != 0) | jnp.eye(x.shape[0], dtype=bool)
    masked = jnp.where(mask, lrelu, -1e30)
    p = jnp.exp(masked - jnp.max(masked, axis=-1, keepdims=True))
    p = jnp.where(mask, p, 0.0)
    alpha = p / jnp.sum(p, axis=-1, keepdims=True)
    return jnp.maximum(alpha @ h + bias, 0.0)[None]


def _reference_bf16(x, adj, w_t, att_src, att_dst, bias):
    """Reference applying the same bf16-MXU-operand rounding as the kernel."""
    h = jnp.dot(x.astype(jnp.bfloat16), w_t.astype(jnp.bfloat16),
                preferred_element_type=jnp.float32)
    e_src = jnp.sum(h * att_src, axis=-1, keepdims=True)
    e_dst = jnp.sum(h * att_dst, axis=-1, keepdims=True)
    raw = e_dst + e_src.T
    lrelu = jnp.maximum(raw, 0.2 * raw)
    mask = (adj.T != 0) | jnp.eye(x.shape[0], dtype=bool)
    masked = jnp.where(mask, lrelu, -1e30)
    p = jnp.exp(masked - jnp.max(masked, axis=-1, keepdims=True))
    p = jnp.where(mask, p, 0.0)
    p_bf = p.astype(jnp.bfloat16)
    l = jnp.sum(p_bf.astype(jnp.float32), axis=-1, keepdims=True)
    num = jnp.dot(p_bf, h.astype(jnp.bfloat16),
                  preferred_element_type=jnp.float32)
    return jnp.maximum(num / l + bias, 0.0)[None]


if __name__ == "__main__":
    # Small shapes: 200 nodes (padded to 256 -> 1x1 grid of 256-tiles),
    # feature_num=16, out_features=32 (padded to 128 lanes inside the wrapper).
    N, FEAT, OUT = 200, 16, 32

    key = jax.random.PRNGKey(0)
    k_x, k_adj, k_w, k_as, k_ad, k_b = jax.random.split(key, 6)

    x = jax.random.normal(k_x, (N, FEAT), dtype=jnp.float32)
    adj = (jax.random.uniform(k_adj, (N, N)) < 0.05).astype(jnp.float32)

    w_t = jax.random.normal(k_w, (FEAT, OUT), dtype=jnp.float32) / FEAT ** 0.5
    att_src = jax.random.normal(k_as, (1, OUT), dtype=jnp.float32) / OUT ** 0.5
    att_dst = jax.random.normal(k_ad, (1, OUT), dtype=jnp.float32) / OUT ** 0.5
    bias = jax.random.normal(k_b, (1, OUT), dtype=jnp.float32) * 0.01

    y = mgc_layer_forward(x, adj, w_t, att_src, att_dst, bias)
    y = jax.block_until_ready(y)

    assert y.shape == (1, N, OUT), y.shape
    assert bool(jnp.all(jnp.isfinite(y)))

    # Tight check vs. a reference with the same bf16 MXU-operand rounding
    # (residual differences: online-softmax rescaling, accumulation order,
    # EUP approximate reciprocal).
    y_bf = _reference_bf16(x, adj, w_t, att_src, att_dst, bias)
    assert jnp.allclose(y, y_bf, atol=2e-2, rtol=2e-2), "mismatch vs bf16 reference"

    # Semantic sanity vs. the pure-f32 reference (looser: the kernel
    # intentionally uses bf16 MXU operands per the performance review).
    y_f32 = _reference_f32(x, adj, w_t, att_src, att_dst, bias)
    assert jnp.allclose(y, y_f32, atol=1e-1, rtol=1e-1), "mismatch vs f32 reference"

    print("KERNEL_OK")
</pallas_src>

<mosaic_0001>
module attributes {stable_mosaic.version = 11 : i64} {
  func.func @_gat_mgc_kernel(%arg0: i32, %arg1: i32, %arg2: memref<256x1xf32, #tpu.memory_space<vmem>>, %arg3: memref<1x256xf32, #tpu.memory_space<vmem>>, %arg4: memref<256x256xi8, #tpu.memory_space<vmem>>, %arg5: memref<256x128xbf16, #tpu.memory_space<vmem>>, %arg6: memref<1x128xf32, #tpu.memory_space<vmem>>, %arg7: memref<256x128xf32, #tpu.memory_space<vmem>>, %arg8: memref<256x1xf32, #tpu.memory_space<vmem>>, %arg9: memref<256x128xf32, #tpu.memory_space<vmem>>) attributes {dimension_semantics = [#tpu.dimension_semantics<parallel>, #tpu.dimension_semantics<arbitrary>], iteration_bounds = array<i64: 1, 1>, scalar_prefetch = 0 : i64, scratch_operands = 2 : i64, tpu.core_type = #tpu.core_type<tc>, window_params = [{transform_indices = @transform_0, window_bounds = array<i64: 256, 1>}, {transform_indices = @transform_1, window_bounds = array<i64: 1, 256>}, {transform_indices = @transform_2, window_bounds = array<i64: 256, 256>}, {transform_indices = @transform_3, window_bounds = array<i64: 256, 128>}, {pipeline_mode = #tpu.pipeline_mode<synchronous>, transform_indices = @transform_4, window_bounds = array<i64: 1, 128>}, {transform_indices = @transform_5, window_bounds = array<i64: 256, 128>}]} {
    %c0_i32 = arith.constant 0 : i32
    %0 = arith.cmpi eq, %arg1, %c0_i32 : i32
    %1 = arith.extui %0 : i1 to i32
    %c0_i32_0 = arith.constant 0 : i32
    %2 = arith.cmpi ne, %1, %c0_i32_0 : i32
    scf.if %2 {
      %cst_22 = arith.constant -1.000000e+30 : f32
      %39 = vector.broadcast %cst_22 : f32 to vector<256x1xf32>
      %c0_23 = arith.constant 0 : index
      %c0_24 = arith.constant 0 : index
      %40 = vector.load %arg8[%c0_23, %c0_24] : memref<256x1xf32, #tpu.memory_space<vmem>>, vector<256x1xf32>
      tpu.vector_store %arg8[%c0_23, %c0_24], %39 {strides = array<i32>} : memref<256x1xf32, #tpu.memory_space<vmem>>, vector<256x1xf32>,
      %cst_25 = arith.constant 0.000000e+00 : f32
      %41 = vector.broadcast %cst_25 : f32 to vector<256x128xf32>
      %c0_26 = arith.constant 0 : index
      %c0_27 = arith.constant 0 : index
      %42 = vector.load %arg9[%c0_26, %c0_27] : memref<256x128xf32, #tpu.memory_space<vmem>>, vector<256x128xf32>
      tpu.vector_store %arg9[%c0_26, %c0_27], %41 {strides = array<i32>} : memref<256x128xf32, #tpu.memory_space<vmem>>, vector<256x128xf32>,
    } else {
    }
    %c0 = arith.constant 0 : index
    %c0_1 = arith.constant 0 : index
    %3 = vector.load %arg4[%c0, %c0_1] : memref<256x256xi8, #tpu.memory_space<vmem>>, vector<256x256xi8>
    %c0_i8 = arith.constant 0 : i8
    %4 = vector.broadcast %c0_i8 : i8 to vector<256x256xi8>
    %5 = arith.cmpi ne, %3, %4 : vector<256x256xi8>
    %c0_2 = arith.constant 0 : index
    %c0_3 = arith.constant 0 : index
    %6 = vector.load %arg2[%c0_2, %c0_3] : memref<256x1xf32, #tpu.memory_space<vmem>>, vector<256x1xf32>
    %c0_4 = arith.constant 0 : index
    %c0_5 = arith.constant 0 : index
    %7 = vector.load %arg3[%c0_4, %c0_5] : memref<1x256xf32, #tpu.memory_space<vmem>>, vector<1x256xf32>
    %8 = vector.broadcast %6 : vector<256x1xf32> to vector<256x256xf32>
    %9 = vector.broadcast %7 : vector<1x256xf32> to vector<256x256xf32>
    %10 = arith.addf %8, %9 : vector<256x256xf32>
    %cst = arith.constant 2.000000e-01 : f32
    %11 = vector.broadcast %cst : f32 to vector<256x256xf32>
    %12 = arith.mulf %11, %10 : vector<256x256xf32>
    %13 = arith.maximumf %10, %12 : vector<256x256xf32>
    %cst_6 = arith.constant -1.000000e+30 : f32
    %14 = vector.broadcast %cst_6 : f32 to vector<256x256xf32>
    %15 = arith.select %5, %13, %14 : vector<256x256xi1>, vector<256x256xf32>
    %c0_7 = arith.constant 0 : index
    %c0_8 = arith.constant 0 : index
    %16 = vector.load %arg8[%c0_7, %c0_8] : memref<256x1xf32, #tpu.memory_space<vmem>>, vector<256x1xf32>
    %cst_9 = arith.constant dense<0xFF800000> : vector<256xf32>
    %17 = vector.multi_reduction <maximumf>, %15, %cst_9 [1] : vector<256x256xf32> to vector<256xf32>
    %18 = vector.shape_cast %17 : vector<256xf32> to vector<256x1xf32>
    %19 = arith.maximumf %16, %18 : vector<256x1xf32>
    %20 = vector.broadcast %19 : vector<256x1xf32> to vector<256x256xf32>
    %21 = arith.subf %15, %20 : vector<256x256xf32>
    %22 = math.exp %21 : vector<256x256xf32>
    %cst_10 = arith.constant 0.000000e+00 : f32
    %23 = vector.broadcast %cst_10 : f32 to vector<256x256xf32>
    %24 = arith.select %5, %22, %23 : vector<256x256xi1>, vector<256x256xf32>
    %25 = arith.subf %16, %19 : vector<256x1xf32>
    %26 = math.exp %25 : vector<256x1xf32>
    %c0_11 = arith.constant 0 : index
    %c0_12 = arith.constant 0 : index
    %27 = vector.load %arg9[%c0_11, %c0_12] : memref<256x128xf32, #tpu.memory_space<vmem>>, vector<256x128xf32>
    %28 = vector.broadcast %26 : vector<256x1xf32> to vector<256x128xf32>
    %29 = arith.mulf %28, %27 : vector<256x128xf32>
    %30 = arith.truncf %24 : vector<256x256xf32> to vector<256x256xbf16>
    %c0_13 = arith.constant 0 : index
    %c0_14 = arith.constant 0 : index
    %31 = vector.load %arg5[%c0_13, %c0_14] : memref<256x128xbf16, #tpu.memory_space<vmem>>, vector<256x128xbf16>
    %cst_15 = arith.constant dense<0.000000e+00> : vector<256x128xf32>
    %32 = tpu.matmul %30, %31, %cst_15 {dimension_numbers = #tpu.dot_dimension_numbers<[1], [0], [0], [1], [0, 0, 1, 1], [], []>} : vector<256x256xbf16>, vector<256x128xbf16>, vector<256x128xf32> -> vector<256x128xf32>
    %33 = arith.addf %29, %32 : vector<256x128xf32>
    %c0_16 = arith.constant 0 : index
    %c0_17 = arith.constant 0 : index
    %34 = vector.load %arg9[%c0_16, %c0_17] : memref<256x128xf32, #tpu.memory_space<vmem>>, vector<256x128xf32>
    tpu.vector_store %arg9[%c0_16, %c0_17], %33 {strides = array<i32>} : memref<256x128xf32, #tpu.memory_space<vmem>>, vector<256x128xf32>,
    %c0_18 = arith.constant 0 : index
    %c0_19 = arith.constant 0 : index
    %35 = vector.load %arg8[%c0_18, %c0_19] : memref<256x1xf32, #tpu.memory_space<vmem>>, vector<256x1xf32>
    tpu.vector_store %arg8[%c0_18, %c0_19], %19 {strides = array<i32>} : memref<256x1xf32, #tpu.memory_space<vmem>>, vector<256x1xf32>,
    %c0_i32_20 = arith.constant 0 : i32
    %36 = arith.cmpi eq, %arg1, %c0_i32_20 : i32
    %37 = arith.extui %36 : i1 to i32
    %c0_i32_21 = arith.constant 0 : i32
    %38 = arith.cmpi ne, %37, %c0_i32_21 : i32
    scf.if %38 {
      %c0_22 = arith.constant 0 : index
      %c0_23 = arith.constant 0 : index
      %39 = vector.load %arg9[%c0_22, %c0_23] : memref<256x128xf32, #tpu.memory_space<vmem>>, vector<256x128xf32>
      %40 = vector.extract_strided_slice %39 {offsets = [0, 32], sizes = [256, 1], strides = [1, 1]} : vector<256x128xf32> to vector<256x1xf32>
      %41 = tpu.reciprocal %40 {approx = true} : vector<256x1xf32> -> vector<256x1xf32>
      %42 = vector.broadcast %41 : vector<256x1xf32> to vector<256x128xf32>
      %43 = arith.mulf %39, %42 : vector<256x128xf32>
      %c0_24 = arith.constant 0 : index
      %c0_25 = arith.constant 0 : index
      %44 = vector.load %arg6[%c0_24, %c0_25] : memref<1x128xf32, #tpu.memory_space<vmem>>, vector<1x128xf32>
      %45 = vector.broadcast %44 : vector<1x128xf32> to vector<256x128xf32>
      %46 = arith.addf %43, %45 : vector<256x128xf32>
      %cst_26 = arith.constant 0.000000e+00 : f32
      %47 = vector.broadcast %cst_26 : f32 to vector<256x128xf32>
      %48 = arith.maximumf %46, %47 : vector<256x128xf32>
      %c0_27 = arith.constant 0 : index
      %c0_28 = arith.constant 0 : index
      %49 = vector.load %arg7[%c0_27, %c0_28] : memref<256x128xf32, #tpu.memory_space<vmem>>, vector<256x128xf32>
      tpu.vector_store %arg7[%c0_27, %c0_28], %48 {strides = array<i32>} : memref<256x128xf32, #tpu.memory_space<vmem>>, vector<256x128xf32>,
    } else {
    }
    return
  }
  func.func @transform_0(%arg0: i32, %arg1: i32) -> (i32, i32) {
    %c0_i32 = arith.constant 0 : i32
    %c0_i32_0 = arith.constant 0 : i32
    return %arg0, %c0_i32 : i32, i32
  }
  func.func @transform_1(%arg0: i32, %arg1: i32) -> (i32, i32) {
    %c0_i32 = arith.constant 0 : i32
    %c0_i32_0 = arith.constant 0 : i32
    return %c0_i32, %arg1 : i32, i32
  }
  func.func @transform_2(%arg0: i32, %arg1: i32) -> (i32, i32) {
    %c0_i32 = arith.constant 0 : i32
    return %arg0, %arg1 : i32, i32
  }
  func.func @transform_3(%arg0: i32, %arg1: i32) -> (i32, i32) {
    %c0_i32 = arith.constant 0 : i32
    %c0_i32_0 = arith.constant 0 : i32
    return %arg1, %c0_i32 : i32, i32
  }
  func.func @transform_4(%arg0: i32, %arg1: i32) -> (i32, i32) {
    %c0_i32 = arith.constant 0 : i32
    %c0_i32_0 = arith.constant 0 : i32
    %c0_i32_1 = arith.constant 0 : i32
    return %c0_i32, %c0_i32_0 : i32, i32
  }
  func.func @transform_5(%arg0: i32, %arg1: i32) -> (i32, i32) {
    %c0_i32 = arith.constant 0 : i32
    %c0_i32_0 = arith.constant 0 : i32
    return %arg0, %c0_i32 : i32, i32
  }
}

</mosaic_0001>

<bundles_post_ra>
// kernel: tpu_custom_call.1
= control target key start
LH: loop header
LB: loop body
LE: loop exit
PB: predicated region body
PF: predicated region fallthrough
CT: control target
= control target key end

     0   :  { %v5557_v2 = vmov 0   ;;  %s5551_s0 = inlined_call_operand.vmem [shape: f32[256,1], index: 0, kind: input, shape index: {}]   ;;  %s5552_s1 = inlined_call_operand.vmem [shape: f32[1,256], index: 1, kind: input, shape index: {}]   ;;  %s5553_s2 = inlined_call_operand.vmem [shape: s8[256,256], index: 2, kind: input, shape index: {}]   ;;  %s5554_s3 = inlined_call_operand.vmem [shape: bf16[256,128], index: 3, kind: input, shape index: {}]   ;;  %s5555_s4 = inlined_call_operand.vmem [shape: f32[1,128], index: 4, kind: input, shape index: {}]   ;;  %s5556_s5 = inlined_call_operand.hbm [shape: f32[256,128], index: 5, kind: output, shape index: {}]  }
   0x1   :  { %v127_v0 = vld [vmem:[%s5551_s0 + $0x10] sm:$0xff]  ;;  %v125_v1 = vld [vmem:[%s5551_s0] sm:$0xff]  ;;  %2861 = vset.pattern.permute.xlu1 %v5557_v2  ;;  %2860 = vset.pattern.permute.xlu0 %v5557_v2  ;;  %v128_v3 = vld [vmem:[%s5551_s0 + $0x18] sm:$0xff] }
   0x2   :  { %170 = vperm.xlu1 %2861, %v127_v0   ;;  %160 = vperm.xlu0 %2860, %v125_v1   ;;  %v126_v4 = vld [vmem:[%s5551_s0 + $0x8] sm:$0xff]  ;;  %v141_v5 = vld [vmem:[%s5551_s0 + $0x80] sm:$0xff]  ;;  %v143_v7 = vld [vmem:[%s5551_s0 + $0x90] sm:$0xff] }
   0x3   :  { %v129_v6 = vld [vmem:[%s5551_s0 + $0x20] sm:$0xff]  ;;  %v142_v8 = vld [vmem:[%s5551_s0 + $0x88] sm:$0xff]  ;;  %v144_v10 = vld [vmem:[%s5551_s0 + $0x98] sm:$0xff] }
   0x4   :  { %v130_v9 = vld [vmem:[%s5551_s0 + $0x28] sm:$0xff]  ;;  %v145_v12 = vld [vmem:[%s5551_s0 + $0xa0] sm:$0xff]  ;;  %v132_v13 = vld [vmem:[%s5551_s0 + $0x38] sm:$0xff] }
   0x5   :  { %v146_v11 = vld [vmem:[%s5551_s0 + $0xa8] sm:$0xff]  ;;  %v131_v14 = vld [vmem:[%s5551_s0 + $0x30] sm:$0xff]  ;;  %v148_v15 = vld [vmem:[%s5551_s0 + $0xb8] sm:$0xff] }
   0x6   :  { %175 = vperm.xlu1 %2861, %v128_v3   ;;  %165 = vperm.xlu0 %2860, %v126_v4   ;;  %v147_v16 = vld [vmem:[%s5551_s0 + $0xb0] sm:$0xff] }
   0xa   :  { %240 = vperm.xlu1 %2861, %v141_v5   ;;  %180 = vperm.xlu0 %2860, %v129_v6  }
   0xe   :  { %250 = vperm.xlu1 %2861, %v143_v7   ;;  %245 = vperm.xlu0 %2860, %v142_v8  }
  0x12   :  { %185 = vperm.xlu1 %2861, %v130_v9   ;;  %255 = vperm.xlu0 %2860, %v144_v10  }
  0x16   :  { %265 = vperm.xlu1 %2861, %v146_v11   ;;  %260 = vperm.xlu0 %2860, %v145_v12  }
  0x1a   :  { %195 = vperm.xlu1 %2861, %v132_v13   ;;  %190 = vperm.xlu0 %2860, %v131_v14  }
  0x1b   :  { %10 = vsyncpa [#allocation5], 0  ;;  %v134_v17 = vld [vmem:[%s5551_s0 + $0x48] sm:$0xff]  ;;  %v133_v18 = vld [vmem:[%s5551_s0 + $0x40] sm:$0xff]  ;;  %v319_v43 = vlaneseq }
  0x1c   :  { %v150_v19 = vld [vmem:[%s5551_s0 + $0xc8] sm:$0xff]  ;;  %v149_v20 = vld [vmem:[%s5551_s0 + $0xc0] sm:$0xff]  ;;  %v136_v21 = vld [vmem:[%s5551_s0 + $0x58] sm:$0xff] }
  0x1d   :  { %v135_v22 = vld [vmem:[%s5551_s0 + $0x50] sm:$0xff]  ;;  %v152_v23 = vld [vmem:[%s5551_s0 + $0xd8] sm:$0xff]  ;;  %v138_v25 = vld [vmem:[%s5551_s0 + $0x68] sm:$0xff]  ;;  %v320_v52 = vshrl.u32 %v319_v43, 7 }
  0x1e   :  { %275 = vperm.xlu1 %2861, %v148_v15   ;;  %270 = vperm.xlu0 %2860, %v147_v16   ;;  %v151_v24 = vld [vmem:[%s5551_s0 + $0xd0] sm:$0xff]  ;;  %v137_v26 = vld [vmem:[%s5551_s0 + $0x60] sm:$0xff]  ;;  %v94_v28 = vld [vmem:[%s5553_s2 + $0x8] sm:$0xff] }
  0x1f   :  { %v93_v27 = vld [vmem:[%s5553_s2] sm:$0xff]  ;;  %vm110_vm1 = vnez %v94_v28  ;;  %v154_v29 = vld [vmem:[%s5551_s0 + $0xe8] sm:$0xff]  ;;  %v140_v35 = vld [vmem:[%s5551_s0 + $0x78] sm:$0xff]  ;;  %v321_v3 = vsub.s32 0, %v320_v52  ;;  %v325_v4 = vsub.s32 1, %v320_v52 }
  0x20   :  { %vm109_vm0 = vnez %v93_v27  ;;  %v153_v30 = vld [vmem:[%s5551_s0 + $0xe0] sm:$0xff]  ;;  %v3292_v32 = vsel %vm110_vm1, 16843009, %v5557_v2  ;;  %v102_v34 = vld [vmem:[%s5553_s2 + $0x48] sm:$0xff]  ;;  %v139_v36 = vld [vmem:[%s5551_s0 + $0x70] sm:$0xff] }
  0x21   :  { %v3289_v31 = vsel %vm109_vm0, 16843009, %v5557_v2  ;;  %v101_v33 = vld [vmem:[%s5553_s2 + $0x40] sm:$0xff]  ;;  %v538_v38 = vunpack.c.0.s8 %v3292_v32  ;;  %vm118_vm3 = vnez %v102_v34  ;;  %v540_v40 = vunpack.c.1.s8 %v3292_v32  ;;  %v156_v41 = vld [vmem:[%s5551_s0 + $0xf8] sm:$0xff]  ;;  %v155_v42 = vld [vmem:[%s5551_s0 + $0xf0] sm:$0xff] }
  0x22   :  { %205 = vperm.xlu1 %2861, %v134_v17   ;;  %200 = vperm.xlu0 %2860, %v133_v18   ;;  %v537_v37 = vunpack.c.0.s8 %v3289_v31  ;;  %vm117_vm2 = vnez %v101_v33  ;;  %v539_v39 = vunpack.c.1.s8 %v3289_v31  ;;  %v541_v46 = vunpack.c.2.s8 %v3289_v31  ;;  %v95_v49 = vld [vmem:[%s5553_s2 + $0x10] sm:$0xff]  ;;  %v96_v50 = vld [vmem:[%s5553_s2 + $0x18] sm:$0xff]  ;;  %v157_v6 = vld [vmem:[%s5552_s1] sm:$0x3] }
  0x23   :  { %v3317_v44 = vsel %vm117_vm2, 16843009, %v5557_v2  ;;  %v542_v47 = vunpack.c.2.s8 %v3292_v32  ;;  %v3322_v48 = vsel %vm118_vm3, 16843009, %v5557_v2  ;;  %vm111_vm4 = vnez %v95_v49  ;;  %v103_v62 = vld [vmem:[%s5553_s2 + $0x50] sm:$0xff]  ;;  %v104_v1 = vld [vmem:[%s5553_s2 + $0x58] sm:$0xff] }
  0x24   :  { %v601_v45 = vpack.c.b16 %v538_v38, %v537_v37  ;;  %v603_v51 = vpack.c.b16 %v540_v40, %v539_v39  ;;  %v569_v53 = vunpack.c.0.s8 %v3317_v44  ;;  %v570_v54 = vunpack.c.0.s8 %v3322_v48  ;;  %v97_v33 = vld [vmem:[%s5553_s2 + $0x20] sm:$0xff]  ;;  %v98_v34 = vld [vmem:[%s5553_s2 + $0x28] sm:$0xff] }
  0x25   :  { %v605_v56 = vpack.c.b16 %v542_v47, %v541_v46  ;;  %vm112_vm5 = vnez %v96_v50  ;;  %v573_v57 = vunpack.c.2.s8 %v3317_v44  ;;  %v574_v58 = vunpack.c.2.s8 %v3322_v48 }
  0x26   :  { %285 = vperm.xlu1 %2861, %v150_v19   ;;  %280 = vperm.xlu0 %2860, %v149_v20   ;;  %v602_v55 = vpack.c.b8 %v601_v45, %v601_v45  ;;  %v571_v59 = vunpack.c.1.s8 %v3317_v44  ;;  %v572_v60 = vunpack.c.1.s8 %v3322_v48  ;;  %v604_v61 = vpack.c.b8 %v603_v51, %v603_v51 }
  0x27   :  { %v3340_v63 = vsel %vm111_vm4, 16843009, %v5557_v2  ;;  %v3343_v0 = vsel %vm112_vm5, 16843009, %v5557_v2  ;;  %v606_v5 = vpack.c.b8 %v605_v56, %v605_v56  ;;  %v633_v7 = vpack.c.b16 %v570_v54, %v569_v53 }
  0x28   :  { %vm665_vm6 = vnez %v602_v55  ;;  %v637_v8 = vpack.c.b16 %v574_v58, %v573_v57  ;;  %v635_v9 = vpack.c.b16 %v572_v60, %v571_v59  ;;  %vm119_vm7 = vnez %v103_v62 }
  0x29   :  { %vm666_vm8 = vnez %v604_v61  ;;  %v545_v10 = vunpack.c.0.s8 %v3340_v63  ;;  %v546_v11 = vunpack.c.0.s8 %v3343_v0  ;;  %vm120_vm9 = vnez %v104_v1 }
  0x2a   :  { %215 = vperm.xlu1 %2861, %v136_v21   ;;  %210 = vperm.xlu0 %2860, %v135_v22   ;;  %v3354_v12 = vsel %vm665_vm6, 16843009, %v5557_v2  ;;  %v543_v13 = vunpack.c.3.s8 %v3289_v31  ;;  %v544_v14 = vunpack.c.3.s8 %v3292_v32  ;;  %v3358_v15 = vrot.slane %v157_v6, %v321_v3 }
  0x2b   :  { %vm667_vm10 = vnez %v606_v5  ;;  %v3361_v16 = vsel %vm119_vm7, 16843009, %v5557_v2  ;;  %v3363_v17 = vrot.slane %v157_v6, %v325_v4  ;;  %v3366_v18 = vsel %vm666_vm8, 16843009, %v5557_v2 }
  0x2c   :  { %v634_v19 = vpack.c.b8 %v633_v7, %v633_v7  ;;  %v3369_v20 = vsel %vm120_vm9, 16843009, %v5557_v2  ;;  %v729_v21 = vunpack.c.0.s8 %v3354_v12  ;;  %v638_v22 = vpack.c.b8 %v637_v8, %v637_v8 }
  0x2d   :  { %v577_v27 = vunpack.c.0.s8 %v3361_v16  ;;  %v575_v28 = vunpack.c.3.s8 %v3317_v44  ;;  %v549_v31 = vunpack.c.2.s8 %v3340_v63  ;;  %v550_v32 = vunpack.c.2.s8 %v3343_v0 }
  0x2e   :  { %295 = vperm.xlu1 %2861, %v152_v23   ;;  %290 = vperm.xlu0 %2860, %v151_v24   ;;  %v636_v23 = vpack.c.b8 %v635_v9, %v635_v9  ;;  %v609_v24 = vpack.c.b16 %v546_v11, %v545_v10  ;;  %v732_v37 = vunpack.c.1.s8 %v3366_v18  ;;  %vm3390_vm11 = vnez %v634_v19 }
  0x2f   :  { %vm3395_vm12 = vnez %v638_v22  ;;  %v547_v44 = vunpack.c.1.s8 %v3340_v63  ;;  %vm113_vm14 = vnez %v97_v33  ;;  %vm114_vm15 = vnez %v98_v34 }
  0x30   :  { %vm3399_vm13 = vnez %v636_v23  ;;  %v613_v47 = vpack.c.b16 %v550_v32, %v549_v31  ;;  %v581_v49 = vunpack.c.2.s8 %v3361_v16  ;;  %v582_v50 = vunpack.c.2.s8 %v3369_v20 }
  0x31   :  { %v579_v51 = vunpack.c.1.s8 %v3361_v16  ;;  %v580_v52 = vunpack.c.1.s8 %v3369_v20  ;;  %v3413_v54 = vsel %vm3390_vm11, 16843009, %v5557_v2  ;;  %v3416_v55 = vsel %vm113_vm14, 16843009, %v5557_v2 }
  0x32   :  { %225 = vperm.xlu1 %2861, %v138_v25   ;;  %220 = vperm.xlu0 %2860, %v137_v26   ;;  %v3373_v25 = vsel %vm667_vm10, 16843009, %v5557_v2  ;;  %v607_v26 = vpack.c.b16 %v544_v14, %v543_v13  ;;  %v3419_v56 = vsel %vm114_vm15, 16843009, %v5557_v2  ;;  %v3424_v57 = vsel %vm3395_vm12, 16843009, %v5557_v2 }
  0x33   :  { %v733_v39 = vunpack.c.0.s8 %v3373_v25  ;;  %v734_v53 = vunpack.c.1.s8 %v3373_v25  ;;  %v3429_v58 = vsel %vm3399_vm13, 16843009, %v5557_v2  ;;  %v614_v1 = vpack.c.b8 %v613_v47, %v613_v47 }
  0x34   :  { %v608_v43 = vpack.c.b8 %v607_v26, %v607_v26  ;;  %v645_v4 = vpack.c.b16 %v582_v50, %v581_v49  ;;  %v643_v5 = vpack.c.b16 %v580_v52, %v579_v51  ;;  %v553_v6 = vunpack.c.0.s8 %v3416_v55  ;;  %v105_v26 = vld [vmem:[%s5553_s2 + $0x60] sm:$0xff] }
  0x35   :  { %v554_v7 = vunpack.c.0.s8 %v3419_v56  ;;  %v761_v8 = vunpack.c.0.s8 %v3413_v54  ;;  %v762_v9 = vunpack.c.1.s8 %v3413_v54  ;;  %v551_v10 = vunpack.c.3.s8 %v3340_v63 }
  0x36   :  { %305 = vperm.xlu1 %2861, %v154_v29   ;;  %300 = vperm.xlu0 %2860, %v153_v30   ;;  %v578_v29 = vunpack.c.0.s8 %v3369_v20  ;;  %v576_v30 = vunpack.c.3.s8 %v3322_v48  ;;  %v548_v48 = vunpack.c.1.s8 %v3343_v0  ;;  %vm3435_vm1 = vnez %v608_v43 }
  0x37   :  { %v552_v11 = vunpack.c.3.s8 %v3343_v0  ;;  %v765_v13 = vunpack.c.0.s8 %v3424_v57  ;;  %v766_v14 = vunpack.c.1.s8 %v3424_v57  ;;  %v3456_v23 = vsel %vm3435_vm1, 16843009, %v5557_v2 }
  0x38   :  { %v641_v45 = vpack.c.b16 %v578_v29, %v577_v27  ;;  %v639_v46 = vpack.c.b16 %v576_v30, %v575_v28  ;;  %v611_v3 = vpack.c.b16 %v548_v48, %v547_v44  ;;  %v106_v27 = vld [vmem:[%s5553_s2 + $0x68] sm:$0xff]  ;;  %vm671_vm4 = vnez %v614_v1 }
  0x39   :  { %v646_v28 = vpack.c.b8 %v645_v4, %v645_v4  ;;  %v644_v29 = vpack.c.b8 %v643_v5, %v643_v5  ;;  %v617_v30 = vpack.c.b16 %v554_v7, %v553_v6  ;;  %v615_v32 = vpack.c.b16 %v552_v11, %v551_v10 }
  0x3a   :  { %235 = vperm.xlu1 %2861, %v140_v35   ;;  %230 = vperm.xlu0 %2860, %v139_v36   ;;  %v730_v35 = vunpack.c.1.s8 %v3354_v12  ;;  %v731_v36 = vunpack.c.0.s8 %v3366_v18  ;;  %v642_v61 = vpack.c.b8 %v641_v45, %v641_v45  ;;  %v640_v62 = vpack.c.b8 %v639_v46, %v639_v46 }
  0x3b   :  { %v583_v33 = vunpack.c.3.s8 %v3361_v16  ;;  %v584_v34 = vunpack.c.3.s8 %v3369_v20  ;;  %vm121_vm5 = vnez %v105_v26  ;;  %vm122_vm6 = vnez %v106_v27  ;;  %v100_v26 = vld [vmem:[%s5553_s2 + $0x38] sm:$0xff] }
  0x3c   :  { %vm3458_vm2 = vnez %v642_v61  ;;  %vm3462_vm3 = vnez %v640_v62  ;;  %v3489_v16 = vsel %vm671_vm4, 16843009, %v5557_v2  ;;  %vm687_vm8 = vnez %v646_v28 }
  0x3d   :  { %v3486_v43 = vsel %vm3462_vm3, 16843009, %v5557_v2  ;;  %vm686_vm9 = vnez %v644_v29  ;;  %v618_v20 = vpack.c.b8 %v617_v30, %v617_v30  ;;  %v616_v44 = vpack.c.b8 %v615_v32, %v615_v32 }
  0x3e   :  { %315 = vperm.xlu1 %2861, %v156_v41   ;;  %310 = vperm.xlu0 %2860, %v155_v42   ;;  %v610_v42 = vpack.c.b8 %v609_v24, %v609_v24  ;;  %v612_v24 = vpack.c.b8 %v611_v3, %v611_v3  ;;  %v3492_v45 = vsel %vm121_vm5, 16843009, %v5557_v2  ;;  %v3495_v46 = vsel %vm122_vm6, 16843009, %v5557_v2 }
  0x3f   :  { %v647_v47 = vpack.c.b16 %v584_v34, %v583_v33  ;;  %v3507_v61 = vsel %vm687_vm8, 16843009, %v5557_v2  ;;  %v3510_v62 = vsel %vm686_vm9, 16843009, %v5557_v2  ;;  %vm3512_vm10 = vnez %v618_v20 }
  0x40   :  { %vm3431_vm0 = vnez %v610_v42  ;;  %v3481_v42 = vsel %vm3458_vm2, 16843009, %v5557_v2  ;;  %vm670_vm7 = vnez %v612_v24  ;;  %v585_v3 = vunpack.c.0.s8 %v3492_v45  ;;  %v99_v24 = vld [vmem:[%s5553_s2 + $0x30] sm:$0xff] }
  0x41   :  { %v3451_v22 = vsel %vm3431_vm0, 16843009, %v5557_v2  ;;  %v3504_v60 = vsel %vm670_vm7, 16843009, %v5557_v2  ;;  %v586_v4 = vunpack.c.0.s8 %v3495_v46  ;;  %vm672_vm11 = vnez %v616_v44  ;;  %v107_v44 = vld [vmem:[%s5553_s2 + $0x70] sm:$0xff] }
  0x42   :  { %v648_v5 = vpack.c.b8 %v647_v47, %v647_v47  ;;  %v557_v6 = vunpack.c.2.s8 %v3416_v55  ;;  %v558_v7 = vunpack.c.2.s8 %v3419_v56  ;;  %v3536_v30 = vsel %vm3512_vm10, 16843009, %v5557_v2  ;;  %v108_v47 = vld [vmem:[%s5553_s2 + $0x78] sm:$0xff] }
  0x43   :  { %v3539_v32 = vsel %vm672_vm11, 16843009, %v5557_v2  ;;  %v649_v33 = vpack.c.b16 %v586_v4, %v585_v3  ;;  %v555_v34 = vunpack.c.1.s8 %v3416_v55  ;;  %v556_v20 = vunpack.c.1.s8 %v3419_v56 }
  0x44   :  { %vm3549_vm12 = vnez %v648_v5  ;;  %v621_v29 = vpack.c.b16 %v558_v7, %v557_v6  ;;  %vm115_vm13 = vnez %v99_v24  ;;  %vm116_vm14 = vnez %v100_v26 }
  0x45   :  { %v589_v3 = vunpack.c.2.s8 %v3492_v45  ;;  %v590_v4 = vunpack.c.2.s8 %v3495_v46  ;;  %v587_v28 = vunpack.c.1.s8 %v3492_v45  ;;  %v588_v27 = vunpack.c.1.s8 %v3495_v46 }
  0x46   :  { %vm123_vm15 = vnez %v107_v44  ;;  %vm124_vm0 = vnez %v108_v47  ;;  %v650_v5 = vpack.c.b8 %v649_v33, %v649_v33  ;;  %v619_v11 = vpack.c.b16 %v556_v20, %v555_v34 }
  0x47   :  { %v3560_v6 = vsel %vm115_vm13, 16843009, %v5557_v2  ;;  %v3563_v7 = vsel %vm116_vm14, 16843009, %v5557_v2  ;;  %v3570_v0 = vsel %vm3549_vm12, 16843009, %v5557_v2  ;;  %v622_v63 = vpack.c.b8 %v621_v29, %v621_v29 }
  0x48   :  { %v653_v44 = vpack.c.b16 %v590_v4, %v589_v3  ;;  %v651_v47 = vpack.c.b16 %v588_v27, %v587_v28  ;;  %v3573_v33 = vsel %vm123_vm15, 16843009, %v5557_v2  ;;  %v3576_v34 = vsel %vm124_vm0, 16843009, %v5557_v2 }
  0x49   :  { %v561_v20 = vunpack.c.0.s8 %v3560_v6  ;;  %v562_v24 = vunpack.c.0.s8 %v3563_v7  ;;  %v559_v26 = vunpack.c.3.s8 %v3416_v55  ;;  %v560_v10 = vunpack.c.3.s8 %v3419_v56 }
  0x4a   :  { %vm689_vm1 = vnez %v650_v5  ;;  %v620_v1 = vpack.c.b8 %v619_v11, %v619_v11  ;;  %v591_v29 = vunpack.c.3.s8 %v3492_v45  ;;  %v592_v27 = vunpack.c.3.s8 %v3495_v46 }
  0x4b   :  { %v593_v4 = vunpack.c.0.s8 %v3573_v33  ;;  %v594_v59 = vunpack.c.0.s8 %v3576_v34  ;;  %vm675_vm2 = vnez %v622_v63  ;;  %v654_v52 = vpack.c.b8 %v653_v44, %v653_v44 }
  0x4c   :  { %v565_v55 = vunpack.c.2.s8 %v3560_v6  ;;  %v566_v56 = vunpack.c.2.s8 %v3563_v7  ;;  %v3591_v11 = vsel %vm689_vm1, 16843009, %v5557_v2  ;;  %v652_v45 = vpack.c.b8 %v651_v47, %v651_v47 }
  0x4d   :  { %v625_v5 = vpack.c.b16 %v562_v24, %v561_v20  ;;  %v623_v46 = vpack.c.b16 %v560_v10, %v559_v26  ;;  %vm674_vm3 = vnez %v620_v1  ;;  %v655_v28 = vpack.c.b16 %v592_v27, %v591_v29 }
  0x4e   :  { %v563_v3 = vunpack.c.1.s8 %v3560_v6  ;;  %v564_v51 = vunpack.c.1.s8 %v3563_v7  ;;  %v3596_v50 = vsel %vm675_vm2, 16843009, %v5557_v2  ;;  %v657_v63 = vpack.c.b16 %v594_v59, %v593_v4 }
  0x4f   :  { %v597_v44 = vunpack.c.2.s8 %v3573_v33  ;;  %v598_v49 = vunpack.c.2.s8 %v3576_v34  ;;  %vm3602_vm4 = vnez %v654_v52  ;;  %v629_v24 = vpack.c.b16 %v566_v56, %v565_v55 }
  0x50   :  { %v3607_v26 = vsel %vm674_vm3, 16843009, %v5557_v2  ;;  %vm690_vm5 = vnez %v652_v45  ;;  %v626_v20 = vpack.c.b8 %v625_v5, %v625_v5  ;;  %v624_v1 = vpack.c.b8 %v623_v46, %v623_v46 }
  0x51   :  { %v656_v59 = vpack.c.b8 %v655_v28, %v655_v28  ;;  %v627_v29 = vpack.c.b16 %v564_v51, %v563_v3  ;;  %v595_v27 = vunpack.c.1.s8 %v3573_v33  ;;  %v596_v4 = vunpack.c.1.s8 %v3576_v34 }
  0x52   :  { %v658_v47 = vpack.c.b8 %v657_v63, %v657_v63  ;;  %v661_v41 = vpack.c.b16 %v598_v49, %v597_v44  ;;  %v3618_v45 = vsel %vm3602_vm4, 16843009, %v5557_v2  ;;  %v630_v51 = vpack.c.b8 %v629_v24, %v629_v24 }
  0x53   :  { %v3621_v28 = vsel %vm690_vm5, 16843009, %v5557_v2  ;;  %vm677_vm6 = vnez %v626_v20  ;;  %v567_v3 = vunpack.c.3.s8 %v3560_v6  ;;  %v568_v5 = vunpack.c.3.s8 %v3563_v7 }
  0x54   :  { %vm676_vm7 = vnez %v624_v1  ;;  %vm692_vm8 = vnez %v656_v59  ;;  %v628_v49 = vpack.c.b8 %v627_v29, %v627_v29  ;;  %v659_v46 = vpack.c.b16 %v596_v4, %v595_v27 }
  0x55   :  { %vm693_vm9 = vnez %v658_v47  ;;  %v662_v10 = vpack.c.b8 %v661_v41, %v661_v41  ;;  %v3628_v24 = vsel %vm677_vm6, 16843009, %v5557_v2  ;;  %vm679_vm10 = vnez %v630_v51 }
  0x56   :  { %v599_v20 = vunpack.c.3.s8 %v3573_v33  ;;  %v600_v6 = vunpack.c.3.s8 %v3576_v34  ;;  %v3634_v1 = vsel %vm676_vm7, 16843009, %v5557_v2  ;;  %v3637_v59 = vsel %vm692_vm8, 16843009, %v5557_v2 }
  0x57   :  { %v631_v29 = vpack.c.b16 %v568_v5, %v567_v3  ;;  %v3641_v41 = vsel %vm693_vm9, 16843009, %v5557_v2  ;;  %vm678_vm11 = vnez %v628_v49  ;;  %v660_v27 = vpack.c.b8 %v659_v46, %v659_v46 }
  0x58   :  { %vm3645_vm12 = vcmp.ne.s32.totalorder %v729_v21, 0  ;;  %v5800_v33 = vmov 0  ;;  %vm3651_vm13 = vcmp.ne.s32.totalorder %v730_v35, 0  ;;  %v5803_v34 = vmov 0 }
  0x59   :  { %v5801_v33 = vsel %vm3645_vm12, 4294967295, %v5800_v33  ;;  %v5804_v34 = vsel %vm3651_vm13, 4294967295, %v5803_v34  ;;  %v3658_v3 = vsel %vm679_vm10, 16843009, %v5557_v2  ;;  %vm695_vm14 = vnez %v662_v10 }
  0x5a   :  { %5802 = vst [vmem:[#allocation7_spill] sm:$0xff] %v5801_v33  ;;  %5805 = vst [vmem:[#allocation8_spill] sm:$0xff] %v5804_v34  ;;  %v3663_v46 = vpack.c.b16 %v600_v6, %v599_v20  ;;  %vm3667_vm15 = vcmp.ne.s32.totalorder %v733_v39, 0  ;;  %v5807_v12 = vmov 0  ;;  %v3674_v10 = vsel %vm678_vm11, 16843009, %v5557_v2 }
  0x5b   :  { %v5808_v12 = vsel %vm3667_vm15, 4294967295, %v5807_v12  ;;  %5810 = vst [vmem:[#allocation11_spill] sm:$0xff] %v3674_v10  ;;  %v632_v5 = vpack.c.b8 %v631_v29, %v631_v29  ;;  %v3679_v6 = vsel %vm695_vm14, 16843009, %v5557_v2  ;;  %vm3681_vm0 = vnez %v660_v27 }
  0x5c   :  { %5806 = vst [vmem:[#allocation9_spill] sm:$0xff] %v3663_v46  ;;  %5809 = vst [vmem:[#allocation10_spill] sm:$0xff] %v5808_v12  ;;  %vm3693_vm1 = vcmp.ne.s32.totalorder %v731_v36, 0  ;;  %v5814_v20 = vmov 0  ;;  %vm3699_vm2 = vcmp.ne.s32.totalorder %v732_v37, 0  ;;  %v5817_v27 = vmov 0 }
  0x5d   :  { %5811 = vst [vmem:[#allocation12_spill] sm:$0xff] %v3679_v6  ;;  %v5815_v20 = vsel %vm3693_vm1, 4294967295, %v5814_v20  ;;  %v5818_v27 = vsel %vm3699_vm2, 4294967295, %v5817_v27  ;;  %vm3710_vm3 = vcmp.ne.s32.totalorder %v734_v53, 0  ;;  %v5820_v63 = vmov 0 }
  0x5e   :  { %5816 = vst [vmem:[#allocation13_spill] sm:$0xff] %v5815_v20  ;;  %5819 = vst [vmem:[#allocation14_spill] sm:$0xff] %v5818_v27  ;;  %v5821_v63 = vsel %vm3710_vm3, 4294967295, %v5820_v63  ;;  %vm3715_vm4 = vnez %v632_v5  ;;  %v3724_v25 = vsel %vm3681_vm0, 16843009, %v5557_v2  ;;  %vm3736_vm5 = vcmp.ne.s32.totalorder %v761_v8, 0 }
  0x5f   :  { %5822 = vst [vmem:[#allocation15_spill] sm:$0xff] %v5821_v63  ;;  %5825 = vst [vmem:[#allocation16_spill] sm:$0xff] %v3724_v25  ;;  %v5826_v52 = vmov 0  ;;  %vm3742_vm6 = vcmp.ne.s32.totalorder %v762_v9, 0  ;;  %v5829_v39 = vmov 0  ;;  %vm3777_vm7 = vcmp.ne.s32.totalorder %v765_v13, 0 }
  0x60   :  { %v5827_v52 = vsel %vm3736_vm5, 4294967295, %v5826_v52  ;;  %v5830_v39 = vsel %vm3742_vm6, 4294967295, %v5829_v39  ;;  %v3749_v40 = vsel %vm3715_vm4, 16843009, %v5557_v2  ;;  %vm3783_vm8 = vcmp.ne.s32.totalorder %v766_v14, 0 }
  0x61   :  { %5828 = vst [vmem:[#allocation17_spill] sm:$0xff] %v5827_v52  ;;  %5831 = vst [vmem:[#allocation18_spill] sm:$0xff] %v5830_v39  ;;  %v5841_v57 = vunpack.c.0.s8 %v3429_v58  ;;  %v5842_v14 = vmov 0  ;;  %v5845_v33 = vunpack.c.1.s8 %v3429_v58  ;;  %v5850_v58 = vunpack.c.0.s8 %v3451_v22 }
  0x62   :  { %v5854_v27 = vunpack.c.1.s8 %v3451_v22  ;;  %v5864_v46 = vmov 0 }
  0x63   :  { %vm3798_vm9 = vcmp.ne.s32.totalorder %v5841_v57, 0  ;;  %vm3804_vm10 = vcmp.ne.s32.totalorder %v5845_v33, 0  ;;  %vm3822_vm11 = vcmp.ne.s32.totalorder %v5850_v58, 0  ;;  %v5851_v33 = vmov 0 }
  0x64   :  { %v5843_v14 = vsel %vm3798_vm9, 4294967295, %v5842_v14  ;;  %v5852_v33 = vsel %vm3822_vm11, 4294967295, %v5851_v33  ;;  %vm3833_vm14 = vcmp.ne.s32.totalorder %v5854_v27, 0  ;;  %v5858_v58 = vunpack.c.0.s8 %v3456_v23 }
  0x65   :  { %5844 = vst [vmem:[#allocation24_spill] sm:$0xff] %v5843_v14  ;;  %5853 = vst [vmem:[#allocation27_spill] sm:$0xff] %v5852_v33 }
  0x66   :  { %vm3839_vm0 = vcmp.ne.s32.totalorder %v5858_v58, 0  ;;  %v5863_v58 = vunpack.c.1.s8 %v3456_v23 }
  0x68   :  { %vm3853_vm4 = vcmp.ne.s32.totalorder %v5863_v58, 0 }
  0x69   :  { %v5865_v46 = vsel %vm3853_vm4, 4294967295, %v5864_v46 }
  0x6a   :  { %5866 = vst [vmem:[#allocation31_spill] sm:$0xff] %v5865_v46 }
  0x81   :  { %v171_v4 = vpop.permute.xlu1 %170  ;;  %v161_v21 = vpop.permute.xlu0 %160 }
  0x82   :  { %v333_v35 = vadd.f32 %v3358_v15, %v171_v4  ;;  %v3687_v51 = vadd.f32 %v3363_v17, %v171_v4  ;;  %v329_v29 = vadd.f32 %v3358_v15, %v161_v21  ;;  %v330_v47 = vadd.f32 %v3363_v17, %v161_v21 }
  0x84   :  { %v397_v44 = vmul.f32 0.2, %v333_v35  ;;  %v393_v36 = vmul.f32 0.2, %v329_v29  ;;  %v398_v4 = vmul.f32 0.2, %v3687_v51 }
  0x85   :  { %v394_v7 = vmul.f32 0.2, %v330_v47  ;;  %v176_v49 = vpop.permute.xlu1 %175  ;;  %v166_v56 = vpop.permute.xlu0 %165 }
  0x86   :  { %v3727_v53 = vadd.f32 %v3358_v15, %v176_v49  ;;  %v3730_v5 = vadd.f32 %v3363_v17, %v176_v49  ;;  %v331_v18 = vadd.f32 %v3358_v15, %v166_v56  ;;  %v332_v55 = vadd.f32 %v3363_v17, %v166_v56 }
  0x87   :  { %v457_v21 = vmax.f32 %v329_v29, %v393_v36  ;;  %v458_v48 = vmax.f32 %v330_v47, %v394_v7  ;;  %v461_v49 = vmax.f32 %v333_v35, %v397_v44  ;;  %v462_v47 = vmax.f32 %v3687_v51, %v398_v4 }
  0x88   :  { %v3752_v56 = vmul.f32 0.2, %v3727_v53  ;;  %v3755_v8 = vmul.f32 0.2, %v3730_v5  ;;  %v395_v38 = vmul.f32 0.2, %v331_v18 }
  0x89   :  { %v396_v9 = vmul.f32 0.2, %v332_v55  ;;  %v241_v31 = vpop.permute.xlu1 %240  ;;  %v181_v19 = vpop.permute.xlu0 %180  ;;  %v3760_v44 = vsel %vm3645_vm12, %v457_v21, -1e+30  ;;  %v3764_v7 = vsel %vm3651_vm13, %v458_v48, -1e+30 }
  0x8a   :  { %5832 = vst [vmem:[#allocation19_spill] sm:$0xff] %v3760_v44  ;;  %5833 = vst [vmem:[#allocation20_spill] sm:$0xff] %v3764_v7  ;;  %v361_v35 = vadd.f32 %v3358_v15, %v241_v31  ;;  %v362_v29 = vadd.f32 %v3363_v17, %v241_v31  ;;  %v3770_v36 = vadd.f32 %v3358_v15, %v181_v19  ;;  %v5834_v21 = vmov 0 }
  0x8b   :  { %v3773_v37 = vadd.f32 %v3363_v17, %v181_v19  ;;  %v5835_v21 = vsel %vm3777_vm7, 4294967295, %v5834_v21  ;;  %v5837_v48 = vmov 0  ;;  %v953_v31 = vmax.f32 %v3760_v44, %v3764_v7 }
  0x8c   :  { %5836 = vst [vmem:[#allocation21_spill] sm:$0xff] %v5835_v21  ;;  %v5838_v48 = vsel %vm3783_vm8, 4294967295, %v5837_v48  ;;  %v459_v51 = vmax.f32 %v331_v18, %v395_v38  ;;  %v460_v4 = vmax.f32 %v332_v55, %v396_v9  ;;  %v3791_v19 = vsel %vm3667_vm15, %v461_v49, -1e+30 }
  0x8d   :  { %5839 = vst [vmem:[#allocation22_spill] sm:$0xff] %v5838_v48  ;;  %5840 = vst [vmem:[#allocation23_spill] sm:$0xff] %v3791_v19  ;;  %v425_v2 = vmul.f32 0.2, %v361_v35  ;;  %v426_v13 = vmul.f32 0.2, %v362_v29  ;;  %954 = vmax.xlane.f32.xlu0 %v953_v31  ;;  %v251_v49 = vpop.permute.xlu1 %250  ;;  %v246_v9 = vpop.permute.xlu0 %245  ;;  %v463_v6 = vmax.f32 %v3727_v53, %v3752_v56 }
  0x8e   :  { %v3794_v54 = vmul.f32 0.2, %v3770_v36  ;;  %v5846_v38 = vmov 0  ;;  %v3810_v18 = vmul.f32 0.2, %v3773_v37  ;;  %v365_v31 = vadd.f32 %v3358_v15, %v251_v49 }
  0x8f   :  { %v5847_v38 = vsel %vm3804_vm10, 4294967295, %v5846_v38  ;;  %v3814_v57 = vsel %vm3693_vm1, %v459_v51, -1e+30  ;;  %v3818_v12 = vsel %vm3699_vm2, %v460_v4, -1e+30  ;;  %v366_v34 = vadd.f32 %v3363_v17, %v251_v49 }
  0x90   :  { %5848 = vst [vmem:[#allocation25_spill] sm:$0xff] %v5847_v38  ;;  %5849 = vst [vmem:[#allocation26_spill] sm:$0xff] %v3818_v12  ;;  %v363_v20 = vadd.f32 %v3358_v15, %v246_v9  ;;  %v364_v51 = vadd.f32 %v3363_v17, %v246_v9  ;;  %v5855_v4 = vmov 0  ;;  %v5859_v7 = vmov 0 }
  0x91   :  { %v5856_v4 = vsel %vm3833_vm14, 4294967295, %v5855_v4  ;;  %v5860_v7 = vsel %vm3839_vm0, 4294967295, %v5859_v7  ;;  %v956_v55 = vmax.f32 %v3814_v57, %v3818_v12  ;;  %v3847_v49 = vsel %vm3710_vm3, %v462_v47, -1e+30  ;;  %v186_v12 = vpop.permute.xlu1 %185  ;;  %v256_v63 = vpop.permute.xlu0 %255 }
  0x92   :  { %5857 = vst [vmem:[#allocation28_spill] sm:$0xff] %v5856_v4  ;;  %5861 = vst [vmem:[#allocation29_spill] sm:$0xff] %v5860_v7  ;;  %v489_v9 = vmax.f32 %v361_v35, %v425_v2  ;;  %v490_v44 = vmax.f32 %v362_v29, %v426_v13  ;;  %v429_v22 = vmul.f32 0.2, %v365_v31  ;;  %v430_v27 = vmul.f32 0.2, %v366_v34 }
  0x93   :  { %5862 = vst [vmem:[#allocation30_spill] sm:$0xff] %v3847_v49  ;;  %v427_v25 = vmul.f32 0.2, %v363_v20  ;;  %v428_v10 = vmul.f32 0.2, %v364_v51  ;;  %957 = vmax.xlane.f32.xlu1 %v956_v55  ;;  %v959_v2 = vmax.f32 %v3791_v19, %v3847_v49  ;;  %v3868_v23 = vadd.f32 %v3358_v15, %v186_v12 }
  0x94   :  { %v3861_v47 = vsel %vm3736_vm5, %v489_v9, -1e+30  ;;  %v3865_v53 = vsel %vm3742_vm6, %v490_v44, -1e+30  ;;  %v3871_v56 = vadd.f32 %v3363_v17, %v186_v12  ;;  %v3874_v35 = vadd.f32 %v3358_v15, %v256_v63 }
  0x95   :  { %v3877_v29 = vadd.f32 %v3363_v17, %v256_v63  ;;  %v5867_v13 = vunpack.c.0.s8 %v3481_v42  ;;  %v5868_v55 = vmov 0  ;;  %v5871_v44 = vunpack.c.1.s8 %v3481_v42 }
  0x96   :  { %v5872_v9 = vmov 0  ;;  %v1001_v12 = vmax.f32 %v3861_v47, %v3865_v53  ;;  %v493_v58 = vmax.f32 %v365_v31, %v429_v22  ;;  %v494_v52 = vmax.f32 %v366_v34, %v430_v27 }
  0x97   :  { %vm3881_vm15 = vcmp.ne.s32.totalorder %v5867_v13, 0  ;;  %vm3887_vm3 = vcmp.ne.s32.totalorder %v5871_v44, 0  ;;  %v491_v39 = vmax.f32 %v363_v20, %v427_v25  ;;  %v3894_v63 = vmul.f32 0.2, %v3868_v23  ;;  %960 = vmax.xlane.f32.xlu1 %v959_v2  ;;  %v266_v20 = vpop.permute.xlu1 %265  ;;  %v261_v25 = vpop.permute.xlu0 %260 }
  0x98   :  { %v5869_v55 = vsel %vm3881_vm15, 4294967295, %v5868_v55  ;;  %v5873_v9 = vsel %vm3887_vm3, 4294967295, %v5872_v9  ;;  %v492_v49 = vmax.f32 %v364_v51, %v428_v10  ;;  %v465_v13 = vmax.f32 %v3770_v36, %v3794_v54  ;;  %1002 = vmax.xlane.f32.xlu0 %v1001_v12 }
  0x99   :  { %5870 = vst [vmem:[#allocation32_spill] sm:$0xff] %v5869_v55  ;;  %5874 = vst [vmem:[#allocation33_spill] sm:$0xff] %v5873_v9  ;;  %v464_v42 = vmax.f32 %v3730_v5, %v3755_v8  ;;  %v5875_v44 = vunpack.c.0.s8 %v3486_v43  ;;  %v5876_v19 = vmov 0  ;;  %v5879_v31 = vunpack.c.1.s8 %v3486_v43 }
  0x9a   :  { %v5880_v34 = vmov 0  ;;  %v3913_v10 = vmul.f32 0.2, %v3871_v56  ;;  %v3917_v5 = vsel %vm3777_vm7, %v493_v58, -1e+30  ;;  %v466_v43 = vmax.f32 %v3773_v37, %v3810_v18 }
  0x9b   :  { %vm3902_vm5 = vcmp.ne.s32.totalorder %v5875_v44, 0  ;;  %vm3908_vm6 = vcmp.ne.s32.totalorder %v5879_v31, 0  ;;  %5883 = vst [vmem:[#allocation36_spill] sm:$0xff] %v3917_v5  ;;  %v3921_v8 = vsel %vm3783_vm8, %v494_v52, -1e+30  ;;  %v369_v51 = vadd.f32 %v3358_v15, %v261_v25  ;;  %v196_v48 = vpop.permute.xlu1 %195  ;;  %v191_v14 = vpop.permute.xlu0 %190 }
  0x9c   :  { %v5877_v19 = vsel %vm3902_vm5, 4294967295, %v5876_v19  ;;  %v5881_v34 = vsel %vm3908_vm6, 4294967295, %v5880_v34  ;;  %5884 = vst [vmem:[#allocation37_spill] sm:$0xff] %v3921_v8  ;;  %v431_v54 = vmul.f32 0.2, %v3874_v35  ;;  %v370_v22 = vadd.f32 %v3363_v17, %v261_v25 }
  0x9d   :  { %5878 = vst [vmem:[#allocation34_spill] sm:$0xff] %v5877_v19  ;;  %5882 = vst [vmem:[#allocation35_spill] sm:$0xff] %v5881_v34  ;;  %v432_v36 = vmul.f32 0.2, %v3877_v29  ;;  %v5885_v27 = vunpack.c.0.s8 %v3489_v16  ;;  %v5886_v2 = vmov 0  ;;  %v3936_v52 = vadd.f32 %v3358_v15, %v266_v20 }
  0x9e   :  { %v1007_v37 = vmax.f32 %v3917_v5, %v3921_v8  ;;  %v3942_v18 = vsel %vm3798_vm9, %v491_v39, -1e+30  ;;  %v3946_v12 = vsel %vm3804_vm10, %v492_v49, -1e+30  ;;  %v3949_v58 = vadd.f32 %v3363_v17, %v266_v20 }
  0x9f   :  { %vm3931_vm1 = vcmp.ne.s32.totalorder %v5885_v27, 0  ;;  %5889 = vst [vmem:[#allocation39_spill] sm:$0xff] %v3946_v12  ;;  %v433_v44 = vmul.f32 0.2, %v369_v51  ;;  %v1004_v31 = vmax.f32 %v3942_v18, %v3946_v12  ;;  %v3955_v25 = vsel %vm3822_vm11, %v465_v13, -1e+30 }
  0xa0   :  { %v5887_v2 = vsel %vm3931_vm1, 4294967295, %v5886_v2  ;;  %5890 = vst [vmem:[#allocation40_spill] sm:$0xff] %v3955_v25  ;;  %v5891_v27 = vunpack.c.1.s8 %v3489_v16  ;;  %v5892_v39 = vmov 0  ;;  %v5895_v49 = vunpack.c.0.s8 %v3504_v60  ;;  %1008 = vmax.xlane.f32.xlu1 %v1007_v37 }
  0xa1   :  { %5888 = vst [vmem:[#allocation38_spill] sm:$0xff] %v5887_v2  ;;  %v5896_v21 = vmov 0  ;;  %v434_v20 = vmul.f32 0.2, %v370_v22  ;;  %v3971_v13 = vsel %vm3833_vm14, %v466_v43, -1e+30  ;;  %1005 = vmax.xlane.f32.xlu0 %v1004_v31  ;;  %v341_v33 = vadd.f32 %v3358_v15, %v191_v14 }
  0xa2   :  { %vm3959_vm7 = vcmp.ne.s32.totalorder %v5891_v27, 0  ;;  %vm3965_vm8 = vcmp.ne.s32.totalorder %v5895_v49, 0  ;;  %5899 = vst [vmem:[#allocation43_spill] sm:$0xff] %v3971_v13  ;;  %v3975_v16 = vsel %vm3839_vm0, %v463_v6, -1e+30  ;;  %v3979_v49 = vadd.f32 %v3358_v15, %v196_v48 }
  0xa3   :  { %v5893_v39 = vsel %vm3959_vm7, 4294967295, %v5892_v39  ;;  %v5897_v21 = vsel %vm3965_vm8, 4294967295, %v5896_v21  ;;  %5900 = vst [vmem:[#allocation44_spill] sm:$0xff] %v3975_v16  ;;  %v342_v37 = vadd.f32 %v3363_v17, %v191_v14  ;;  %v495_v38 = vmax.f32 %v3874_v35, %v431_v54 }
  0xa4   :  { %5894 = vst [vmem:[#allocation41_spill] sm:$0xff] %v5893_v39  ;;  %5898 = vst [vmem:[#allocation42_spill] sm:$0xff] %v5897_v21  ;;  %v5901_v4 = vunpack.c.1.s8 %v3504_v60  ;;  %v5902_v43 = vmov 0  ;;  %v5905_v6 = vunpack.c.0.s8 %v3507_v61  ;;  %v5906_v27 = vmov 0 }
  0xa5   :  { %v965_v31 = vmax.f32 %v3955_v25, %v3971_v13  ;;  %v4000_v14 = vsel %vm3853_vm4, %v464_v42, -1e+30  ;;  %v497_v35 = vmax.f32 %v369_v51, %v433_v44  ;;  %v498_v54 = vmax.f32 %v370_v22, %v434_v20  ;;  %v276_v51 = vpop.permute.xlu1 %275  ;;  %v271_v22 = vpop.permute.xlu0 %270 }
  0xa6   :  { %vm3986_vm11 = vcmp.ne.s32.totalorder %v5901_v4, 0  ;;  %vm3992_vm14 = vcmp.ne.s32.totalorder %v5905_v6, 0  ;;  %5909 = vst [vmem:[#allocation47_spill] sm:$0xff] %v4000_v14  ;;  %v4003_v60 = vmul.f32 0.2, %v3936_v52  ;;  %v962_v6 = vmax.f32 %v3975_v16, %v4000_v14 }
  0xa7   :  { %v5903_v43 = vsel %vm3986_vm11, 4294967295, %v5902_v43  ;;  %v5907_v27 = vsel %vm3992_vm14, 4294967295, %v5906_v27  ;;  %v4006_v4 = vmul.f32 0.2, %v3949_v58  ;;  %v405_v7 = vmul.f32 0.2, %v341_v33  ;;  %966 = vmax.xlane.f32.xlu1 %v965_v31 }
  0xa8   :  { %5904 = vst [vmem:[#allocation45_spill] sm:$0xff] %v5903_v43  ;;  %5908 = vst [vmem:[#allocation46_spill] sm:$0xff] %v5907_v27  ;;  %v5910_v8 = vunpack.c.1.s8 %v3507_v61  ;;  %v5911_v13 = vmov 0  ;;  %v406_v42 = vmul.f32 0.2, %v342_v37  ;;  %v496_v46 = vmax.f32 %v3877_v29, %v432_v36  ;;  %963 = vmax.xlane.f32.xlu0 %v962_v6 }
  0xa9   :  { %v4018_v44 = vsel %vm3881_vm15, %v497_v35, -1e+30  ;;  %v4022_v20 = vsel %vm3887_vm3, %v498_v54, -1e+30  ;;  %v4026_v61 = vadd.f32 %v3363_v17, %v196_v48  ;;  %v373_v31 = vadd.f32 %v3358_v15, %v271_v22 }
  0xaa   :  { %vm4012_vm0 = vcmp.ne.s32.totalorder %v5910_v8, 0  ;;  %5914 = vst [vmem:[#allocation49_spill] sm:$0xff] %v4018_v44  ;;  %5915 = vst [vmem:[#allocation50_spill] sm:$0xff] %v4022_v20  ;;  %v4029_v8 = vmul.f32 0.2, %v3979_v49  ;;  %v374_v25 = vadd.f32 %v3363_v17, %v271_v22  ;;  %v5916_v35 = vunpack.c.0.s8 %v3510_v62 }
  0xab   :  { %v5912_v13 = vsel %vm4012_vm0, 4294967295, %v5911_v13  ;;  %v5917_v55 = vmov 0  ;;  %v5920_v54 = vunpack.c.1.s8 %v3510_v62  ;;  %v5921_v29 = vmov 0 }
  0xac   :  { %5913 = vst [vmem:[#allocation48_spill] sm:$0xff] %v5912_v13  ;;  %vm4035_vm15 = vcmp.ne.s32.totalorder %v5916_v35, 0  ;;  %v1013_v48 = vmax.f32 %v4018_v44, %v4022_v20  ;;  %v4049_v36 = vsel %vm3902_vm5, %v495_v38, -1e+30  ;;  %v4053_v6 = vsel %vm3908_vm6, %v496_v46, -1e+30  ;;  %v206_v46 = vpop.permute.xlu1 %205 }
  0xad   :  { %v5918_v55 = vsel %vm4035_vm15, 4294967295, %v5917_v55  ;;  %vm4041_vm3 = vcmp.ne.s32.totalorder %v5920_v54, 0  ;;  %5924 = vst [vmem:[#allocation53_spill] sm:$0xff] %v4049_v36  ;;  %5925 = vst [vmem:[#allocation54_spill] sm:$0xff] %v4053_v6  ;;  %v469_v22 = vmax.f32 %v341_v33, %v405_v7  ;;  %v4056_v35 = vadd.f32 %v3358_v15, %v276_v51  ;;  %v201_v7 = vpop.permute.xlu0 %200 }
  0xae   :  { %5919 = vst [vmem:[#allocation51_spill] sm:$0xff] %v5918_v55  ;;  %v5922_v29 = vsel %vm4041_vm3, 4294967295, %v5921_v29  ;;  %v4059_v62 = vadd.f32 %v3363_v17, %v276_v51  ;;  %v437_v54 = vmul.f32 0.2, %v373_v31  ;;  %v1010_v9 = vmax.f32 %v4049_v36, %v4053_v6  ;;  %1014 = vmax.xlane.f32.xlu1 %v1013_v48 }
  0xaf   :  { %5923 = vst [vmem:[#allocation52_spill] sm:$0xff] %v5922_v29  ;;  %v5926_v20 = vunpack.c.0.s8 %v3536_v30  ;;  %v5927_v38 = vmov 0  ;;  %v438_v19 = vmul.f32 0.2, %v374_v25  ;;  %v470_v33 = vmax.f32 %v342_v37, %v406_v42 }
  0xb0   :  { %v4071_v34 = vsel %vm3931_vm1, %v469_v22, -1e+30  ;;  %v467_v51 = vmax.f32 %v3868_v23, %v3894_v63  ;;  %v4076_v44 = vmul.f32 0.2, %v4026_v61  ;;  %1011 = vmax.xlane.f32.xlu0 %v1010_v9  ;;  %v345_v6 = vadd.f32 %v3358_v15, %v201_v7 }
  0xb1   :  { %vm4065_vm4 = vcmp.ne.s32.totalorder %v5926_v20, 0  ;;  %5930 = vst [vmem:[#allocation56_spill] sm:$0xff] %v4071_v34  ;;  %v4079_v20 = vadd.f32 %v3358_v15, %v206_v46  ;;  %v346_v48 = vadd.f32 %v3363_v17, %v201_v7  ;;  %v5931_v37 = vunpack.c.1.s8 %v3536_v30 }
  0xb2   :  { %v5928_v38 = vsel %vm4065_vm4, 4294967295, %v5927_v38  ;;  %v5932_v42 = vmov 0  ;;  %v5935_v22 = vunpack.c.0.s8 %v3539_v32  ;;  %v5936_v23 = vmov 0 }
  0xb3   :  { %5929 = vst [vmem:[#allocation55_spill] sm:$0xff] %v5928_v38  ;;  %vm4085_vm5 = vcmp.ne.s32.totalorder %v5931_v37, 0  ;;  %v4097_v9 = vsel %vm3959_vm7, %v470_v33, -1e+30  ;;  %v468_v63 = vmax.f32 %v3871_v56, %v3913_v10  ;;  %v4103_v30 = vsel %vm3965_vm8, %v467_v51, -1e+30 }
  0xb4   :  { %v5933_v42 = vsel %vm4085_vm5, 4294967295, %v5932_v42  ;;  %vm4091_vm1 = vcmp.ne.s32.totalorder %v5935_v22, 0  ;;  %5939 = vst [vmem:[#allocation59_spill] sm:$0xff] %v4097_v9  ;;  %5940 = vst [vmem:[#allocation60_spill] sm:$0xff] %v4103_v30  ;;  %v501_v7 = vmax.f32 %v373_v31, %v437_v54  ;;  %v5941_v37 = vunpack.c.1.s8 %v3539_v32  ;;  %v286_v31 = vpop.permute.xlu1 %285  ;;  %v281_v54 = vpop.permute.xlu0 %280 }
  0xb5   :  { %5934 = vst [vmem:[#allocation57_spill] sm:$0xff] %v5933_v42  ;;  %v5937_v23 = vsel %vm4091_vm1, 4294967295, %v5936_v23  ;;  %v5942_v2 = vmov 0  ;;  %v4112_v22 = vmul.f32 0.2, %v4056_v35  ;;  %v4118_v39 = vadd.f32 %v3363_v17, %v206_v46 }
  0xb6   :  { %5938 = vst [vmem:[#allocation58_spill] sm:$0xff] %v5937_v23  ;;  %vm4107_vm6 = vcmp.ne.s32.totalorder %v5941_v37, 0  ;;  %v4115_v33 = vmul.f32 0.2, %v4059_v62  ;;  %v971_v56 = vmax.f32 %v4071_v34, %v4097_v9  ;;  %v409_v10 = vmul.f32 0.2, %v345_v6 }
  0xb7   :  { %v5943_v2 = vsel %vm4107_vm6, 4294967295, %v5942_v2  ;;  %v4124_v32 = vsel %vm3986_vm11, %v468_v63, -1e+30  ;;  %v502_v51 = vmax.f32 %v374_v25, %v438_v19  ;;  %v4128_v37 = vsel %vm3992_vm14, %v501_v7, -1e+30 }
  0xb8   :  { %5944 = vst [vmem:[#allocation61_spill] sm:$0xff] %v5943_v2  ;;  %5945 = vst [vmem:[#allocation62_spill] sm:$0xff] %v4124_v32  ;;  %v5947_v21 = vunpack.c.0.s8 %v3591_v11  ;;  %v5948_v46 = vmov 0  ;;  %v4137_v9 = vmul.f32 0.2, %v4079_v20  ;;  %972 = vmax.xlane.f32.xlu1 %v971_v56  ;;  %v968_v63 = vmax.f32 %v4103_v30, %v4124_v32  ;;  %v211_v13 = vpop.permute.xlu0 %210 }
  0xb9   :  { %5946 = vst [vmem:[#allocation63_spill] sm:$0xff] %v4128_v37  ;;  %v410_v34 = vmul.f32 0.2, %v346_v48  ;;  %v377_v19 = vadd.f32 %v3358_v15, %v281_v54  ;;  %v5951_v25 = vunpack.c.1.s8 %v3591_v11  ;;  %v5952_v7 = vmov 0 }
  0xba   :  { %vm4132_vm7 = vcmp.ne.s32.totalorder %v5947_v21, 0  ;;  %v378_v21 = vadd.f32 %v3363_v17, %v281_v54  ;;  %v4151_v27 = vsel %vm4012_vm0, %v502_v51, -1e+30  ;;  %v499_v56 = vmax.f32 %v3936_v52, %v4003_v60  ;;  %969 = vmax.xlane.f32.xlu0 %v968_v63 }
  0xbb   :  { %v5949_v46 = vsel %vm4132_vm7, 4294967295, %v5948_v46  ;;  %vm4144_vm14 = vcmp.ne.s32.totalorder %v5951_v25, 0  ;;  %5955 = vst [vmem:[#allocation66_spill] sm:$0xff] %v4151_v27  ;;  %v500_v43 = vmax.f32 %v3949_v58, %v4006_v4  ;;  %v5956_v32 = vunpack.c.0.s8 %v3570_v0 }
  0xbc   :  { %5950 = vst [vmem:[#allocation64_spill] sm:$0xff] %v5949_v46  ;;  %v5953_v7 = vsel %vm4144_vm14, 4294967295, %v5952_v7  ;;  %v5957_v11 = vmov 0  ;;  %v4164_v25 = vmul.f32 0.2, %v4118_v39  ;;  %v4167_v54 = vadd.f32 %v3358_v15, %v286_v31 }
  0xbd   :  { %5954 = vst [vmem:[#allocation65_spill] sm:$0xff] %v5953_v7  ;;  %vm4159_vm8 = vcmp.ne.s32.totalorder %v5956_v32, 0  ;;  %v4170_v51 = vadd.f32 %v3363_v17, %v286_v31  ;;  %v1019_v52 = vmax.f32 %v4128_v37, %v4151_v27  ;;  %v5960_v58 = vunpack.c.1.s8 %v3570_v0  ;;  %v216_v31 = vpop.permute.xlu1 %215 }
  0xbe   :  { %v5958_v11 = vsel %vm4159_vm8, 4294967295, %v5957_v11  ;;  %v5961_v60 = vmov 0  ;;  %v441_v4 = vmul.f32 0.2, %v377_v19  ;;  %v4182_v32 = vsel %vm4035_vm15, %v499_v56, -1e+30 }
  0xbf   :  { %5959 = vst [vmem:[#allocation67_spill] sm:$0xff] %v5958_v11  ;;  %vm4176_vm0 = vcmp.ne.s32.totalorder %v5960_v58, 0  ;;  %5964 = vst [vmem:[#allocation69_spill] sm:$0xff] %v4182_v32  ;;  %v4186_v63 = vsel %vm4041_vm3, %v500_v43, -1e+30  ;;  %v473_v30 = vmax.f32 %v345_v6, %v409_v10  ;;  %1020 = vmax.xlane.f32.xlu1 %v1019_v52  ;;  %v4191_v58 = vadd.f32 %v3358_v15, %v216_v31 }
  0xc0   :  { %v5962_v60 = vsel %vm4176_vm0, 4294967295, %v5961_v60  ;;  %5965 = vst [vmem:[#allocation70_spill] sm:$0xff] %v4186_v63  ;;  %v442_v36 = vmul.f32 0.2, %v378_v21  ;;  %v1016_v0 = vmax.f32 %v4182_v32, %v4186_v63  ;;  %v4194_v27 = vadd.f32 %v3363_v17, %v216_v31  ;;  %v6067_v32 = vld [vmem:[#allocation12_spill] sm:$0xff] }
  0xc1   :  { %5963 = vst [vmem:[#allocation68_spill] sm:$0xff] %v5962_v60  ;;  %v5966_v56 = vunpack.c.0.s8 %v3596_v50  ;;  %v5967_v55 = vmov 0  ;;  %v349_v43 = vadd.f32 %v3358_v15, %v211_v13  ;;  %v474_v6 = vmax.f32 %v346_v48, %v410_v34 }
  0xc2   :  { %v4205_v10 = vsel %vm4065_vm4, %v473_v30, -1e+30  ;;  %v471_v52 = vmax.f32 %v3979_v49, %v4029_v8  ;;  %v5971_v29 = vunpack.c.1.s8 %v3596_v50  ;;  %v5972_v31 = vmov 0  ;;  %1017 = vmax.xlane.f32.xlu0 %v1016_v0  ;;  %v291_v0 = vpop.permute.xlu0 %290 }
  0xc3   :  { %vm4198_vm15 = vcmp.ne.s32.totalorder %v5966_v56, 0  ;;  %5970 = vst [vmem:[#allocation72_spill] sm:$0xff] %v4205_v10  ;;  %v4216_v56 = vmul.f32 0.2, %v4167_v54  ;;  %v4219_v63 = vmul.f32 0.2, %v4170_v51  ;;  %v350_v34 = vadd.f32 %v3363_v17, %v211_v13  ;;  %v296_v13 = vpop.permute.xlu1 %295 }
  0xc4   :  { %v5968_v55 = vsel %vm4198_vm15, 4294967295, %v5967_v55  ;;  %vm4211_vm3 = vcmp.ne.s32.totalorder %v5971_v29, 0  ;;  %v472_v48 = vmax.f32 %v4026_v61, %v4076_v44  ;;  %v5975_v49 = vunpack.c.0.s8 %v3607_v26 }
  0xc5   :  { %5969 = vst [vmem:[#allocation71_spill] sm:$0xff] %v5968_v55  ;;  %v5973_v31 = vsel %vm4211_vm3, 4294967295, %v5972_v31  ;;  %v5976_v50 = vmov 0  ;;  %v4231_v8 = vmul.f32 0.2, %v4191_v58  ;;  %v505_v44 = vmax.f32 %v377_v19, %v441_v4 }
  0xc6   :  { %5974 = vst [vmem:[#allocation73_spill] sm:$0xff] %v5973_v31  ;;  %vm4226_vm4 = vcmp.ne.s32.totalorder %v5975_v49, 0  ;;  %v4235_v29 = vsel %vm4085_vm5, %v474_v6, -1e+30  ;;  %v4239_v30 = vsel %vm4091_vm1, %v471_v52, -1e+30  ;;  %v5981_v61 = vunpack.c.1.s8 %v3607_v26 }
  0xc7   :  { %v5977_v50 = vsel %vm4226_vm4, 4294967295, %v5976_v50  ;;  %5979 = vst [vmem:[#allocation75_spill] sm:$0xff] %v4235_v29  ;;  %5980 = vst [vmem:[#allocation76_spill] sm:$0xff] %v4239_v30  ;;  %v5982_v49 = vmov 0  ;;  %v4248_v38 = vmul.f32 0.2, %v4194_v27  ;;  %v977_v6 = vmax.f32 %v4205_v10, %v4235_v29 }
  0xc8   :  { %5978 = vst [vmem:[#allocation74_spill] sm:$0xff] %v5977_v50  ;;  %vm4243_vm11 = vcmp.ne.s32.totalorder %v5981_v61, 0  ;;  %v4254_v42 = vsel %vm4107_vm6, %v472_v48, -1e+30  ;;  %v4257_v52 = vadd.f32 %v3358_v15, %v296_v13  ;;  %v413_v19 = vmul.f32 0.2, %v349_v43 }
  0xc9   :  { %v5983_v49 = vsel %vm4243_vm11, 4294967295, %v5982_v49  ;;  %5985 = vst [vmem:[#allocation78_spill] sm:$0xff] %v4254_v42  ;;  %v974_v26 = vmax.f32 %v4239_v30, %v4254_v42  ;;  %v4262_v4 = vadd.f32 %v3363_v17, %v296_v13  ;;  %v506_v61 = vmax.f32 %v378_v21, %v442_v36  ;;  %978 = vmax.xlane.f32.xlu1 %v977_v6 }
  0xca   :  { %5984 = vst [vmem:[#allocation77_spill] sm:$0xff] %v5983_v49  ;;  %v5986_v23 = vunpack.c.0.s8 %v3618_v45  ;;  %v5987_v37 = vmov 0  ;;  %v414_v2 = vmul.f32 0.2, %v350_v34  ;;  %v381_v48 = vadd.f32 %v3358_v15, %v291_v0 }
  0xcb   :  { %v4273_v29 = vsel %vm4132_vm7, %v505_v44, -1e+30  ;;  %v503_v10 = vmax.f32 %v4056_v35, %v4112_v22  ;;  %v5991_v13 = vunpack.c.1.s8 %v3618_v45  ;;  %v5992_v36 = vmov 0  ;;  %975 = vmax.xlane.f32.xlu0 %v974_v26  ;;  %v226_v35 = vpop.permute.xlu1 %225  ;;  %v221_v22 = vpop.permute.xlu0 %220 }
  0xcc   :  { %vm4266_vm5 = vcmp.ne.s32.totalorder %v5986_v23, 0  ;;  %5990 = vst [vmem:[#allocation80_spill] sm:$0xff] %v4273_v29  ;;  %v4284_v23 = vmul.f32 0.2, %v4257_v52  ;;  %v382_v21 = vadd.f32 %v3363_v17, %v291_v0  ;;  %v4289_v6 = vsel %vm4144_vm14, %v506_v61, -1e+30 }
  0xcd   :  { %v5988_v37 = vsel %vm4266_vm5, 4294967295, %v5987_v37  ;;  %vm4279_vm1 = vcmp.ne.s32.totalorder %v5991_v13, 0  ;;  %5995 = vst [vmem:[#allocation82_spill] sm:$0xff] %v4289_v6  ;;  %v504_v44 = vmax.f32 %v4059_v62, %v4115_v33  ;;  %v5996_v45 = vunpack.c.0.s8 %v3621_v28 }
  0xce   :  { %5989 = vst [vmem:[#allocation79_spill] sm:$0xff] %v5988_v37  ;;  %v5993_v36 = vsel %vm4279_vm1, 4294967295, %v5992_v36  ;;  %v5997_v13 = vmov 0  ;;  %v6000_v26 = vunpack.c.1.s8 %v3621_v28  ;;  %v6001_v46 = vmov 0 }
  0xcf   :  { %5994 = vst [vmem:[#allocation81_spill] sm:$0xff] %v5993_v36  ;;  %vm4295_vm7 = vcmp.ne.s32.totalorder %v5996_v45, 0  ;;  %v1025_v0 = vmax.f32 %v4273_v29, %v4289_v6  ;;  %v4309_v62 = vsel %vm4159_vm8, %v503_v10, -1e+30  ;;  %v4312_v33 = vadd.f32 %v3358_v15, %v226_v35 }
  0xd0   :  { %v5998_v13 = vsel %vm4295_vm7, 4294967295, %v5997_v13  ;;  %vm4301_vm6 = vcmp.ne.s32.totalorder %v6000_v26, 0  ;;  %6004 = vst [vmem:[#allocation85_spill] sm:$0xff] %v4309_v62  ;;  %v4315_v61 = vadd.f32 %v3363_v17, %v226_v35  ;;  %v4318_v45 = vmul.f32 0.2, %v4262_v4 }
  0xd1   :  { %5999 = vst [vmem:[#allocation83_spill] sm:$0xff] %v5998_v13  ;;  %v6002_v46 = vsel %vm4301_vm6, 4294967295, %v6001_v46  ;;  %v4322_v28 = vsel %vm4176_vm0, %v504_v44, -1e+30  ;;  %v4325_v26 = vadd.f32 %v3358_v15, %v221_v22  ;;  %v477_v7 = vmax.f32 %v349_v43, %v413_v19  ;;  %1026 = vmax.xlane.f32.xlu1 %v1025_v0  ;;  %v306_v19 = vpop.permute.xlu1 %305  ;;  %v301_v0 = vpop.permute.xlu0 %300 }
  0xd2   :  { %6003 = vst [vmem:[#allocation84_spill] sm:$0xff] %v6002_v46  ;;  %6005 = vst [vmem:[#allocation86_spill] sm:$0xff] %v4322_v28  ;;  %v445_v11 = vmul.f32 0.2, %v381_v48  ;;  %v1022_v10 = vmax.f32 %v4309_v62, %v4322_v28  ;;  %v4330_v6 = vadd.f32 %v3363_v17, %v221_v22  ;;  %v478_v35 = vmax.f32 %v350_v34, %v414_v2 }
  0xd3   :  { %v446_v29 = vmul.f32 0.2, %v382_v21  ;;  %v4333_v42 = vmul.f32 0.2, %v4312_v33  ;;  %v4337_v44 = vsel %vm4198_vm15, %v477_v7, -1e+30  ;;  %v475_v43 = vmax.f32 %v4079_v20, %v4137_v9 }
  0xd4   :  { %6006 = vst [vmem:[#allocation87_spill] sm:$0xff] %v4337_v44  ;;  %v6007_v60 = vunpack.c.0.s8 %v3628_v24  ;;  %v6008_v28 = vmov 0  ;;  %v6011_v2 = vunpack.c.1.s8 %v3628_v24  ;;  %v6012_v34 = vmov 0  ;;  %1023 = vmax.xlane.f32.xlu0 %v1022_v10 }
  0xd5   :  { %v6015_v7 = vunpack.c.0.s8 %v3634_v1  ;;  %v6016_v22 = vmov 0  ;;  %v4360_v20 = vmul.f32 0.2, %v4315_v61  ;;  %v4364_v9 = vsel %vm4211_vm3, %v478_v35, -1e+30  ;;  %v236_v49 = vpop.permute.xlu1 %235 }
  0xd6   :  { %vm4343_vm14 = vcmp.ne.s32.totalorder %v6007_v60, 0  ;;  %vm4349_vm8 = vcmp.ne.s32.totalorder %v6011_v2, 0  ;;  %6019 = vst [vmem:[#allocation91_spill] sm:$0xff] %v4364_v9  ;;  %v476_v24 = vmax.f32 %v4118_v39, %v4164_v25  ;;  %v4369_v60 = vadd.f32 %v3358_v15, %v306_v19 }
  0xd7   :  { %v6009_v28 = vsel %vm4343_vm14, 4294967295, %v6008_v28  ;;  %v6013_v34 = vsel %vm4349_vm8, 4294967295, %v6012_v34  ;;  %vm4355_vm15 = vcmp.ne.s32.totalorder %v6015_v7, 0  ;;  %v6020_v2 = vunpack.c.1.s8 %v3634_v1 }
  0xd8   :  { %6010 = vst [vmem:[#allocation88_spill] sm:$0xff] %v6009_v28  ;;  %6014 = vst [vmem:[#allocation89_spill] sm:$0xff] %v6013_v34  ;;  %v6017_v22 = vsel %vm4355_vm15, 4294967295, %v6016_v22  ;;  %v6021_v7 = vmov 0  ;;  %v417_v10 = vmul.f32 0.2, %v4325_v26  ;;  %v983_v55 = vmax.f32 %v4337_v44, %v4364_v9  ;;  %v231_v44 = vpop.permute.xlu0 %230 }
  0xd9   :  { %6018 = vst [vmem:[#allocation90_spill] sm:$0xff] %v6017_v22  ;;  %vm4373_vm0 = vcmp.ne.s32.totalorder %v6020_v2, 0  ;;  %v4382_v35 = vsel %vm4226_vm4, %v475_v43, -1e+30  ;;  %v4385_v39 = vadd.f32 %v3363_v17, %v306_v19  ;;  %v418_v25 = vmul.f32 0.2, %v4330_v6 }
  0xda   :  { %v6022_v7 = vsel %vm4373_vm0, 4294967295, %v6021_v7  ;;  %6024 = vst [vmem:[#allocation93_spill] sm:$0xff] %v4382_v35  ;;  %v4390_v1 = vsel %vm4243_vm11, %v476_v24, -1e+30  ;;  %v4393_v2 = vadd.f32 %v3358_v15, %v301_v0  ;;  %v509_v31 = vmax.f32 %v381_v48, %v445_v11  ;;  %984 = vmax.xlane.f32.xlu1 %v983_v55 }
  0xdb   :  { %6023 = vst [vmem:[#allocation92_spill] sm:$0xff] %v6022_v7  ;;  %6025 = vst [vmem:[#allocation94_spill] sm:$0xff] %v4390_v1  ;;  %v6026_v62 = vunpack.c.0.s8 %v3641_v41  ;;  %v6027_v9 = vmov 0  ;;  %v980_v43 = vmax.f32 %v4382_v35, %v4390_v1  ;;  %v4404_v19 = vmul.f32 0.2, %v4369_v60 }
  0xdc   :  { %v4407_v24 = vadd.f32 %v3363_v17, %v301_v0  ;;  %v510_v50 = vmax.f32 %v382_v21, %v446_v29  ;;  %v6030_v11 = vunpack.c.1.s8 %v3641_v41  ;;  %v6031_v48 = vmov 0  ;;  %v311_v13 = vpop.permute.xlu0 %310 }
  0xdd   :  { %vm4397_vm3 = vcmp.ne.s32.totalorder %v6026_v62, 0  ;;  %v4417_v55 = vsel %vm4266_vm5, %v509_v31, -1e+30  ;;  %v507_v62 = vmax.f32 %v4167_v54, %v4216_v56  ;;  %v508_v0 = vmax.f32 %v4170_v51, %v4219_v63  ;;  %981 = vmax.xlane.f32.xlu0 %v980_v43 }
  0xde   :  { %v6028_v9 = vsel %vm4397_vm3, 4294967295, %v6027_v9  ;;  %vm4411_vm4 = vcmp.ne.s32.totalorder %v6030_v11, 0  ;;  %6034 = vst [vmem:[#allocation97_spill] sm:$0xff] %v4417_v55  ;;  %v4424_v29 = vadd.f32 %v3358_v15, %v236_v49  ;;  %v6035_v21 = vunpack.c.0.s8 %v3637_v59 }
  0xdf   :  { %6029 = vst [vmem:[#allocation95_spill] sm:$0xff] %v6028_v9  ;;  %v6032_v48 = vsel %vm4411_vm4, 4294967295, %v6031_v48  ;;  %v6036_v41 = vmov 0  ;;  %v6039_v11 = vunpack.c.1.s8 %v3637_v59  ;;  %v6040_v31 = vmov 0 }
  0xe0   :  { %6033 = vst [vmem:[#allocation96_spill] sm:$0xff] %v6032_v48  ;;  %vm4428_vm11 = vcmp.ne.s32.totalorder %v6035_v21, 0  ;;  %v6043_v54 = vunpack.c.0.s8 %v3658_v3  ;;  %v6044_v56 = vmov 0  ;;  %v4445_v51 = vmul.f32 0.2, %v4385_v39 }
  0xe1   :  { %v6037_v41 = vsel %vm4428_vm11, 4294967295, %v6036_v41  ;;  %vm4434_vm9 = vcmp.ne.s32.totalorder %v6039_v11, 0  ;;  %v4449_v63 = vsel %vm4279_vm1, %v510_v50, -1e+30  ;;  %v357_v59 = vadd.f32 %v3358_v15, %v231_v44 }
  0xe2   :  { %6038 = vst [vmem:[#allocation98_spill] sm:$0xff] %v6037_v41  ;;  %v6041_v31 = vsel %vm4434_vm9, 4294967295, %v6040_v31  ;;  %vm4440_vm5 = vcmp.ne.s32.totalorder %v6043_v54, 0  ;;  %6047 = vst [vmem:[#allocation101_spill] sm:$0xff] %v4449_v63  ;;  %v358_v21 = vadd.f32 %v3363_v17, %v231_v44  ;;  %v6048_v11 = vunpack.c.1.s8 %v3658_v3  ;;  %v6052_v54 = vld [vmem:[#allocation11_spill] sm:$0xff] }
  0xe3   :  { %6042 = vst [vmem:[#allocation99_spill] sm:$0xff] %v6041_v31  ;;  %v6045_v56 = vsel %vm4440_vm5, 4294967295, %v6044_v56  ;;  %v6049_v37 = vmov 0  ;;  %v6053_v1 = vunpack.c.0.s8 %v6052_v54  ;;  %v6054_v43 = vmov 0 }
  0xe4   :  { %6046 = vst [vmem:[#allocation100_spill] sm:$0xff] %v6045_v56  ;;  %vm4455_vm10 = vcmp.ne.s32.totalorder %v6048_v11, 0  ;;  %v449_v36 = vmul.f32 0.2, %v4393_v2  ;;  %v1031_v50 = vmax.f32 %v4417_v55, %v4449_v63  ;;  %v4470_v44 = vsel %vm4295_vm7, %v507_v62, -1e+30 }
  0xe5   :  { %v6050_v37 = vsel %vm4455_vm10, 4294967295, %v6049_v37  ;;  %vm4461_vm12 = vcmp.ne.s32.totalorder %v6053_v1, 0  ;;  %6057 = vst [vmem:[#allocation103_spill] sm:$0xff] %v4470_v44  ;;  %v4474_v3 = vsel %vm4301_vm6, %v508_v0, -1e+30  ;;  %v6059_v11 = vunpack.c.1.s8 %v6052_v54  ;;  %v6063_v0 = vld [vmem:[#allocation9_spill] sm:$0xff] }
  0xe6   :  { %6051 = vst [vmem:[#allocation102_spill] sm:$0xff] %v6050_v37  ;;  %v6055_v43 = vsel %vm4461_vm12, 4294967295, %v6054_v43  ;;  %6058 = vst [vmem:[#allocation104_spill] sm:$0xff] %v4474_v3  ;;  %v6060_v1 = vmov 0  ;;  %v450_v35 = vmul.f32 0.2, %v4407_v24  ;;  %v1028_v30 = vmax.f32 %v4470_v44, %v4474_v3  ;;  %1032 = vmax.xlane.f32.xlu1 %v1031_v50  ;;  %v316_v44 = vpop.permute.xlu1 %315 }
  0xe7   :  { %6056 = vst [vmem:[#allocation11_spill] sm:$0xff] %v6055_v43  ;;  %vm4478_vm1 = vcmp.ne.s32.totalorder %v6059_v11, 0  ;;  %v4486_v63 = vadd.f32 %v3363_v17, %v236_v49  ;;  %v4489_v62 = vmul.f32 0.2, %v4424_v29  ;;  %v6064_v46 = vpack.c.b8 %v6063_v0, %v6063_v0 }
  0xe8   :  { %v6061_v1 = vsel %vm4478_vm1, 4294967295, %v6060_v1  ;;  %v481_v11 = vmax.f32 %v4325_v26, %v417_v10  ;;  %v482_v55 = vmax.f32 %v4330_v6, %v418_v25  ;;  %v479_v49 = vmax.f32 %v4191_v58, %v4231_v8  ;;  %1029 = vmax.xlane.f32.xlu0 %v1028_v30  ;;  %v6079_v30 = vld [vmem:[#allocation16_spill] sm:$0xff] }
  0xe9   :  { %6062 = vst [vmem:[#allocation105_spill] sm:$0xff] %v6061_v1  ;;  %vm4494_vm7 = vnez %v6064_v46  ;;  %v480_v3 = vmax.f32 %v4194_v27, %v4248_v38  ;;  %v6068_v14 = vunpack.c.0.s8 %v6067_v32  ;;  %v6069_v0 = vmov 0 }
  0xea   :  { %v6072_v46 = vunpack.c.1.s8 %v6067_v32  ;;  %v6073_v50 = vmov 0  ;;  %v421_v6 = vmul.f32 0.2, %v357_v59  ;;  %v422_v26 = vmul.f32 0.2, %v358_v21 }
  0xeb   :  { %vm4506_vm6 = vcmp.ne.s32.totalorder %v6068_v14, 0  ;;  %v389_v58 = vadd.f32 %v3358_v15, %v311_v13  ;;  %v390_v27 = vadd.f32 %v3363_v17, %v311_v13  ;;  %v4520_v38 = vsel %vm4343_vm14, %v481_v11, -1e+30 }
  0xec   :  { %v6070_v0 = vsel %vm4506_vm6, 4294967295, %v6069_v0  ;;  %vm4512_vm2 = vcmp.ne.s32.totalorder %v6072_v46, 0  ;;  %6076 = vst [vmem:[#allocation106_spill] sm:$0xff] %v4520_v38  ;;  %v4524_v14 = vsel %vm4349_vm8, %v482_v55, -1e+30  ;;  %v513_v8 = vmax.f32 %v4393_v2, %v449_v36 }
  0xed   :  { %6071 = vst [vmem:[#allocation9_spill] sm:$0xff] %v6070_v0  ;;  %v6074_v50 = vsel %vm4512_vm2, 4294967295, %v6073_v50  ;;  %6077 = vst [vmem:[#allocation107_spill] sm:$0xff] %v4524_v14  ;;  %v4528_v32 = vsel %vm4355_vm15, %v479_v49, -1e+30  ;;  %v6080_v10 = vunpack.c.0.s8 %v6079_v30  ;;  %v6081_v25 = vmov 0 }
  0xee   :  { %6075 = vst [vmem:[#allocation12_spill] sm:$0xff] %v6074_v50  ;;  %6078 = vst [vmem:[#allocation108_spill] sm:$0xff] %v4528_v32  ;;  %v4538_v13 = vmul.f32 0.2, %v4486_v63  ;;  %v989_v11 = vmax.f32 %v4520_v38, %v4524_v14  ;;  %v4544_v55 = vsel %vm4373_vm0, %v480_v3, -1e+30  ;;  %v4547_v49 = vadd.f32 %v3358_v15, %v316_v44 }
  0xef   :  { %vm4533_vm13 = vcmp.ne.s32.totalorder %v6080_v10, 0  ;;  %6084 = vst [vmem:[#allocation109_spill] sm:$0xff] %v4544_v55  ;;  %v986_v36 = vmax.f32 %v4528_v32, %v4544_v55  ;;  %v453_v2 = vmul.f32 0.2, %v389_v58  ;;  %v454_v46 = vmul.f32 0.2, %v390_v27 }
  0xf0   :  { %v6082_v25 = vsel %vm4533_vm13, 4294967295, %v6081_v25  ;;  %v514_v10 = vmax.f32 %v4407_v24, %v450_v35  ;;  %990 = vmax.xlane.f32.xlu1 %v989_v11  ;;  %v4554_v28 = vsel %vm4397_vm3, %v513_v8, -1e+30  ;;  %v511_v34 = vmax.f32 %v4257_v52, %v4284_v23  ;;  %v2875_v0 = vld [vmem:[%s5554_s3 + $0x28] sm:$0xff]   ;;  %v2876_v50 = vld [vmem:[%s5554_s3 + $0x70] sm:$0xff]  }
  0xf1   :  { %6083 = vst [vmem:[#allocation16_spill] sm:$0xff] %v6082_v25  ;;  %6085 = vst [vmem:[#allocation110_spill] sm:$0xff] %v4554_v28  ;;  %v512_v3 = vmax.f32 %v4262_v4, %v4318_v45  ;;  %v485_v15 = vmax.f32 %v357_v59, %v421_v6  ;;  %987 = vmax.xlane.f32.xlu0 %v986_v36  ;;  %v486_v7 = vmax.f32 %v358_v21, %v422_v26  ;;  %v6094_v6 = vmov 0 }
  0xf2   :  { %v4562_v22 = vsel %vm4411_vm4, %v514_v10, -1e+30  ;;  %v483_v35 = vmax.f32 %v4312_v33, %v4333_v42  ;;  %v484_v24 = vmax.f32 %v4315_v61, %v4360_v20  ;;  %v4572_v52 = vsel %vm4428_vm11, %v511_v34, -1e+30 }
  0xf3   :  { %6086 = vst [vmem:[#allocation111_spill] sm:$0xff] %v4562_v22  ;;  %v1037_v8 = vmax.f32 %v4554_v28, %v4562_v22  ;;  %6087 = vst [vmem:[#allocation112_spill] sm:$0xff] %v4572_v52  ;;  %v4576_v4 = vsel %vm4434_vm9, %v512_v3, -1e+30  ;;  %v4580_v23 = vsel %vm4440_vm5, %v485_v15, -1e+30  ;;  %v4583_v42 = vadd.f32 %v3363_v17, %v316_v44 }
  0xf4   :  { %6088 = vst [vmem:[#allocation113_spill] sm:$0xff] %v4576_v4  ;;  %6089 = vst [vmem:[#allocation114_spill] sm:$0xff] %v4580_v23  ;;  %v1034_v33 = vmax.f32 %v4572_v52, %v4576_v4  ;;  %v4589_v61 = vsel %vm4455_vm10, %v486_v7, -1e+30  ;;  %v4593_v45 = vsel %vm4461_vm12, %v483_v35, -1e+30  ;;  %v517_v17 = vmax.f32 %v389_v58, %v453_v2 }
  0xf5   :  { %6090 = vst [vmem:[#allocation115_spill] sm:$0xff] %v4589_v61  ;;  %6091 = vst [vmem:[#allocation116_spill] sm:$0xff] %v4593_v45  ;;  %1038 = vmax.xlane.f32.xlu1 %v1037_v8  ;;  %v995_v34 = vmax.f32 %v4580_v23, %v4589_v61  ;;  %v4599_v20 = vsel %vm4478_vm1, %v484_v24, -1e+30  ;;  %v518_v59 = vmax.f32 %v390_v27, %v454_v46  ;;  %v6093_v44 = vunpack.c.1.s8 %v6079_v30 }
  0xf6   :  { %6092 = vst [vmem:[#allocation117_spill] sm:$0xff] %v4599_v20  ;;  %1035 = vmax.xlane.f32.xlu0 %v1034_v33  ;;  %v515_v21 = vmax.f32 %v4369_v60, %v4404_v19  ;;  %v516_v7 = vmax.f32 %v4385_v39, %v4445_v51  ;;  %v6097_v26 = vmov 0   ;;  %v4616_v58 = vsel %vm4506_vm6, %v517_v17, -1e+30 }
  0xf7   :  { %vm4607_vm5 = vcmp.ne.s32.totalorder %v6093_v44, 0  ;;  %v728_v11 = vsel %vm4494_vm7, 16843009, %v6097_v26  ;;  %6098 = vst [vmem:[#allocation119_spill] sm:$0xff] %v4616_v58  ;;  %v4620_v60 = vsel %vm4512_vm2, %v518_v59, -1e+30  ;;  %v6100_v39 = vunpack.c.0.s8 %v3749_v40 }
  0xf8   :  { %v6095_v6 = vsel %vm4607_vm5, 4294967295, %v6094_v6  ;;  %6099 = vst [vmem:[#allocation120_spill] sm:$0xff] %v4620_v60  ;;  %v6101_v19 = vmov 0  ;;  %v6104_v51 = vunpack.c.1.s8 %v3749_v40  ;;  %v6105_v27 = vmov 0  ;;  %v2865_v44 = vld [vmem:[%s5554_s3] sm:$0xff]  }
  0xf9   :  { %6096 = vst [vmem:[#allocation118_spill] sm:$0xff] %v6095_v6  ;;  %vm4624_vm10 = vcmp.ne.s32.totalorder %v6100_v39, 0  ;;  %v455_v54 = vmul.f32 0.2, %v4547_v49  ;;  %v456_v30 = vmul.f32 0.2, %v4583_v42  ;;  %v992_v36 = vmax.f32 %v4593_v45, %v4599_v20  ;;  %996 = vmax.xlane.f32.xlu1 %v995_v34 }
  0xfa   :  { %v6102_v19 = vsel %vm4624_vm10, 4294967295, %v6101_v19  ;;  %vm4630_vm3 = vcmp.ne.s32.totalorder %v6104_v51, 0  ;;  %v487_v2 = vmax.f32 %v4424_v29, %v4489_v62  ;;  %v1043_v46 = vmax.f32 %v4616_v58, %v4620_v60  ;;  %v2866_v51 = vld [vmem:[%s5554_s3 + $0x48] sm:$0xff]  }
  0xfb   :  { %6103 = vst [vmem:[#allocation121_spill] sm:$0xff] %v6102_v19  ;;  %v6106_v27 = vsel %vm4630_vm3, 4294967295, %v6105_v27  ;;  %v4644_v40 = vsel %vm4533_vm13, %v515_v21, -1e+30  ;;  %v4648_v10 = vsel %vm4607_vm5, %v516_v7, -1e+30  ;;  %v488_v3 = vmax.f32 %v4486_v63, %v4538_v13  ;;  %993 = vmax.xlane.f32.xlu0 %v992_v36 }
  0xfc   :  { %6107 = vst [vmem:[#allocation122_spill] sm:$0xff] %v6106_v27  ;;  %6108 = vst [vmem:[#allocation123_spill] sm:$0xff] %v4644_v40  ;;  %v791_v15 = vunpack.c.0.s8 %v728_v11  ;;  %v792_v35 = vunpack.c.1.s8 %v728_v11  ;;  %vm5731_vm7 = vcmask 7168   ;;  %v3161_v29 = vmov -1e+30   ;;  %v2864_v7 = vld [vmem:[%s5554_s3 + $0x40] sm:$0xff]  }
  0xfd   :  { %6109 = vst [vmem:[#allocation124_spill] sm:$0xff] %v4648_v10  ;;  %29 = vst.msk [vmem:[#allocation2] sm:$0xff] %vm5731_vm7, %v3161_v29  ;;  %v1040_v63 = vmax.f32 %v4644_v40, %v4648_v10  ;;  %1044 = vmax.xlane.f32.xlu1 %v1043_v46  ;;  %v4688_v62 = vsel %vm4624_vm10, %v487_v2, -1e+30  ;;  %v4692_v13 = vsel %vm4630_vm3, %v488_v3, -1e+30  ;;  %v519_v24 = vmax.f32 %v4547_v49, %v455_v54 }
  0xfe   :  { %30 = vst.msk [vmem:[#allocation2 + $0x8] sm:$0xff] %vm5731_vm7, %v3161_v29  ;;  %31 = vst.msk [vmem:[#allocation2 + $0x10] sm:$0xff] %vm5731_vm7, %v3161_v29  ;;  %v520_v8 = vmax.f32 %v4583_v42, %v456_v30  ;;  %vm4696_vm6 = vcmp.ne.s32.totalorder %v791_v15, 0  ;;  %v6112_v33 = vmov 0  ;;  %v6115_v34 = vmov 0  ;;  %2726 = vmatprep.subr.bf16.mxu0 %v2864_v7  ;;  %2838 = vmatprep.subr.bf16.mxu1 %v2864_v7  ;;  %v2867_v54 = vld [vmem:[%s5554_s3 + $0x8] sm:$0xff]  }
  0xff   :  { %32 = vst.msk [vmem:[#allocation2 + $0x18] sm:$0xff] %vm5731_vm7, %v3161_v29  ;;  %33 = vst.msk [vmem:[#allocation2 + $0x20] sm:$0xff] %vm5731_vm7, %v3161_v29  ;;  %1041 = vmax.xlane.f32.xlu0 %v1040_v63  ;;  %v6113_v33 = vsel %vm4696_vm6, 4294967295, %v6112_v33  ;;  %v998_v17 = vmax.f32 %v4688_v62, %v4692_v13  ;;  %v4708_v59 = vsel %vm4696_vm6, %v519_v24, -1e+30  ;;  %2727 = vmatpush3.bf16.msra.mxu0 %v2865_v44  ;;  %vm6120_vm6 = vcmask 7168  }
 0x100   :  { %34 = vst.msk [vmem:[#allocation2 + $0x28] sm:$0xff] %vm5731_vm7, %v3161_v29  ;;  %35 = vst.msk [vmem:[#allocation2 + $0x30] sm:$0xff] %vm5731_vm7, %v3161_v29  ;;  %2846 = vmatpush3.bf16.msra.mxu1 %v2865_v44  ;;  %2728 = vmatprep.subr.bf16.mxu0 %v2866_v51  ;;  %v2868_v3 = vld [vmem:[%s5554_s3 + $0x50] sm:$0xff]   ;;  %v2878_v27 = vld [vmem:[%s5554_s3 + $0x78] sm:$0xff]  }
 0x101   :  { %36 = vst.msk [vmem:[#allocation2 + $0x38] sm:$0xff] %vm5731_vm7, %v3161_v29  ;;  %37 = vst.msk [vmem:[#allocation2 + $0x40] sm:$0xff] %vm5731_vm7, %v3161_v29  ;;  %2839 = vmatprep.subr.bf16.mxu1 %v2866_v51  ;;  %v2869_v15 = vld [vmem:[%s5554_s3 + $0x10] sm:$0xff]  }
 0x102   :  { %38 = vst.msk [vmem:[#allocation2 + $0x48] sm:$0xff] %vm5731_vm7, %v3161_v29  ;;  %39 = vst.msk [vmem:[#allocation2 + $0x50] sm:$0xff] %vm5731_vm7, %v3161_v29  ;;  %v2877_v19 = vld [vmem:[%s5554_s3 + $0x30] sm:$0xff]  }
 0x103   :  { %40 = vst.msk [vmem:[#allocation2 + $0x58] sm:$0xff] %vm5731_vm7, %v3161_v29  ;;  %41 = vst.msk [vmem:[#allocation2 + $0x60] sm:$0xff] %vm5731_vm7, %v3161_v29  ;;  %999 = vmax.xlane.f32.xlu0 %v998_v17  ;;  %2729 = vmatpush3.bf16.msra.mxu0 %v2867_v54  ;;  %v2870_v17 = vld [vmem:[%s5554_s3 + $0x58] sm:$0xff]  }
 0x104   :  { %42 = vst.msk [vmem:[#allocation2 + $0x68] sm:$0xff] %vm5731_vm7, %v3161_v29  ;;  %43 = vst.msk [vmem:[#allocation2 + $0x70] sm:$0xff] %vm5731_vm7, %v3161_v29  ;;  %v4716_v21 = vld [vmem:[#allocation2] sm:$0xff]  ;;  %2847 = vmatpush3.bf16.msra.mxu1 %v2867_v54  ;;  %2730 = vmatprep.subr.bf16.mxu0 %v2868_v3 }
 0x105   :  { %44 = vst.msk [vmem:[#allocation2 + $0x78] sm:$0xff] %vm5731_vm7, %v3161_v29  ;;  %45 = vst.msk [vmem:[#allocation2 + $0x80] sm:$0xff] %vm5731_vm7, %v3161_v29  ;;  %v4727_v39 = vld [vmem:[#allocation2 + $0x8] sm:$0xff]  ;;  %v4741_v2 = vld [vmem:[#allocation2 + $0x10] sm:$0xff]  ;;  %2840 = vmatprep.subr.bf16.mxu1 %v2868_v3 }
 0x106   :  { %46 = vst.msk [vmem:[#allocation2 + $0x88] sm:$0xff] %vm5731_vm7, %v3161_v29  ;;  %47 = vst.msk [vmem:[#allocation2 + $0x90] sm:$0xff] %vm5731_vm7, %v3161_v29  ;;  %v4784_v3 = vld [vmem:[#allocation2 + $0x20] sm:$0xff] }
 0x107   :  { %48 = vst.msk [vmem:[#allocation2 + $0x98] sm:$0xff] %vm5731_vm7, %v3161_v29  ;;  %49 = vst.msk [vmem:[#allocation2 + $0xa0] sm:$0xff] %vm5731_vm7, %v3161_v29  ;;  %2731 = vmatpush3.bf16.msra.mxu0 %v2869_v15 }
 0x108   :  { %50 = vst.msk [vmem:[#allocation2 + $0xa8] sm:$0xff] %vm5731_vm7, %v3161_v29  ;;  %51 = vst.msk [vmem:[#allocation2 + $0xb0] sm:$0xff] %vm5731_vm7, %v3161_v29  ;;  %2848 = vmatpush3.bf16.msra.mxu1 %v2869_v15  ;;  %2732 = vmatprep.subr.bf16.mxu0 %v2870_v17  ;;  %v2872_v15 = vld [vmem:[%s5554_s3 + $0x60] sm:$0xff]  }
 0x109   :  { %52 = vst.msk [vmem:[#allocation2 + $0xb8] sm:$0xff] %vm5731_vm7, %v3161_v29  ;;  %53 = vst.msk [vmem:[#allocation2 + $0xc0] sm:$0xff] %vm5731_vm7, %v3161_v29  ;;  %2841 = vmatprep.subr.bf16.mxu1 %v2870_v17  ;;  %v4797_v17 = vld [vmem:[#allocation2 + $0x18] sm:$0xff] }
 0x10a   :  { %54 = vst.msk [vmem:[#allocation2 + $0xc8] sm:$0xff] %vm5731_vm7, %v3161_v29  ;;  %55 = vst.msk [vmem:[#allocation2 + $0xd0] sm:$0xff] %vm5731_vm7, %v3161_v29  ;;  %v4960_v45 = vld [vmem:[#allocation2 + $0x58] sm:$0xff] }
 0x10b   :  { %56 = vst.msk [vmem:[#allocation2 + $0xd8] sm:$0xff] %vm5731_vm7, %v3161_v29  ;;  %57 = vst.msk [vmem:[#allocation2 + $0xe0] sm:$0xff] %vm5731_vm7, %v3161_v29  ;;  %v4988_v14 = vld [vmem:[#allocation2 + $0x70] sm:$0xff] }
 0x10c   :  { %58 = vst.msk [vmem:[#allocation2 + $0xe8] sm:$0xff] %vm5731_vm7, %v3161_v29  ;;  %59 = vst.msk [vmem:[#allocation2 + $0xf0] sm:$0xff] %vm5731_vm7, %v3161_v29  ;;  %v4743_v46 = vld [vmem:[#allocation2 + $0x80] sm:$0xff] }
 0x10d   :  { %60 = vst.msk [vmem:[#allocation2 + $0xf8] sm:$0xff] %vm5731_vm7, %v3161_v29  ;;  %6110 = vst [vmem:[#allocation125_spill] sm:$0xff] %v4688_v62  ;;  %vm4700_vm7 = vcmp.ne.s32.totalorder %v792_v35, 0  ;;  %v4776_v44 = vld [vmem:[#allocation2 + $0x88] sm:$0xff] }
 0x10e   :  { %6111 = vst [vmem:[#allocation126_spill] sm:$0xff] %v4692_v13  ;;  %6114 = vst [vmem:[#allocation127_spill] sm:$0xff] %v6113_v33  ;;  %v6116_v34 = vsel %vm4700_vm7, 4294967295, %v6115_v34  ;;  %v4712_v49 = vsel %vm4700_vm7, %v520_v8, -1e+30  ;;  %v4760_v8 = vld [vmem:[#allocation2 + $0x90] sm:$0xff] }
 0x10f   :  { %6117 = vst [vmem:[#allocation128_spill] sm:$0xff] %v6116_v34  ;;  %6118 = vst [vmem:[#allocation129_spill] sm:$0xff] %v4708_v59  ;;  %v1046_v42 = vmax.f32 %v4708_v59, %v4712_v49  ;;  %v4810_v33 = vld [vmem:[#allocation2 + $0xa0] sm:$0xff]  ;;  %v4861_v25 = vld [vmem:[#allocation2 + $0xb0] sm:$0xff] }
 0x110   :  { %6119 = vst [vmem:[#allocation130_spill] sm:$0xff] %v4712_v49  ;;  %vm6121_vm7 = vmmov %vm6120_vm6  ;;  %v4869_v9 = vld [vmem:[#allocation2 + $0xa8] sm:$0xff]  ;;  %v4900_v41 = vld [vmem:[#allocation2 + $0xc0] sm:$0xff] }
 0x111   :  { %1047 = vmax.xlane.f32.xlu0 %v1046_v42  ;;  %v2871_v42 = vld [vmem:[%s5554_s3 + $0x18] sm:$0xff]   ;;  %vm6128_vm2 = vmmov %vm6120_vm6  ;;  %v4921_v13 = vld [vmem:[#allocation2 + $0x50] sm:$0xff] }
 0x112   :  { %2733 = vmatpush3.bf16.msra.mxu0 %v2871_v42  ;;  %2849 = vmatpush3.bf16.msra.mxu1 %v2871_v42  ;;  %v2874_v42 = vld [vmem:[%s5554_s3 + $0x68] sm:$0xff]   ;;  %v4908_v31 = vld [vmem:[#allocation2 + $0xb8] sm:$0xff]  ;;  %v4939_v62 = vld [vmem:[#allocation2 + $0xd0] sm:$0xff] }
 0x113   :  { %2734 = vmatprep.subr.bf16.mxu0 %v2872_v15  ;;  %2842 = vmatprep.subr.bf16.mxu1 %v2872_v15  ;;  %v4821_v15 = vld [vmem:[#allocation2 + $0x98] sm:$0xff]  ;;  %v4928_v49 = vld [vmem:[#allocation2 + $0x48] sm:$0xff]  ;;  %v4970_v52 = vld [vmem:[#allocation2 + $0xe0] sm:$0xff] }
 0x114   :  { %v4941_v10 = vld [vmem:[#allocation2 + $0xc8] sm:$0xff]  ;;  %v4975_v28 = vld [vmem:[#allocation2 + $0xd8] sm:$0xff] }
 0x11a   :  { %v955_v26 = vpop.xlane.xlu0 %954 }
 0x11b   :  { %v4725_v11 = vmax.f32 %v4716_v21, %v955_v26 }
 0x11d   :  { %2203 = vst.msk [vmem:[#allocation2] sm:$0xff] %vm6120_vm6, %v4725_v11  ;;  %1083 = vperm.xlu1 %2861, %v4725_v11  }
 0x120   :  { %v958_v30 = vpop.xlane.xlu1 %957 }
 0x121   :  { %v4739_v36 = vmax.f32 %v4727_v39, %v958_v30 }
 0x123   :  { %2204 = vst.msk [vmem:[#allocation2 + $0x8] sm:$0xff] %vm6120_vm6, %v4739_v36 }
 0x124   :  { %v961_v35 = vpop.xlane.xlu1 %960 }
 0x125   :  { %v1003_v29 = vpop.xlane.xlu0 %1002  ;;  %v4755_v63 = vmax.f32 %v4741_v2, %v961_v35  ;;  %v2873_v35 = vld [vmem:[%s5554_s3 + $0x20] sm:$0xff]  }
 0x126   :  { %v4758_v24 = vmax.f32 %v4743_v46, %v1003_v29  ;;  %2735 = vmatpush3.bf16.msra.mxu0 %v2873_v35  ;;  %2850 = vmatpush3.bf16.msra.mxu1 %v2873_v35 }
 0x127   :  { %1088 = vperm.xlu0 %2860, %v4739_v36   ;;  %2205 = vst.msk [vmem:[#allocation2 + $0x10] sm:$0xff] %vm6120_vm6, %v4755_v63  ;;  %2736 = vmatprep.subr.bf16.mxu0 %v2874_v42 }
 0x128   :  { %2219 = vst.msk [vmem:[#allocation2 + $0x80] sm:$0xff] %vm6121_vm7, %v4758_v24  ;;  %1163 = vperm.xlu1 %2861, %v4758_v24   ;;  %vm6122_vm7 = vmmov %vm6120_vm6  ;;  %2843 = vmatprep.subr.bf16.mxu1 %v2874_v42  ;;  %v4843_v42 = vld [vmem:[#allocation2 + $0x30] sm:$0xff] }
 0x12a   :  { %2737 = vmatpush3.bf16.msra.mxu0 %v2875_v0  ;;  %2851 = vmatpush3.bf16.msra.mxu1 %v2875_v0 }
 0x12b   :  { %1093 = vperm.xlu0 %2860, %v4755_v63   ;;  %2738 = vmatprep.subr.bf16.mxu0 %v2876_v50 }
 0x12c   :  { %2844 = vmatprep.subr.bf16.mxu1 %v2876_v50 }
 0x12d   :  { %v1009_v26 = vpop.xlane.xlu1 %1008 }
 0x12e   :  { %v4779_v51 = vmax.f32 %v4760_v8, %v1009_v26  ;;  %v1006_v54 = vpop.xlane.xlu0 %1005  ;;  %2739 = vmatpush3.bf16.msra.mxu0 %v2877_v19  ;;  %2852 = vmatpush3.bf16.msra.mxu1 %v2877_v19 }
 0x12f   :  { %v4782_v30 = vmax.f32 %v4776_v44, %v1006_v54  ;;  %2740 = vmatprep.subr.bf16.mxu0 %v2878_v27  ;;  %2845 = vmatprep.subr.bf16.mxu1 %v2878_v27  ;;  %v4885_v27 = vld [vmem:[#allocation2 + $0x40] sm:$0xff] }
 0x130   :  { %2221 = vst.msk [vmem:[#allocation2 + $0x90] sm:$0xff] %vm6122_vm7, %v4779_v51  ;;  %1173 = vperm.xlu0 %2860, %v4779_v51   ;;  %vm6123_vm7 = vmmov %vm6120_vm6 }
 0x131   :  { %2220 = vst.msk [vmem:[#allocation2 + $0x88] sm:$0xff] %vm6120_vm6, %v4782_v30  ;;  %1168 = vperm.xlu1 %2861, %v4782_v30  }
 0x134   :  { %v967_v26 = vpop.xlane.xlu1 %966 }
 0x135   :  { %v4805_v54 = vmax.f32 %v4784_v3, %v967_v26  ;;  %v964_v29 = vpop.xlane.xlu0 %963 }
 0x136   :  { %v4808_v7 = vmax.f32 %v4797_v17, %v964_v29 }
 0x137   :  { %2207 = vst.msk [vmem:[#allocation2 + $0x20] sm:$0xff] %vm6123_vm7, %v4805_v54  ;;  %1103 = vperm.xlu0 %2860, %v4805_v54   ;;  %vm6124_vm7 = vmmov %vm6120_vm6 }
 0x138   :  { %2206 = vst.msk [vmem:[#allocation2 + $0x18] sm:$0xff] %vm6120_vm6, %v4808_v7  ;;  %1098 = vperm.xlu1 %2861, %v4808_v7  }
 0x13b   :  { %v1015_v29 = vpop.xlane.xlu1 %1014 }
 0x13c   :  { %v4827_v26 = vmax.f32 %v4810_v33, %v1015_v29  ;;  %v4850_v29 = vld [vmem:[#allocation2 + $0x28] sm:$0xff] }
 0x13d   :  { %v1012_v34 = vpop.xlane.xlu0 %1011 }
 0x13e   :  { %v4830_v35 = vmax.f32 %v4821_v15, %v1012_v34  ;;  %2223 = vst.msk [vmem:[#allocation2 + $0xa0] sm:$0xff] %vm6124_vm7, %v4827_v26  ;;  %1183 = vperm.xlu0 %2860, %v4827_v26   ;;  %v2879_v34 = vld [vmem:[%s5554_s3 + $0x38] sm:$0xff]   ;;  %vm6125_vm7 = vmmov %vm6120_vm6 }
 0x13f   :  { %2741 = vmatpush3.bf16.msra.mxu0 %v2879_v34  ;;  %2853 = vmatpush3.bf16.msra.mxu1 %v2879_v34  ;;  %v4892_v34 = vld [vmem:[#allocation2 + $0x38] sm:$0xff] }
 0x140   :  { %2222 = vst.msk [vmem:[#allocation2 + $0x98] sm:$0xff] %vm6120_vm6, %v4830_v35  ;;  %1178 = vperm.xlu1 %2861, %v4830_v35  }
 0x145   :  { %v973_v0 = vpop.xlane.xlu1 %972 }
 0x146   :  { %v4853_v56 = vmax.f32 %v4843_v42, %v973_v0 }
 0x147   :  { %v970_v37 = vpop.xlane.xlu0 %969 }
 0x148   :  { %2209 = vst.msk [vmem:[#allocation2 + $0x30] sm:$0xff] %vm6125_vm7, %v4853_v56  ;;  %v4866_v50 = vmax.f32 %v4850_v29, %v970_v37  ;;  %1113 = vperm.xlu0 %2860, %v4853_v56   ;;  %vm6126_vm7 = vmmov %vm6120_vm6 }
 0x14a   :  { %2208 = vst.msk [vmem:[#allocation2 + $0x28] sm:$0xff] %vm6120_vm6, %v4866_v50  ;;  %1108 = vperm.xlu1 %2861, %v4866_v50  }
 0x14c   :  { %v1021_v0 = vpop.xlane.xlu1 %1020 }
 0x14d   :  { %v4875_v19 = vmax.f32 %v4861_v25, %v1021_v0 }
 0x14f   :  { %v1018_v6 = vpop.xlane.xlu0 %1017  ;;  %2225 = vst.msk [vmem:[#allocation2 + $0xb0] sm:$0xff] %vm6126_vm7, %v4875_v19  ;;  %1193 = vperm.xlu0 %2860, %v4875_v19   ;;  %vm6127_vm7 = vmmov %vm6120_vm6 }
 0x150   :  { %v4882_v48 = vmax.f32 %v4869_v9, %v1018_v6 }
 0x152   :  { %2224 = vst.msk [vmem:[#allocation2 + $0xa8] sm:$0xff] %vm6120_vm6, %v4882_v48  ;;  %1188 = vperm.xlu1 %2861, %v4882_v48  }
 0x156   :  { %v979_v0 = vpop.xlane.xlu1 %978 }
 0x157   :  { %v4895_v37 = vmax.f32 %v4885_v27, %v979_v0 }
 0x158   :  { %v976_v6 = vpop.xlane.xlu0 %975 }
 0x159   :  { %v4898_v1 = vmax.f32 %v4892_v34, %v976_v6  ;;  %2211 = vst.msk [vmem:[#allocation2 + $0x40] sm:$0xff] %vm6127_vm7, %v4895_v37  ;;  %1123 = vperm.xlu0 %2860, %v4895_v37   ;;  %vm6129_vm7 = vmmov %vm6128_vm2 }
 0x15b   :  { %2210 = vst.msk [vmem:[#allocation2 + $0x38] sm:$0xff] %vm6120_vm6, %v4898_v1  ;;  %1118 = vperm.xlu1 %2861, %v4898_v1   ;;  %vm6130_vm6 = vmmov %vm6128_vm2 }
 0x15e   :  { %v1027_v43 = vpop.xlane.xlu1 %1026 }
 0x15f   :  { %v4911_v0 = vmax.f32 %v4900_v41, %v1027_v43 }
 0x161   :  { %v1024_v6 = vpop.xlane.xlu0 %1023  ;;  %2227 = vst.msk [vmem:[#allocation2 + $0xc0] sm:$0xff] %vm6128_vm2, %v4911_v0  ;;  %1203 = vperm.xlu0 %2860, %v4911_v0  }
 0x162   :  { %v4918_v59 = vmax.f32 %v4908_v31, %v1024_v6 }
 0x164   :  { %2226 = vst.msk [vmem:[#allocation2 + $0xb8] sm:$0xff] %vm6129_vm7, %v4918_v59  ;;  %1198 = vperm.xlu1 %2861, %v4918_v59   ;;  %vm6131_vm7 = vmmov %vm6128_vm2 }
 0x167   :  { %v985_v43 = vpop.xlane.xlu1 %984 }
 0x168   :  { %v4931_v60 = vmax.f32 %v4921_v13, %v985_v43 }
 0x16a   :  { %v982_v6 = vpop.xlane.xlu0 %981  ;;  %2213 = vst.msk [vmem:[#allocation2 + $0x50] sm:$0xff] %vm6128_vm2, %v4931_v60  ;;  %1133 = vperm.xlu0 %2860, %v4931_v60  }
 0x16b   :  { %v4936_v58 = vmax.f32 %v4928_v49, %v982_v6  ;;  %v4955_v6 = vld [vmem:[#allocation2 + $0x60] sm:$0xff] }
 0x16d   :  { %2212 = vst.msk [vmem:[#allocation2 + $0x48] sm:$0xff] %vm6130_vm6, %v4936_v58  ;;  %1128 = vperm.xlu1 %2861, %v4936_v58   ;;  %vm6132_vm6 = vmmov %vm6128_vm2 }
 0x173   :  { %v1033_v43 = vpop.xlane.xlu1 %1032 }
 0x174   :  { %v4947_v40 = vmax.f32 %v4939_v62, %v1033_v43  ;;  %v1497_v43 = vsub.f32 %v4716_v21, %v4725_v11  ;;  %v1499_v21 = vsub.f32 %v4741_v2, %v4755_v63  ;;  %v4993_v2 = vld [vmem:[#allocation2 + $0x68] sm:$0xff] }
 0x175   :  { %v1030_v61 = vpop.xlane.xlu0 %1029 }
 0x176   :  { %v4950_v20 = vmax.f32 %v4941_v10, %v1030_v61  ;;  %2229 = vst.msk [vmem:[#allocation2 + $0xd0] sm:$0xff] %vm6131_vm7, %v4947_v40  ;;  %1213 = vperm.xlu0 %2860, %v4947_v40   ;;  %v1529_v55 = vmul.f32 1.442695, %v1497_v43  ;;  %vm6133_vm7 = vmmov %vm6128_vm2  ;;  %v1533_v63 = vmul.f32 1.442695, %v1499_v21  ;;  %v1501_v43 = vsub.f32 %v4784_v3, %v4805_v54  ;;  %v5013_v3 = vld [vmem:[#allocation2 + $0xe8] sm:$0xff] }
 0x177   :  { %v1500_v21 = vsub.f32 %v4797_v17, %v4808_v7  ;;  %v1502_v7 = vsub.f32 %v4850_v29, %v4866_v50  ;;  %v1504_v29 = vsub.f32 %v4892_v34, %v4898_v1  ;;  %v1506_v1 = vsub.f32 %v4928_v49, %v4936_v58 }
 0x178   :  { %2228 = vst.msk [vmem:[#allocation2 + $0xc8] sm:$0xff] %vm6128_vm2, %v4950_v20  ;;  %1208 = vperm.xlu1 %2861, %v4950_v20   ;;  %2880 = vpow2.f32 %v1529_v55  ;;  %v5008_v55 = vld [vmem:[#allocation2 + $0xf0] sm:$0xff]  ;;  %v1537_v54 = vmul.f32 1.442695, %v1501_v43  ;;  %v1505_v43 = vsub.f32 %v4885_v27, %v4895_v37  ;;  %v1507_v37 = vsub.f32 %v4921_v13, %v4931_v60 }
 0x179   :  { %2882 = vpow2.f32 %v1533_v63  ;;  %v1539_v27 = vmul.f32 1.442695, %v1502_v7  ;;  %v1543_v60 = vmul.f32 1.442695, %v1504_v29 }
 0x17a   :  { %2884 = vpow2.f32 %v1537_v54  ;;  %v5041_v54 = vld [vmem:[#allocation2 + $0xf8] sm:$0xff] }
 0x17d   :  { %v991_v23 = vpop.xlane.xlu1 %990 }
 0x17e   :  { %v4965_v61 = vmax.f32 %v4955_v6, %v991_v23  ;;  %v988_v22 = vpop.xlane.xlu0 %987 }
 0x17f   :  { %v4968_v4 = vmax.f32 %v4960_v45, %v988_v22 }
 0x180   :  { %2215 = vst.msk [vmem:[#allocation2 + $0x60] sm:$0xff] %vm6132_vm6, %v4965_v61  ;;  %1143 = vperm.xlu0 %2860, %v4965_v61   ;;  %vm6134_vm6 = vmmov %vm6128_vm2 }
 0x181   :  { %2214 = vst.msk [vmem:[#allocation2 + $0x58] sm:$0xff] %vm6133_vm7, %v4968_v4  ;;  %1138 = vperm.xlu1 %2861, %v4968_v4   ;;  %vm6135_vm7 = vmmov %vm6128_vm2 }
 0x182   :  { %v1039_v22 = vpop.xlane.xlu1 %1038 }
 0x183   :  { %v4983_v23 = vmax.f32 %v4970_v52, %v1039_v22  ;;  %v1036_v11 = vpop.xlane.xlu0 %1035 }
 0x184   :  { %v4986_v32 = vmax.f32 %v4975_v28, %v1036_v11  ;;  %v1498_v11 = vsub.f32 %v4727_v39, %v4739_v36  ;;  %v1503_v39 = vsub.f32 %v4843_v42, %v4853_v56  ;;  %v5031_v56 = vld [vmem:[#allocation2 + $0x78] sm:$0xff] }
 0x185   :  { %2231 = vst.msk [vmem:[#allocation2 + $0xe0] sm:$0xff] %vm6128_vm2, %v4983_v23  ;;  %1223 = vperm.xlu0 %2860, %v4983_v23  }
 0x186   :  { %2230 = vst.msk [vmem:[#allocation2 + $0xd8] sm:$0xff] %vm6134_vm6, %v4986_v32  ;;  %1218 = vperm.xlu1 %2861, %v4986_v32   ;;  %v997_v22 = vpop.xlane.xlu1 %996  ;;  %v1531_v36 = vmul.f32 1.442695, %v1498_v11  ;;  %vm6136_vm6 = vmmov %vm6128_vm2  ;;  %v1541_v42 = vmul.f32 1.442695, %v1503_v39  ;;  %v2881_v11 = vpop.eup %2880 }
 0x187   :  { %v5003_v38 = vmax.f32 %v4988_v14, %v997_v22  ;;  %v1545_v39 = vmul.f32 1.442695, %v1505_v43  ;;  %v1509_v43 = vsub.f32 %v4955_v6, %v4965_v61  ;;  %v1547_v6 = vmul.f32 1.442695, %v1506_v1 }
 0x188   :  { %v994_v16 = vpop.xlane.xlu0 %993  ;;  %2886 = vpow2.f32 %v1531_v36  ;;  %v2883_v36 = vpop.eup %2882  ;;  %v1508_v61 = vsub.f32 %v4960_v45, %v4968_v4 }
 0x189   :  { %v5006_v5 = vmax.f32 %v4993_v2, %v994_v16  ;;  %2217 = vst.msk [vmem:[#allocation2 + $0x70] sm:$0xff] %vm6135_vm7, %v5003_v38  ;;  %1153 = vperm.xlu0 %2860, %v5003_v38   ;;  %vm6137_vm7 = vmmov %vm6128_vm2  ;;  %2888 = vpow2.f32 %v1541_v42  ;;  %v1549_v42 = vmul.f32 1.442695, %v1507_v37  ;;  %v2885_v13 = vpop.eup %2884  ;;  %v1511_v7 = vsub.f32 %v4988_v14, %v5003_v38 }
 0x18a   :  { %v1045_v16 = vpop.xlane.xlu1 %1044  ;;  %v1551_v58 = vmul.f32 1.442695, %v1508_v61  ;;  %v6139_v38 = vsub.f32 %v4743_v46, %v4758_v24  ;;  %v6141_v24 = vsub.f32 %v4810_v33, %v4827_v26  ;;  %v6144_v33 = vsub.f32 %v4821_v15, %v4830_v35 }
 0x18b   :  { %2216 = vst.msk [vmem:[#allocation2 + $0x68] sm:$0xff] %vm6128_vm2, %v5006_v5  ;;  %1148 = vperm.xlu1 %2861, %v5006_v5   ;;  %v5023_v22 = vmax.f32 %v5008_v55, %v1045_v16  ;;  %v1510_v49 = vsub.f32 %v4993_v2, %v5006_v5  ;;  %v6140_v5 = vsub.f32 %v4760_v8, %v4779_v51 }
 0x18c   :  { %v1042_v12 = vpop.xlane.xlu0 %1041  ;;  %v1561_v14 = vmul.f32 1.442695, %v6139_v38  ;;  %v6143_v51 = vsub.f32 %v4861_v25, %v4875_v19  ;;  %v1567_v26 = vmul.f32 1.442695, %v6144_v33  ;;  %v6146_v25 = vsub.f32 %v4869_v9, %v4882_v48  ;;  %v6149_v38 = vld [vmem:[#allocation20_spill] sm:$0xff]  ;;  %v6152_v33 = vld [vmem:[#allocation30_spill] sm:$0xff] }
 0x18d   :  { %v5026_v63 = vmax.f32 %v5013_v3, %v1042_v12  ;;  %2233 = vst.msk [vmem:[#allocation2 + $0xf0] sm:$0xff] %vm6136_vm6, %v5023_v22  ;;  %1233 = vperm.xlu0 %2860, %v5023_v22   ;;  %v1535_v12 = vmul.f32 1.442695, %v1500_v21  ;;  %vm6138_vm6 = vmmov %vm6128_vm2  ;;  %v1555_v4 = vmul.f32 1.442695, %v1510_v49  ;;  %v1527_v61 = vsub.f32 %v5008_v55, %v5023_v22 }
 0x18e   :  { %v1565_v2 = vmul.f32 1.442695, %v6140_v5  ;;  %v1573_v1 = vmul.f32 1.442695, %v6143_v51  ;;  %v1571_v19 = vmul.f32 1.442695, %v6146_v25 }
 0x18f   :  { %2232 = vst.msk [vmem:[#allocation2 + $0xe8] sm:$0xff] %vm6137_vm7, %v5026_v63  ;;  %1228 = vperm.xlu1 %2861, %v5026_v63   ;;  %2890 = vpow2.f32 %v1535_v12  ;;  %v1553_v12 = vmul.f32 1.442695, %v1509_v43  ;;  %v1569_v43 = vmul.f32 1.442695, %v6141_v24  ;;  %v6150_v5 = vld [vmem:[#allocation26_spill] sm:$0xff] }
 0x190   :  { %v1000_v17 = vpop.xlane.xlu0 %999  ;;  %2892 = vpow2.f32 %v1545_v39  ;;  %v1557_v39 = vmul.f32 1.442695, %v1511_v7 }
 0x191   :  { %v1064_v16 = vmax.f32 %v5031_v56, %v1000_v17  ;;  %1627 = vperm.xlu0 %2860, %v2881_v11   ;;  %2894 = vpow2.f32 %v1539_v27 }
 0x192   :  { %v2887_v34 = vpop.eup %2886  ;;  %2896 = vpow2.f32 %v1549_v42 }
 0x193   :  { %2218 = vst.msk [vmem:[#allocation2 + $0x78] sm:$0xff] %vm6128_vm2, %v1064_v16  ;;  %1158 = vperm.xlu1 %2861, %v1064_v16   ;;  %2898 = vpow2.f32 %v1543_v60  ;;  %v2889_v17 = vpop.eup %2888  ;;  %v1512_v45 = vsub.f32 %v5031_v56, %v1064_v16  ;;  %v6142_v56 = vsub.f32 %v4776_v44, %v4782_v30  ;;  %v6145_v44 = vsub.f32 %v4900_v41, %v4911_v0 }
 0x194   :  { %2900 = vpow2.f32 %v1553_v12  ;;  %v1523_v12 = vsub.f32 %v4939_v62, %v4947_v40  ;;  %v6147_v41 = vsub.f32 %v4908_v31, %v4918_v59  ;;  %v1522_v62 = vsub.f32 %v4941_v10, %v4950_v20 }
 0x195   :  { %1637 = vperm.xlu0 %2860, %v2883_v36   ;;  %2902 = vpow2.f32 %v1547_v6  ;;  %v1559_v36 = vmul.f32 1.442695, %v1512_v45  ;;  %v1563_v16 = vmul.f32 1.442695, %v6142_v56  ;;  %v1577_v30 = vmul.f32 1.442695, %v6145_v44 }
 0x196   :  { %2904 = vpow2.f32 %v1557_v39  ;;  %v1581_v35 = vmul.f32 1.442695, %v1523_v12  ;;  %v1525_v6 = vsub.f32 %v4970_v52, %v4983_v23  ;;  %v1575_v40 = vmul.f32 1.442695, %v6147_v41  ;;  %v6151_v56 = vld [vmem:[#allocation23_spill] sm:$0xff] }
 0x197   :  { %2906 = vpow2.f32 %v1551_v58  ;;  %v1579_v52 = vmul.f32 1.442695, %v1522_v62  ;;  %v1524_v23 = vsub.f32 %v4975_v28, %v4986_v32  ;;  %v1589_v59 = vmul.f32 1.442695, %v1527_v61  ;;  %v6153_v12 = vld [vmem:[#allocation39_spill] sm:$0xff]  ;;  %v6155_v62 = vld [vmem:[#allocation37_spill] sm:$0xff] }
 0x198   :  { %2908 = vpow2.f32 %v1561_v14  ;;  %v1585_v48 = vmul.f32 1.442695, %v1525_v6  ;;  %v1526_v10 = vsub.f32 %v5013_v3, %v5026_v63  ;;  %v6148_v63 = vld [vmem:[#allocation19_spill] sm:$0xff] }
 0x199   :  { %1647 = vperm.xlu0 %2860, %v2885_v13   ;;  %v2891_v11 = vpop.eup %2890  ;;  %2910 = vpow2.f32 %v1555_v4  ;;  %v1583_v20 = vmul.f32 1.442695, %v1524_v23  ;;  %v6157_v61 = vld [vmem:[#allocation47_spill] sm:$0xff] }
 0x19a   :  { %v2893_v37 = vpop.eup %2892  ;;  %2912 = vpow2.f32 %v1565_v2  ;;  %v1587_v55 = vmul.f32 1.442695, %v1526_v10  ;;  %v6160_v10 = vld [vmem:[#allocation14_spill] sm:$0xff] }
 0x19b   :  { %v2895_v27 = vpop.eup %2894  ;;  %2914 = vpow2.f32 %v1559_v36  ;;  %vm6161_vm2 = vnez %v6160_v10 }
 0x19c   :  { %v2897_v29 = vpop.eup %2896  ;;  %2916 = vpow2.f32 %v1569_v43  ;;  %v1084_v3 = vpop.permute.xlu1 %1083 }
 0x19d   :  { %1657 = vperm.xlu0 %2860, %v2889_v17   ;;  %2918 = vpow2.f32 %v1563_v16  ;;  %v1242_v14 = vsub.f32 %v6149_v38, %v1084_v3 }
 0x19e   :  { %v1048_v50 = vpop.xlane.xlu0 %1047  ;;  %2920 = vpow2.f32 %v1573_v1 }
 0x19f   :  { %v5049_v21 = vmax.f32 %v5041_v54, %v1048_v50  ;;  %v2899_v50 = vpop.eup %2898  ;;  %2922 = vpow2.f32 %v1567_v26 }
 0x1a0   :  { %v2901_v42 = vpop.eup %2900  ;;  %2924 = vpow2.f32 %v1577_v30 }
 0x1a1   :  { %2234 = vst.msk [vmem:[#allocation2 + $0xf8] sm:$0xff] %vm6138_vm6, %v5049_v21  ;;  %1238 = vperm.xlu1 %2861, %v5049_v21   ;;  %1667 = vperm.xlu0 %2860, %v2893_v37   ;;  %v2903_v46 = vpop.eup %2902  ;;  %2926 = vpow2.f32 %v1571_v19  ;;  %v1528_v28 = vsub.f32 %v5041_v54, %v5049_v21  ;;  %v1307_v21 = vmul.f32 1.442695, %v1242_v14  ;;  %v6169_v14 = vld [vmem:[#allocation54_spill] sm:$0xff] }
 0x1a2   :  { %v2905_v60 = vpop.eup %2904  ;;  %2928 = vpow2.f32 %v1581_v35 }
 0x1a3   :  { %v2907_v8 = vpop.eup %2906  ;;  %2930 = vpow2.f32 %v1575_v40  ;;  %v1591_v58 = vmul.f32 1.442695, %v1528_v28 }
 0x1a4   :  { %v2909_v13 = vpop.eup %2908  ;;  %2932 = vpow2.f32 %v1585_v48 }
 0x1a5   :  { %1632 = vperm.xlu1 %2861, %v2887_v34   ;;  %1677 = vperm.xlu0 %2860, %v2897_v29   ;;  %v2911_v34 = vpop.eup %2910  ;;  %2934 = vpow2.f32 %v1579_v52 }
 0x1a6   :  { %v2913_v7 = vpop.eup %2912  ;;  %2936 = vpow2.f32 %v1589_v59  ;;  %v1089_v29 = vpop.permute.xlu0 %1088 }
 0x1a7   :  { %v2915_v15 = vpop.eup %2914  ;;  %2938 = vpow2.f32 %v1583_v20  ;;  %v1244_v2 = vsub.f32 %v6150_v5, %v1089_v29  ;;  %v1164_v43 = vpop.permute.xlu1 %1163  ;;  %v6158_v20 = vld [vmem:[#allocation8_spill] sm:$0xff] }
 0x1a8   :  { %v2917_v0 = vpop.eup %2916  ;;  %2940 = vpow2.f32 %v1587_v55  ;;  %vm6159_vm7 = vnez %v6158_v20  ;;  %v6162_v55 = vld [vmem:[#allocation40_spill] sm:$0xff] }
 0x1a9   :  { %1642 = vperm.xlu1 %2861, %v2891_v11   ;;  %1687 = vperm.xlu0 %2860, %v2901_v42   ;;  %v2919_v9 = vpop.eup %2918  ;;  %2942 = vpow2.f32 %v1591_v58  ;;  %vm2629_vm6 = vmpackc.low %vm6161_vm2, %vm6159_vm7  ;;  %v6163_v58 = vld [vmem:[#allocation7_spill] sm:$0xff] }
 0x1aa   :  { %v2921_v17 = vpop.eup %2920  ;;  %v1094_v24 = vpop.permute.xlu0 %1093  ;;  %vm6164_vm10 = vnez %v6163_v58 }
 0x1ab   :  { %v2923_v31 = vpop.eup %2922  ;;  %v1245_v16 = vsub.f32 %v6151_v56, %v1094_v24  ;;  %v1246_v26 = vsub.f32 %v6152_v33, %v1094_v24 }
 0x1ac   :  { %v2925_v11 = vpop.eup %2924 }
 0x1ad   :  { %1652 = vperm.xlu1 %2861, %v2895_v27   ;;  %1697 = vperm.xlu0 %2860, %v2905_v60   ;;  %v2927_v39 = vpop.eup %2926  ;;  %v1241_v27 = vsub.f32 %v6148_v63, %v1084_v3  ;;  %v1273_v60 = vsub.f32 %v3861_v47, %v1164_v43  ;;  %v1315_v35 = vmul.f32 1.442695, %v1246_v26  ;;  %v6167_v3 = vld [vmem:[#allocation43_spill] sm:$0xff] }
 0x1ae   :  { %v2929_v32 = vpop.eup %2928 }
 0x1af   :  { %v2931_v22 = vpop.eup %2930  ;;  %v1305_v54 = vmul.f32 1.442695, %v1241_v27  ;;  %v1174_v1 = vpop.permute.xlu0 %1173  ;;  %v6168_v27 = vld [vmem:[#allocation53_spill] sm:$0xff] }
 0x1b0   :  { %v2933_v49 = vpop.eup %2932 }
 0x1b1   :  { %1662 = vperm.xlu1 %2861, %v2899_v50   ;;  %1707 = vperm.xlu0 %2860, %v2909_v13   ;;  %v2935_v37 = vpop.eup %2934  ;;  %v1243_v50 = vsub.f32 %v3814_v57, %v1089_v29  ;;  %2944 = vpow2.f32 %v1305_v54  ;;  %v1313_v57 = vmul.f32 1.442695, %v1245_v16  ;;  %v1369_v13 = vmul.f32 1.442695, %v1273_v60  ;;  %v6172_v16 = vld [vmem:[#allocation60_spill] sm:$0xff] }
 0x1b2   :  { %v2937_v4 = vpop.eup %2936  ;;  %2946 = vpow2.f32 %v1307_v21 }
 0x1b3   :  { %v2939_v45 = vpop.eup %2938  ;;  %v1309_v42 = vmul.f32 1.442695, %v1243_v50 }
 0x1b4   :  { %v2941_v36 = vpop.eup %2940 }
 0x1b5   :  { %1672 = vperm.xlu1 %2861, %v2903_v46   ;;  %1717 = vperm.xlu0 %2860, %v2913_v7   ;;  %v1311_v46 = vmul.f32 1.442695, %v1244_v2  ;;  %2948 = vpow2.f32 %v1309_v42  ;;  %v2943_v51 = vpop.eup %2942  ;;  %v6170_v2 = vld [vmem:[#allocation49_spill] sm:$0xff]  ;;  %v6171_v42 = vld [vmem:[#allocation50_spill] sm:$0xff] }
 0x1b6   :  { %v1104_v47 = vpop.permute.xlu0 %1103 }
 0x1b7   :  { %2950 = vpow2.f32 %v1311_v46  ;;  %v1249_v28 = vsub.f32 %v6162_v55, %v1104_v47  ;;  %v1250_v63 = vsub.f32 %v6167_v3, %v1104_v47 }
 0x1b8   :  { %2952 = vpow2.f32 %v1313_v57 }
 0x1b9   :  { %1682 = vperm.xlu1 %2861, %v2907_v8   ;;  %1727 = vperm.xlu0 %2860, %v2917_v0   ;;  %v1274_v8 = vsub.f32 %v3865_v53, %v1164_v43  ;;  %2954 = vpow2.f32 %v1369_v13  ;;  %v6154_v53 = vld [vmem:[#allocation36_spill] sm:$0xff]  ;;  %v1278_v0 = vsub.f32 %v6155_v62, %v1174_v1  ;;  %v1321_v21 = vmul.f32 1.442695, %v1249_v28  ;;  %v6184_v62 = vld [vmem:[#allocation69_spill] sm:$0xff] }
 0x1ba   :  { %v1277_v6 = vsub.f32 %v6154_v53, %v1174_v1  ;;  %v1323_v5 = vmul.f32 1.442695, %v1250_v63  ;;  %v6181_v53 = vld [vmem:[#allocation24_spill] sm:$0xff] }
 0x1bb   :  { %v1371_v44 = vmul.f32 1.442695, %v1274_v8  ;;  %vm6182_vm2 = vnez %v6181_v53 }
 0x1bd   :  { %1692 = vperm.xlu1 %2861, %v2911_v34   ;;  %1737 = vperm.xlu0 %2860, %v2921_v17   ;;  %v1169_v34 = vpop.permute.xlu1 %1168  ;;  %2956 = vpow2.f32 %v1371_v44  ;;  %v1184_v59 = vpop.permute.xlu0 %1183  ;;  %v6174_v44 = vld [vmem:[#allocation18_spill] sm:$0xff] }
 0x1be   :  { %v1275_v30 = vsub.f32 %v3942_v18, %v1169_v34  ;;  %v1276_v25 = vsub.f32 %v6153_v12, %v1169_v34  ;;  %v1282_v46 = vsub.f32 %v6171_v42, %v1184_v59 }
 0x1c0   :  { %v1373_v19 = vmul.f32 1.442695, %v1275_v30  ;;  %v1375_v7 = vmul.f32 1.442695, %v1276_v25  ;;  %v1387_v13 = vmul.f32 1.442695, %v1282_v46 }
 0x1c1   :  { %1702 = vperm.xlu1 %2861, %v2915_v15   ;;  %1747 = vperm.xlu0 %2860, %v2925_v11   ;;  %v2945_v15 = vpop.eup %2944  ;;  %v1099_v41 = vpop.permute.xlu1 %1098  ;;  %v6176_v30 = vld [vmem:[#allocation25_spill] sm:$0xff]  ;;  %v6178_v25 = vld [vmem:[#allocation56_spill] sm:$0xff] }
 0x1c2   :  { %v2947_v40 = vpop.eup %2946  ;;  %v1248_v18 = vsub.f32 %v6157_v61, %v1099_v41  ;;  %2958 = vpow2.f32 %v1373_v19 }
 0x1c3   :  { %v2949_v52 = vpop.eup %2948  ;;  %2960 = vpow2.f32 %v1375_v7 }
 0x1c4   :  { %v2951_v23 = vpop.eup %2950  ;;  %v2633_v11 = vpack.c.bf16 %v2949_v52, %v2945_v15  ;;  %2962 = vpow2.f32 %v1315_v35  ;;  %v6179_v35 = vld [vmem:[#allocation17_spill] sm:$0xff] }
 0x1c5   :  { %1712 = vperm.xlu1 %2861, %v2919_v9   ;;  %1757 = vperm.xlu0 %2860, %v2929_v32   ;;  %v6156_v9 = vld [vmem:[#allocation44_spill] sm:$0xff]  ;;  %v1179_v32 = vpop.permute.xlu1 %1178  ;;  %v2953_v50 = vpop.eup %2952  ;;  %vm6180_vm7 = vnez %v6179_v35 }
 0x1c6   :  { %v1247_v48 = vsub.f32 %v6156_v9, %v1099_v41  ;;  %v1279_v38 = vsub.f32 %v6168_v27, %v1179_v32  ;;  %v2955_v24 = vpop.eup %2954  ;;  %v6183_v41 = vld [vmem:[#allocation59_spill] sm:$0xff] }
 0x1c7   :  { %v1114_v29 = vpop.permute.xlu0 %1113  ;;  %v2957_v56 = vpop.eup %2956 }
 0x1c8   :  { %v1317_v17 = vmul.f32 1.442695, %v1247_v48  ;;  %v1253_v19 = vsub.f32 %v6178_v25, %v1114_v29  ;;  %v6185_v48 = vld [vmem:[#allocation63_spill] sm:$0xff]  ;;  %v6210_v25 = vld [vmem:[#allocation28_spill] sm:$0xff] }
 0x1c9   :  { %1722 = vperm.xlu1 %2861, %v2923_v31   ;;  %1767 = vperm.xlu0 %2860, %v2933_v49   ;;  %v1319_v31 = vmul.f32 1.442695, %v1248_v18  ;;  %v6165_v49 = vld [vmem:[#allocation13_spill] sm:$0xff]  ;;  %v1109_v43 = vpop.permute.xlu1 %1108  ;;  %v6186_v18 = vld [vmem:[#allocation70_spill] sm:$0xff] }
 0x1ca   :  { %vm6166_vm3 = vnez %v6165_v49  ;;  %2964 = vpow2.f32 %v1317_v17  ;;  %v1251_v60 = vsub.f32 %v6172_v16, %v1109_v43 }
 0x1cb   :  { %vm2632_vm13 = vmpackc.low %vm6166_vm3, %vm6164_vm10  ;;  %2966 = vpow2.f32 %v1319_v31  ;;  %vm6177_vm3 = vnez %v6176_v30  ;;  %v6187_v31 = vld [vmem:[#allocation15_spill] sm:$0xff]  ;;  %v6209_v30 = vld [vmem:[#allocation86_spill] sm:$0xff] }
 0x1cc   :  { %v2959_v8 = vpop.eup %2958  ;;  %v1325_v34 = vmul.f32 1.442695, %v1251_v60 }
 0x1cd   :  { %1732 = vperm.xlu1 %2861, %v2927_v39   ;;  %1777 = vperm.xlu0 %2860, %v2937_v4   ;;  %v1377_v39 = vmul.f32 1.442695, %v1277_v6  ;;  %v1280_v4 = vsub.f32 %v6169_v14, %v1179_v32  ;;  %v2961_v33 = vpop.eup %2960  ;;  %v2681_v6 = vpack.c.bf16 %v2959_v8, %v2955_v24  ;;  %v6191_v32 = vld [vmem:[#allocation10_spill] sm:$0xff]  ;;  %v6196_v14 = vld [vmem:[#allocation76_spill] sm:$0xff] }
 0x1ce   :  { %v1194_v1 = vpop.permute.xlu0 %1193  ;;  %v2963_v12 = vpop.eup %2962  ;;  %v2678_v15 = vpack.c.bf16 %v2961_v33, %v2957_v56  ;;  %v6204_v56 = vld [vmem:[#allocation34_spill] sm:$0xff]  ;;  %v6206_v8 = vld [vmem:[#allocation72_spill] sm:$0xff] }
 0x1cf   :  { %v1383_v54 = vmul.f32 1.442695, %v1280_v4  ;;  %2968 = vpow2.f32 %v1377_v39  ;;  %v1285_v61 = vsub.f32 %v6185_v48, %v1194_v1  ;;  %vm6205_vm12 = vnez %v6204_v56  ;;  %v6235_v56 = vld [vmem:[#allocation104_spill] sm:$0xff] }
 0x1d1   :  { %1742 = vperm.xlu1 %2861, %v2931_v22   ;;  %v2630_v22 = vpack.c.bf16 %v2951_v23, %v2947_v40  ;;  %v1189_v47 = vpop.permute.xlu1 %1188  ;;  %v1254_v40 = vsub.f32 %v6183_v41, %v1114_v29  ;;  %v6198_v29 = vld [vmem:[#allocation22_spill] sm:$0xff]  ;;  %v6214_v41 = vld [vmem:[#allocation27_spill] sm:$0xff] }
 0x1d2   :  { %v1284_v52 = vsub.f32 %v6186_v18, %v1189_v47 }
 0x1d3   :  { %2631 = vmatprep.mubr.msk.bf16.mxu0 %vm2629_vm6, %v2630_v22  ;;  %vm2680_vm6 = vmpackc.low %vm6182_vm2, %vm6180_vm7  ;;  %vm6192_vm2 = vnez %v6191_v32  ;;  %v6193_v22 = vld [vmem:[#allocation29_spill] sm:$0xff]  ;;  %v1331_v49 = vmul.f32 1.442695, %v1254_v40  ;;  %v6216_v40 = vld [vmem:[#allocation42_spill] sm:$0xff] }
 0x1d4   :  { %2634 = vmatmul.mubr.msk.bf16.vlgmr.msra.gmra.mrb[0].mxu0 %vm2632_vm13, %v2633_v11  ;;  %vm6175_vm13 = vnez %v6174_v44  ;;  %v2965_v9 = vpop.eup %2964  ;;  %v1329_v11 = vmul.f32 1.442695, %v1253_v19  ;;  %v1391_v39 = vmul.f32 1.442695, %v1284_v52  ;;  %v6212_v19 = vld [vmem:[#allocation45_spill] sm:$0xff] }
 0x1d5   :  { %1752 = vperm.xlu1 %2861, %v2935_v37   ;;  %v1379_v37 = vmul.f32 1.442695, %v1278_v0  ;;  %vm2677_vm10 = vmpackc.low %vm6177_vm3, %vm6175_vm13  ;;  %v1283_v0 = vsub.f32 %v6184_v62, %v1189_v47  ;;  %v2967_v23 = vpop.eup %2966  ;;  %vm6188_vm13 = vnez %v6187_v31  ;;  %v2639_v20 = vpack.c.bf16 %v2965_v9, %v2953_v50  ;;  %v6200_v50 = vld [vmem:[#allocation35_spill] sm:$0xff]  ;;  %v6218_v9 = vld [vmem:[#allocation80_spill] sm:$0xff] }
 0x1d6   :  { %2679 = vmatprep.mubr.msk.bf16.mxu1 %vm2677_vm10, %v2678_v15  ;;  %v2636_v28 = vpack.c.bf16 %v2967_v23, %v2963_v12  ;;  %vm6194_vm10 = vnez %v6193_v22 }
 0x1d7   :  { %2970 = vpow2.f32 %v1379_v37  ;;  %v1389_v17 = vmul.f32 1.442695, %v1283_v0  ;;  %2682 = vmatmul.mubr.msk.bf16.vlgmr.msra.gmra.mrb[0].mxu1 %vm2680_vm6, %v2681_v6  ;;  %vm2638_vm5 = vmpackc.low %vm6194_vm10, %vm6192_vm2  ;;  %v6195_v37 = vld [vmem:[#allocation66_spill] sm:$0xff]  ;;  %vm6199_vm6 = vnez %v6198_v29  ;;  %vm6201_vm2 = vnez %v6200_v50  ;;  %v6232_v50 = vld [vmem:[#allocation97_spill] sm:$0xff] }
 0x1d8   :  { %v1124_v55 = vpop.permute.xlu0 %1123  ;;  %v1286_v3 = vsub.f32 %v6195_v37, %v1194_v1  ;;  %vm2683_vm10 = vmpackc.low %vm6201_vm2, %vm6199_vm6 }
 0x1d9   :  { %1762 = vperm.xlu1 %2861, %v2939_v45   ;;  %v1381_v45 = vmul.f32 1.442695, %v1279_v38  ;;  %v2969_v10 = vpop.eup %2968  ;;  %v1393_v38 = vmul.f32 1.442695, %v1285_v61  ;;  %v6219_v61 = vld [vmem:[#allocation82_spill] sm:$0xff] }
 0x1da   :  { %v1119_v63 = vpop.permute.xlu1 %1118  ;;  %v1395_v60 = vmul.f32 1.442695, %v1286_v3 }
 0x1db   :  { %2972 = vpow2.f32 %v1381_v45  ;;  %v1255_v4 = vsub.f32 %v6196_v14, %v1119_v63  ;;  %v6197_v45 = vld [vmem:[#allocation78_spill] sm:$0xff] }
 0x1dc   :  { %2974 = vpow2.f32 %v1383_v54  ;;  %v1256_v54 = vsub.f32 %v6197_v45, %v1119_v63  ;;  %v6231_v45 = vld [vmem:[#allocation91_spill] sm:$0xff] }
 0x1dd   :  { %1772 = vperm.xlu1 %2861, %v2941_v36   ;;  %v1281_v36 = vsub.f32 %v6170_v2, %v1184_v59  ;;  %2976 = vpow2.f32 %v1321_v21  ;;  %v6189_v59 = vld [vmem:[#allocation31_spill] sm:$0xff] }
 0x1de   :  { %2978 = vpow2.f32 %v1323_v5  ;;  %vm6190_vm3 = vnez %v6189_v59  ;;  %v1335_v42 = vmul.f32 1.442695, %v1256_v54 }
 0x1df   :  { %v1385_v26 = vmul.f32 1.442695, %v1281_v36  ;;  %2980 = vpow2.f32 %v1325_v34  ;;  %vm2635_vm7 = vmpackc.low %vm6190_vm3, %vm6188_vm13  ;;  %v1333_v36 = vmul.f32 1.442695, %v1255_v4  ;;  %vm6215_vm3 = vnez %v6214_v41 }
 0x1e0   :  { %2637 = vmatprep.mubr.msk.bf16.mxu0 %vm2635_vm7, %v2636_v28  ;;  %v1204_v46 = vpop.permute.xlu0 %1203  ;;  %vm6217_vm7 = vnez %v6216_v40  ;;  %v6226_v28 = vld [vmem:[#allocation94_spill] sm:$0xff]  ;;  %v6246_v40 = vld [vmem:[#allocation108_spill] sm:$0xff] }
 0x1e1   :  { %1782 = vperm.xlu1 %2861, %v2943_v51   ;;  %v6173_v51 = vld [vmem:[#allocation62_spill] sm:$0xff]  ;;  %v2971_v58 = vpop.eup %2970  ;;  %2640 = vmatmul.mubr.msk.bf16.gmra.mrb[4].mxu0 %vm2638_vm5, %v2639_v20  ;;  %vm6213_vm5 = vnez %v6212_v19  ;;  %vm2644_vm6 = vmpackc.low %vm6217_vm7, %vm6215_vm3  ;;  %v1289_v48 = vsub.f32 %v6218_v9, %v1204_v46  ;;  %v1290_v18 = vsub.f32 %v6219_v61, %v1204_v46  ;;  %v6248_v61 = vld [vmem:[#allocation48_spill] sm:$0xff] }
 0x1e2   :  { %v1252_v57 = vsub.f32 %v6173_v51, %v1109_v43  ;;  %v6202_v43 = vld [vmem:[#allocation21_spill] sm:$0xff]  ;;  %v1257_v51 = vsub.f32 %v6206_v8, %v1124_v55 }
 0x1e3   :  { %vm6203_vm4 = vnez %v6202_v43  ;;  %v1199_v33 = vpop.permute.xlu1 %1198  ;;  %v1401_v63 = vmul.f32 1.442695, %v1289_v48 }
 0x1e4   :  { %v1327_v7 = vmul.f32 1.442695, %v1252_v57  ;;  %vm2686_vm13 = vmpackc.low %vm6205_vm12, %vm6203_vm4  ;;  %v6207_v57 = vld [vmem:[#allocation75_spill] sm:$0xff]  ;;  %v1288_v12 = vsub.f32 %v6209_v30, %v1199_v33  ;;  %vm6211_vm12 = vnez %v6210_v25  ;;  %v1337_v15 = vmul.f32 1.442695, %v1257_v51  ;;  %v6242_v25 = vld [vmem:[#allocation58_spill] sm:$0xff] }
 0x1e5   :  { %v2973_v27 = vpop.eup %2972  ;;  %v1258_v1 = vsub.f32 %v6207_v57, %v1124_v55  ;;  %vm2641_vm4 = vmpackc.low %vm6213_vm5, %vm6211_vm12  ;;  %v6224_v55 = vld [vmem:[#allocation52_spill] sm:$0xff] }
 0x1e6   :  { %2982 = vpow2.f32 %v1327_v7  ;;  %v2975_v21 = vpop.eup %2974  ;;  %v2687_v5 = vpack.c.bf16 %v2973_v27, %v2969_v10  ;;  %v1399_v52 = vmul.f32 1.442695, %v1288_v12  ;;  %v6221_v10 = vld [vmem:[#allocation93_spill] sm:$0xff]  ;;  %v1403_v27 = vmul.f32 1.442695, %v1290_v18  ;;  %v6240_v12 = vld [vmem:[#allocation38_spill] sm:$0xff] }
 0x1e7   :  { %2984 = vpow2.f32 %v1385_v26  ;;  %v2977_v2 = vpop.eup %2976  ;;  %v2684_v24 = vpack.c.bf16 %v2975_v21, %v2971_v58  ;;  %v1339_v0 = vmul.f32 1.442695, %v1258_v1  ;;  %v6227_v58 = vld [vmem:[#allocation32_spill] sm:$0xff]  ;;  %v6236_v1 = vld [vmem:[#allocation41_spill] sm:$0xff] }
 0x1e8   :  { %2986 = vpow2.f32 %v1387_v13  ;;  %v2979_v16 = vpop.eup %2978  ;;  %v6208_v13 = vld [vmem:[#allocation85_spill] sm:$0xff]  ;;  %vm6228_vm3 = vnez %v6227_v58  ;;  %vm6237_vm5 = vnez %v6236_v1  ;;  %v6250_v18 = vld [vmem:[#allocation68_spill] sm:$0xff] }
 0x1e9   :  { %2988 = vpow2.f32 %v1389_v17  ;;  %2685 = vmatprep.mubr.msk.bf16.mxu1 %vm2683_vm10, %v2684_v24  ;;  %v2981_v26 = vpop.eup %2980  ;;  %v1287_v34 = vsub.f32 %v6208_v13, %v1199_v33  ;;  %v1134_v53 = vpop.permute.xlu0 %1133  ;;  %v6220_v17 = vld [vmem:[#allocation87_spill] sm:$0xff]  ;;  %vm6225_vm10 = vnez %v6224_v55  ;;  %v6238_v33 = vld [vmem:[#allocation61_spill] sm:$0xff] }
 0x1ea   :  { %2990 = vpow2.f32 %v1391_v39  ;;  %2688 = vmatmul.mubr.msk.bf16.gmra.mrb[4].mxu1 %vm2686_vm13, %v2687_v5  ;;  %v2645_v7 = vpack.c.bf16 %v2981_v26, %v2977_v2  ;;  %v1261_v31 = vsub.f32 %v6220_v17, %v1134_v53  ;;  %v6222_v39 = vld [vmem:[#allocation33_spill] sm:$0xff]  ;;  %v1262_v54 = vsub.f32 %v6231_v45, %v1134_v53  ;;  %v6234_v24 = vld [vmem:[#allocation103_spill] sm:$0xff] }
 0x1eb   :  { %2992 = vpow2.f32 %v1329_v11  ;;  %v1397_v35 = vmul.f32 1.442695, %v1287_v34  ;;  %vm6223_vm2 = vnez %v6222_v39 }
 0x1ec   :  { %2994 = vpow2.f32 %v1331_v49  ;;  %v1129_v59 = vpop.permute.xlu1 %1128  ;;  %vm2689_vm13 = vmpackc.low %vm6225_vm10, %vm6223_vm2  ;;  %v6229_v49 = vld [vmem:[#allocation51_spill] sm:$0xff]  ;;  %v1345_v21 = vmul.f32 1.442695, %v1261_v31  ;;  %v1347_v34 = vmul.f32 1.442695, %v1262_v54  ;;  %vm6241_vm2 = vnez %v6240_v12  ;;  %v6259_v54 = vld [vmem:[#allocation57_spill] sm:$0xff] }
 0x1ed   :  { %2996 = vpow2.f32 %v1393_v38  ;;  %v1259_v11 = vsub.f32 %v6221_v10, %v1129_v59  ;;  %v1260_v32 = vsub.f32 %v6226_v28, %v1129_v59  ;;  %vm6230_vm7 = vnez %v6229_v49  ;;  %v6252_v10 = vld [vmem:[#allocation46_spill] sm:$0xff]  ;;  %v6257_v49 = vld [vmem:[#allocation112_spill] sm:$0xff]  ;;  %v6271_v12 = vld [vmem:[#allocation115_spill] sm:$0xff] }
 0x1ee   :  { %2998 = vpow2.f32 %v1333_v36  ;;  %vm2692_vm12 = vmpackc.low %vm6230_vm7, %vm6228_vm3  ;;  %vm6243_vm10 = vnez %v6242_v25  ;;  %vm6249_vm3 = vnez %v6248_v61  ;;  %vm6251_vm7 = vnez %v6250_v18  ;;  %v6256_v28 = vld [vmem:[#allocation110_spill] sm:$0xff]  ;;  %v6280_v61 = vld [vmem:[#allocation83_spill] sm:$0xff] }
 0x1ef   :  { %3000 = vpow2.f32 %v1335_v42  ;;  %v1341_v38 = vmul.f32 1.442695, %v1259_v11  ;;  %v1343_v29 = vmul.f32 1.442695, %v1260_v32  ;;  %v6233_v42 = vld [vmem:[#allocation101_spill] sm:$0xff]  ;;  %v6254_v11 = vld [vmem:[#allocation67_spill] sm:$0xff] }
 0x1f0   :  { %v2983_v44 = vpop.eup %2982  ;;  %3002 = vpow2.f32 %v1395_v60 }
 0x1f1   :  { %v2985_v47 = vpop.eup %2984  ;;  %v2642_v6 = vpack.c.bf16 %v2983_v44, %v2979_v16  ;;  %3004 = vpow2.f32 %v1397_v35 }
 0x1f2   :  { %v2987_v62 = vpop.eup %2986  ;;  %3006 = vpow2.f32 %v1399_v52 }
 0x1f3   :  { %v2989_v23 = vpop.eup %2988  ;;  %2643 = vmatprep.mubr.msk.bf16.mxu0 %vm2641_vm4, %v2642_v6  ;;  %3008 = vpow2.f32 %v1337_v15  ;;  %vm6239_vm4 = vnez %v6238_v33  ;;  %v6245_v6 = vld [vmem:[#allocation107_spill] sm:$0xff] }
 0x1f4   :  { %v2991_v20 = vpop.eup %2990  ;;  %2646 = vmatmul.mubr.msk.bf16.gmra.mrb[8].mxu0 %vm2644_vm6, %v2645_v7  ;;  %v2693_v37 = vpack.c.bf16 %v2989_v23, %v2985_v47  ;;  %3010 = vpow2.f32 %v1339_v0  ;;  %vm2647_vm6 = vmpackc.low %vm6239_vm4, %vm6237_vm5  ;;  %v6244_v47 = vld [vmem:[#allocation106_spill] sm:$0xff]  ;;  %v6247_v0 = vld [vmem:[#allocation109_spill] sm:$0xff]  ;;  %vm6255_vm5 = vnez %v6254_v11 }
 0x1f5   :  { %v2690_v22 = vpack.c.bf16 %v2991_v20, %v2987_v62  ;;  %v2993_v3 = vpop.eup %2992  ;;  %v1214_v14 = vpop.permute.xlu0 %1213  ;;  %3012 = vpow2.f32 %v1341_v38  ;;  %v6283_v11 = vld [vmem:[#allocation120_spill] sm:$0xff] }
 0x1f6   :  { %v2995_v4 = vpop.eup %2994  ;;  %v1293_v5 = vsub.f32 %v6232_v50, %v1214_v14  ;;  %v1294_v46 = vsub.f32 %v6233_v42, %v1214_v14  ;;  %3014 = vpow2.f32 %v1343_v29 }
 0x1f7   :  { %v1209_v2 = vpop.permute.xlu1 %1208  ;;  %2691 = vmatprep.mubr.msk.bf16.mxu1 %vm2689_vm13, %v2690_v22  ;;  %v2997_v36 = vpop.eup %2996  ;;  %3016 = vpow2.f32 %v1401_v63  ;;  %vm2650_vm13 = vmpackc.low %vm6243_vm10, %vm6241_vm2  ;;  %vm6253_vm2 = vnez %v6252_v10 }
 0x1f8   :  { %v1291_v43 = vsub.f32 %v6234_v24, %v1209_v2  ;;  %v1292_v16 = vsub.f32 %v6235_v56, %v1209_v2  ;;  %2694 = vmatmul.mubr.msk.bf16.gmra.mrb[8].mxu1 %vm2692_vm12, %v2693_v37  ;;  %v2999_v60 = vpop.eup %2998  ;;  %3018 = vpow2.f32 %v1403_v27  ;;  %v1409_v19 = vmul.f32 1.442695, %v1293_v5  ;;  %vm2695_vm12 = vmpackc.low %vm6251_vm7, %vm6249_vm3  ;;  %v6263_v5 = vld [vmem:[#allocation111_spill] sm:$0xff] }
 0x1f9   :  { %v3001_v8 = vpop.eup %3000  ;;  %v2651_v26 = vpack.c.bf16 %v2999_v60, %v2993_v3  ;;  %3020 = vpow2.f32 %v1345_v21  ;;  %v1411_v7 = vmul.f32 1.442695, %v1294_v46  ;;  %vm2698_vm4 = vmpackc.low %vm6255_vm5, %vm6253_vm2  ;;  %v6258_v3 = vld [vmem:[#allocation113_spill] sm:$0xff]  ;;  %v6264_v24 = vld [vmem:[#allocation55_spill] sm:$0xff] }
 0x1fa   :  { %v1405_v51 = vmul.f32 1.442695, %v1291_v43  ;;  %v1407_v57 = vmul.f32 1.442695, %v1292_v16  ;;  %v3003_v13 = vpop.eup %3002  ;;  %v2648_v30 = vpack.c.bf16 %v3001_v8, %v2995_v4  ;;  %v6261_v21 = vld [vmem:[#allocation77_spill] sm:$0xff]  ;;  %vm6265_vm3 = vnez %v6264_v24  ;;  %v6266_v43 = vld [vmem:[#allocation74_spill] sm:$0xff] }
 0x1fb   :  { %v3005_v53 = vpop.eup %3004  ;;  %vm6262_vm10 = vnez %v6261_v21  ;;  %vm6267_vm7 = vnez %v6266_v43  ;;  %v6268_v16 = vld [vmem:[#allocation114_spill] sm:$0xff]  ;;  %v6269_v8 = vld [vmem:[#allocation116_spill] sm:$0xff] }
 0x1fc   :  { %3022 = vpow2.f32 %v1405_v51  ;;  %2649 = vmatprep.mubr.msk.bf16.mxu0 %vm2647_vm6, %v2648_v30  ;;  %v3007_v48 = vpop.eup %3006  ;;  %v2699_v52 = vpack.c.bf16 %v3005_v53, %v2997_v36  ;;  %vm6260_vm6 = vnez %v6259_v54  ;;  %v6293_v24 = vld [vmem:[#allocation130_spill] sm:$0xff] }
 0x1fd   :  { %3024 = vpow2.f32 %v1407_v57  ;;  %2652 = vmatmul.mubr.msk.bf16.gmra.mrb[12].mxu0 %vm2650_vm13, %v2651_v26  ;;  %v3009_v23 = vpop.eup %3008  ;;  %v2696_v20 = vpack.c.bf16 %v3007_v48, %v3003_v13  ;;  %vm2653_vm13 = vmpackc.low %vm6262_vm10, %vm6260_vm6  ;;  %v6270_v57 = vld [vmem:[#allocation117_spill] sm:$0xff]  ;;  %v6278_v48 = vld [vmem:[#allocation64_spill] sm:$0xff]  ;;  %vm6281_vm10 = vnez %v6280_v61 }
 0x1fe   :  { %3026 = vpow2.f32 %v1347_v34  ;;  %v3011_v39 = vpop.eup %3010  ;;  %vm6279_vm6 = vnez %v6278_v48  ;;  %v6311_v48 = vld [vmem:[#allocation16_spill] sm:$0xff] }
 0x1ff   :  { %v1144_v44 = vpop.permute.xlu0 %1143  ;;  %3028 = vpow2.f32 %v1409_v19  ;;  %2697 = vmatprep.mubr.msk.bf16.mxu1 %vm2695_vm12, %v2696_v20  ;;  %v3013_v27 = vpop.eup %3012  ;;  %vm2656_vm12 = vmpackc.low %vm6267_vm7, %vm6265_vm3 }
 0x200   :  { %v1265_v15 = vsub.f32 %v6244_v47, %v1144_v44  ;;  %v1139_v35 = vpop.permute.xlu1 %1138  ;;  %v1266_v41 = vsub.f32 %v6245_v6, %v1144_v44  ;;  %3030 = vpow2.f32 %v1411_v7  ;;  %2700 = vmatmul.mubr.msk.bf16.gmra.mrb[12].mxu1 %vm2698_vm4, %v2699_v52  ;;  %v3015_v38 = vpop.eup %3014  ;;  %v2657_v29 = vpack.c.bf16 %v3013_v27, %v3009_v23  ;;  %v6272_v47 = vld [vmem:[#allocation65_spill] sm:$0xff]  ;;  %v6282_v23 = vld [vmem:[#allocation119_spill] sm:$0xff] }
 0x201   :  { %v1263_v62 = vsub.f32 %v6246_v40, %v1139_v35  ;;  %v1264_v9 = vsub.f32 %v6247_v0, %v1139_v35  ;;  %v3017_v50 = vpop.eup %3016  ;;  %v2654_v46 = vpack.c.bf16 %v3015_v38, %v3011_v39  ;;  %vm6273_vm2 = vnez %v6272_v47  ;;  %v6303_v47 = vld [vmem:[#allocation11_spill] sm:$0xff] }
 0x202   :  { %v1353_v55 = vmul.f32 1.442695, %v1265_v15  ;;  %v1355_v58 = vmul.f32 1.442695, %v1266_v41  ;;  %v3019_v56 = vpop.eup %3018  ;;  %v6274_v15 = vld [vmem:[#allocation84_spill] sm:$0xff]  ;;  %v6276_v41 = vld [vmem:[#allocation123_spill] sm:$0xff] }
 0x203   :  { %v1349_v17 = vmul.f32 1.442695, %v1263_v62  ;;  %v1351_v31 = vmul.f32 1.442695, %v1264_v9  ;;  %v3021_v33 = vpop.eup %3020  ;;  %2655 = vmatprep.mubr.msk.bf16.mxu0 %vm2653_vm13, %v2654_v46  ;;  %vm6275_vm5 = vnez %v6274_v15  ;;  %v6277_v62 = vld [vmem:[#allocation124_spill] sm:$0xff]  ;;  %vm2704_vm13 = vmpackc.low %vm6281_vm10, %vm6279_vm6 }
 0x204   :  { %v1224_v59 = vpop.permute.xlu0 %1223  ;;  %vm2701_vm4 = vmpackc.low %vm6275_vm5, %vm6273_vm2 }
 0x205   :  { %v1297_v32 = vsub.f32 %v6256_v28, %v1224_v59  ;;  %v1219_v22 = vpop.permute.xlu1 %1218  ;;  %3032 = vpow2.f32 %v1349_v17  ;;  %v1298_v2 = vsub.f32 %v6263_v5, %v1224_v59  ;;  %2658 = vmatmul.mubr.msk.bf16.gmra.mrb[16].mxu0 %vm2656_vm12, %v2657_v29 }
 0x206   :  { %v1295_v37 = vsub.f32 %v6257_v49, %v1219_v22  ;;  %v1296_v63 = vsub.f32 %v6258_v3, %v1219_v22  ;;  %3034 = vpow2.f32 %v1351_v31  ;;  %v3023_v26 = vpop.eup %3022  ;;  %v3162_v3 = vmov 32  }
 0x207   :  { %3036 = vpow2.f32 %v1353_v55  ;;  %v1417_v36 = vmul.f32 1.442695, %v1297_v32  ;;  %v3025_v44 = vpop.eup %3024  ;;  %v1419_v30 = vmul.f32 1.442695, %v1298_v2  ;;  %v2705_v35 = vpack.c.bf16 %v3023_v26, %v3017_v50  ;;  %v6284_v32 = vld [vmem:[#allocation125_spill] sm:$0xff]  ;;  %2862 = vset.pattern.permute.xlu0 %v3162_v3  ;;  %2863 = vset.pattern.permute.xlu1 %v3162_v3 }
 0x208   :  { %v1413_v14 = vmul.f32 1.442695, %v1295_v37  ;;  %v1415_v4 = vmul.f32 1.442695, %v1296_v63  ;;  %v1154_v45 = vpop.permute.xlu0 %1153  ;;  %3038 = vpow2.f32 %v1355_v58  ;;  %v3027_v53 = vpop.eup %3026  ;;  %v2702_v9 = vpack.c.bf16 %v3025_v44, %v3019_v56  ;;  %v6285_v58 = vld [vmem:[#allocation126_spill] sm:$0xff]  ;;  %v6286_v37 = vld [vmem:[#allocation73_spill] sm:$0xff] }
 0x209   :  { %v1269_v60 = vsub.f32 %v6268_v16, %v1154_v45  ;;  %v1270_v25 = vsub.f32 %v6271_v12, %v1154_v45  ;;  %v3029_v18 = vpop.eup %3028  ;;  %vm6287_vm3 = vnez %v6286_v37  ;;  %v6294_v56 = vld [vmem:[#allocation81_spill] sm:$0xff]  ;;  %v6327_v37 = vld [vmem:[#allocation127_spill] sm:$0xff] }
 0x20a   :  { %v1149_v42 = vpop.permute.xlu1 %1148  ;;  %3040 = vpow2.f32 %v1413_v14  ;;  %v3031_v52 = vpop.eup %3030  ;;  %2703 = vmatprep.mubr.msk.bf16.mxu1 %vm2701_vm4, %v2702_v9  ;;  %vm2659_vm7 = vmpackc.low %vm4373_vm0, %vm6287_vm3  ;;  %v6289_v14 = vld [vmem:[#allocation71_spill] sm:$0xff]  ;;  %vm6295_vm0 = vnez %v6294_v56 }
 0x20b   :  { %v1267_v51 = vsub.f32 %v6269_v8, %v1149_v42  ;;  %v1268_v1 = vsub.f32 %v6270_v57, %v1149_v42  ;;  %3042 = vpow2.f32 %v1415_v4  ;;  %v1361_v6 = vmul.f32 1.442695, %v1269_v60  ;;  %2706 = vmatmul.mubr.msk.bf16.gmra.mrb[16].mxu1 %vm2704_vm13, %v2705_v35  ;;  %v6292_v42 = vld [vmem:[#allocation129_spill] sm:$0xff]  ;;  %v6297_v57 = vld [vmem:[#allocation79_spill] sm:$0xff] }
 0x20c   :  { %3044 = vpow2.f32 %v1417_v36  ;;  %v1234_v19 = vpop.permute.xlu0 %1233  ;;  %v1363_v10 = vmul.f32 1.442695, %v1270_v25  ;;  %vm6290_vm12 = vnez %v6289_v14  ;;  %vm6298_vm5 = vnez %v6297_v57  ;;  %v6309_v9 = vld [vmem:[#allocation95_spill] sm:$0xff] }
 0x20d   :  { %v1357_v13 = vmul.f32 1.442695, %v1267_v51  ;;  %v1359_v34 = vmul.f32 1.442695, %v1268_v1  ;;  %v1301_v17 = vsub.f32 %v6282_v23, %v1234_v19  ;;  %v1302_v39 = vsub.f32 %v6283_v11, %v1234_v19  ;;  %vm2662_vm2 = vmpackc.low %vm4355_vm15, %vm6290_vm12  ;;  %v6315_v23 = vld [vmem:[#allocation122_spill] sm:$0xff]  ;;  %v6319_v11 = vld [vmem:[#allocation121_spill] sm:$0xff] }
 0x20e   :  { %v1229_v7 = vpop.permute.xlu1 %1228  ;;  %vm2707_vm15 = vmpackc.low %vm4434_vm9, %vm6295_vm0  ;;  %vm6316_vm12 = vnez %v6315_v23 }
 0x20f   :  { %v1299_v40 = vsub.f32 %v6276_v41, %v1229_v7  ;;  %v1300_v0 = vsub.f32 %v6277_v62, %v1229_v7  ;;  %3046 = vpow2.f32 %v1357_v13  ;;  %v3033_v20 = vpop.eup %3032  ;;  %v1425_v54 = vmul.f32 1.442695, %v1301_v17  ;;  %vm2710_vm4 = vmpackc.low %vm4428_vm11, %vm6298_vm5  ;;  %v6307_v41 = vld [vmem:[#allocation118_spill] sm:$0xff] }
 0x210   :  { %3048 = vpow2.f32 %v1359_v34  ;;  %v3035_v28 = vpop.eup %3034  ;;  %v2663_v63 = vpack.c.bf16 %v3033_v20, %v3021_v33  ;;  %v1427_v5 = vmul.f32 1.442695, %v1302_v39  ;;  %vm2665_vm9 = vmpackc.low %vm4478_vm1, %vm4349_vm8  ;;  %vm6304_vm11 = vnez %v6303_v47 }
 0x211   :  { %v1421_v31 = vmul.f32 1.442695, %v1299_v40  ;;  %v1423_v59 = vmul.f32 1.442695, %v1300_v0  ;;  %3050 = vpow2.f32 %v1419_v30  ;;  %v3037_v27 = vpop.eup %3036  ;;  %v2660_v38 = vpack.c.bf16 %v3035_v28, %v3027_v53  ;;  %vm2668_vm6 = vmpackc.low %vm6304_vm11, %vm4343_vm14  ;;  %v6321_v28 = vld [vmem:[#allocation12_spill] sm:$0xff] }
 0x212   :  { %v1159_v55 = vpop.permute.xlu1 %1158  ;;  %3052 = vpow2.f32 %v1361_v6  ;;  %v3039_v45 = vpop.eup %3038  ;;  %v6305_v6 = vld [vmem:[#allocation96_spill] sm:$0xff]  ;;  %vm6308_vm13 = vnez %v6307_v41  ;;  %vm6310_vm1 = vnez %v6309_v9  ;;  %vm6312_vm8 = vnez %v6311_v48 }
 0x213   :  { %v1271_v22 = vsub.f32 %v6284_v32, %v1159_v55  ;;  %v1272_v49 = vsub.f32 %v6285_v58, %v1159_v55  ;;  %3054 = vpow2.f32 %v1421_v31  ;;  %2661 = vmatprep.mubr.msk.bf16.mxu0 %vm2659_vm7, %v2660_v38  ;;  %vm6306_vm10 = vnez %v6305_v6  ;;  %vm2716_vm7 = vmpackc.low %vm6312_vm8, %vm6310_vm1  ;;  %v6323_v32 = vld [vmem:[#allocation128_spill] sm:$0xff] }
 0x214   :  { %3056 = vpow2.f32 %v1423_v59  ;;  %v3041_v50 = vpop.eup %3040  ;;  %2664 = vmatmul.mubr.msk.bf16.gmra.mrb[20].mxu0 %vm2662_vm2, %v2663_v63  ;;  %vm2713_vm3 = vmpackc.low %vm6308_vm13, %vm6306_vm10  ;;  %vm6328_vm10 = vnez %v6327_v37  ;;  %v1628_v63 = vpop.permute.xlu0 %1627 }
 0x215   :  { %v1365_v21 = vmul.f32 1.442695, %v1271_v22  ;;  %v1367_v29 = vmul.f32 1.442695, %v1272_v49  ;;  %3058 = vpow2.f32 %v1363_v10  ;;  %v3043_v36 = vpop.eup %3042  ;;  %v2711_v60 = vpack.c.bf16 %v3041_v50, %v3029_v18  ;;  %v6317_v10 = vld [vmem:[#allocation100_spill] sm:$0xff]  ;;  %v6325_v49 = vld [vmem:[#allocation9_spill] sm:$0xff] }
 0x216   :  { %v3045_v8 = vpop.eup %3044  ;;  %v2708_v51 = vpack.c.bf16 %v3043_v36, %v3031_v52  ;;  %v6313_v52 = vld [vmem:[#allocation102_spill] sm:$0xff]  ;;  %vm6318_vm0 = vnez %v6317_v10 }
 0x217   :  { %3060 = vpow2.f32 %v1365_v21  ;;  %vm6314_vm14 = vnez %v6313_v52 }
 0x218   :  { %3062 = vpow2.f32 %v1367_v29  ;;  %2709 = vmatprep.mubr.msk.bf16.mxu1 %vm2707_vm15, %v2708_v51  ;;  %vm2671_vm2 = vmpackc.low %vm6316_vm12, %vm6314_vm14  ;;  %vm6320_vm15 = vnez %v6319_v11  ;;  %v1638_v38 = vpop.permute.xlu0 %1637 }
 0x219   :  { %3064 = vpow2.f32 %v1425_v54  ;;  %v3047_v13 = vpop.eup %3046  ;;  %2712 = vmatmul.mubr.msk.bf16.gmra.mrb[20].mxu1 %vm2710_vm4, %v2711_v60  ;;  %vm2674_vm5 = vmpackc.low %vm6320_vm15, %vm6318_vm0  ;;  %vm6322_vm4 = vnez %v6321_v28  ;;  %v1787_v48 = vmul.f32 0.0, %v1638_v38 }
 0x21a   :  { %3066 = vpow2.f32 %v1427_v5  ;;  %v3049_v34 = vpop.eup %3048  ;;  %v2669_v12 = vpack.c.bf16 %v3047_v13, %v3037_v27 }
 0x21b   :  { %v3051_v25 = vpop.eup %3050  ;;  %v2666_v19 = vpack.c.bf16 %v3049_v34, %v3039_v45 }
 0x21c   :  { %v3053_v15 = vpop.eup %3052  ;;  %v5338_v4 = vpop.permute.xlu0 %1647 }
 0x21d   :  { %v3055_v35 = vpop.eup %3054  ;;  %2667 = vmatprep.mubr.msk.bf16.mxu0 %vm2665_vm9, %v2666_v19  ;;  %vm6324_vm9 = vnez %v6323_v32  ;;  %v1789_v38 = vmul.f32 0.0, %v5338_v4 }
 0x21e   :  { %v3057_v53 = vpop.eup %3056  ;;  %2670 = vmatmul.mubr.msk.bf16.gmra.mrb[24].mxu0 %vm2668_vm6, %v2669_v12  ;;  %v2717_v40 = vpack.c.bf16 %v3055_v35, %v3045_v8  ;;  %vm2719_vm11 = vmpackc.low %vm6324_vm9, %vm6322_vm4  ;;  %vm6326_vm6 = vnez %v6325_v49 }
 0x21f   :  { %v3059_v62 = vpop.eup %3058  ;;  %v2714_v0 = vpack.c.bf16 %v3057_v53, %v3051_v25  ;;  %vm2722_vm13 = vmpackc.low %vm6328_vm10, %vm6326_vm6 }
 0x220   :  { %v1239_v2 = vpop.permute.xlu1 %1238  ;;  %v5342_v54 = vpop.permute.xlu0 %1657 }
 0x221   :  { %v1303_v46 = vsub.f32 %v6292_v42, %v1239_v2  ;;  %v1304_v43 = vsub.f32 %v6293_v24, %v1239_v2  ;;  %v3061_v61 = vpop.eup %3060  ;;  %2715 = vmatprep.mubr.msk.bf16.mxu1 %vm2713_vm3, %v2714_v0 }
 0x222   :  { %v3063_v18 = vpop.eup %3062  ;;  %2718 = vmatmul.mubr.msk.bf16.gmra.mrb[24].mxu1 %vm2716_vm7, %v2717_v40  ;;  %v2675_v59 = vpack.c.bf16 %v3061_v61, %v3053_v15 }
 0x223   :  { %v1429_v33 = vmul.f32 1.442695, %v1303_v46  ;;  %v1431_v26 = vmul.f32 1.442695, %v1304_v43  ;;  %v3065_v17 = vpop.eup %3064  ;;  %v2672_v31 = vpack.c.bf16 %v3063_v18, %v3059_v62  ;;  %v1785_v43 = vmul.f32 0.0, %v1628_v63 }
 0x224   :  { %v3067_v20 = vpop.eup %3066  ;;  %v1633_v27 = vpop.permute.xlu1 %1632 }
 0x225   :  { %3068 = vpow2.f32 %v1429_v33  ;;  %2673 = vmatprep.mubr.msk.bf16.mxu0 %vm2671_vm2, %v2672_v31  ;;  %v5346_v29 = vpop.permute.xlu0 %1667  ;;  %v1786_v19 = vmul.f32 0.0, %v1633_v27 }
 0x226   :  { %3070 = vpow2.f32 %v1431_v26  ;;  %2676 = vmatmul.mubr.msk.bf16.gmra.mrb[28].mxu0 %vm2674_vm5, %v2675_v59 }
 0x228   :  { %v1643_v14 = vpop.permute.xlu1 %1642 }
 0x229   :  { %v5350_v5 = vpop.permute.xlu0 %1677  ;;  %v1788_v61 = vmul.f32 0.0, %v1643_v14 }
 0x22c   :  { %v5340_v45 = vpop.permute.xlu1 %1652 }
 0x22d   :  { %v5354_v36 = vpop.permute.xlu0 %1687 }
 0x22f   :  { %v3069_v39 = vpop.eup %3068 }
 0x230   :  { %v3071_v55 = vpop.eup %3070  ;;  %v2723_v58 = vpack.c.bf16 %v3069_v39, %v3065_v17  ;;  %v5344_v21 = vpop.permute.xlu1 %1662 }
 0x231   :  { %v2720_v22 = vpack.c.bf16 %v3071_v55, %v3067_v20  ;;  %v5358_v60 = vpop.permute.xlu0 %1697 }
 0x233   :  { %2721 = vmatprep.mubr.msk.bf16.mxu1 %vm2719_vm11, %v2720_v22 }
 0x234   :  { %2724 = vmatmul.mubr.msk.bf16.gmra.mrb[28].mxu1 %vm2722_vm13, %v2723_v58  ;;  %v5348_v50 = vpop.permute.xlu1 %1672 }
 0x235   :  { %v1708_v33 = vpop.permute.xlu0 %1707 }
 0x236   :  { %v1801_v44 = vmul.f32 0.0, %v1708_v33 }
 0x238   :  { %v5352_v2 = vpop.permute.xlu1 %1682 }
 0x239   :  { %v1718_v18 = vpop.permute.xlu0 %1717 }
 0x23a   :  { %v1803_v55 = vmul.f32 0.0, %v1718_v18  ;;  %v1792_v18 = vmul.f32 0.0, %v5344_v21 }
 0x23c   :  { %v5356_v42 = vpop.permute.xlu1 %1692 }
 0x240   :  { %v5362_v1 = vpop.permute.xlu1 %1702 }
 0x244   :  { %v1713_v13 = vpop.permute.xlu1 %1712 }
 0x245   :  { %v1802_v7 = vmul.f32 0.0, %v1713_v13 }
 0x248   :  { %v1723_v17 = vpop.permute.xlu1 %1722 }
 0x249   :  { %v1804_v28 = vmul.f32 0.0, %v1723_v17 }
 0x2a7   :  { %v2742_v46 = vpop.f32.mrb[0].mxu0 }
 0x2a8   :  { %v2743_v24 = vpop.f32.mrb[1].mxu0 }
 0x2a9   :  { %v2744_v56 = vadd.f32 %v2743_v24, %v2742_v46  ;;  %v2745_v16 = vpop.f32.mrb[2].mxu0  ;;  %v1790_v46 = vmul.f32 0.0, %v5340_v45  ;;  %v1728_v24 = vpop.permute.xlu0 %1727 }
 0x2aa   :  { %v2746_v8 = vpop.f32.mrb[3].mxu0  ;;  %v2790_v26 = vpop.f32.mrb[0].mxu1 }
 0x2ab   :  { %v5360_v51 = vadd.f32 %v2744_v56, %v1785_v43  ;;  %v2747_v57 = vadd.f32 %v2746_v8, %v2745_v16  ;;  %v2791_v34 = vpop.f32.mrb[1].mxu1  ;;  %v1733_v8 = vpop.permute.xlu1 %1732 }
 0x2ac   :  { %v2792_v30 = vadd.f32 %v2791_v34, %v2790_v26  ;;  %v2793_v12 = vpop.f32.mrb[2].mxu1  ;;  %v1806_v45 = vmul.f32 0.0, %v1733_v8 }
 0x2ad   :  { %3072 = vrcp.f32 %v5360_v51  ;;  %v2794_v25 = vpop.f32.mrb[3].mxu1  ;;  %v5367_v41 = vadd.f32 %v2747_v57, %v1786_v19 }
 0x2ae   :  { %v5365_v47 = vadd.f32 %v2792_v30, %v1801_v44  ;;  %v2795_v15 = vadd.f32 %v2794_v25, %v2793_v12  ;;  %v1805_v44 = vmul.f32 0.0, %v1728_v24 }
 0x2b0   :  { %3074 = vrcp.f32 %v5365_v47  ;;  %v5370_v40 = vadd.f32 %v2795_v15, %v1802_v7 }
 0x2b2   :  { %3076 = vrcp.f32 %v5370_v40 }
 0x2b3   :  { %3078 = vrcp.f32 %v5367_v41 }
 0x2b4   :  { %v2748_v35 = vpop.f32.mrb[4].mxu0 }
 0x2b5   :  { %v2749_v53 = vpop.f32.mrb[5].mxu0 }
 0x2b6   :  { %v2750_v62 = vadd.f32 %v2749_v53, %v2748_v35  ;;  %v2751_v0 = vpop.f32.mrb[6].mxu0 }
 0x2b7   :  { %v3073_v6 = vpop.eup %3072  ;;  %v2752_v9 = vpop.f32.mrb[7].mxu0 }
 0x2b8   :  { %2304 = vperm.xlu0 %2862, %v3073_v6   ;;  %v2753_v52 = vadd.f32 %v2752_v9, %v2751_v0  ;;  %v5374_v59 = vadd.f32 %v2750_v62, %v1787_v48  ;;  %v1791_v6 = vmul.f32 0.0, %v5342_v54  ;;  %v1738_v48 = vpop.permute.xlu0 %1737 }
 0x2ba   :  { %v5376_v20 = vadd.f32 %v2753_v52, %v1788_v61  ;;  %v3075_v27 = vpop.eup %3074 }
 0x2bb   :  { %2384 = vperm.xlu1 %2863, %v3075_v27  }
 0x2bc   :  { %3080 = vrcp.f32 %v5376_v20  ;;  %v3077_v16 = vpop.eup %3076 }
 0x2bd   :  { %v2796_v23 = vpop.f32.mrb[4].mxu1  ;;  %3082 = vrcp.f32 %v5374_v59  ;;  %2389 = vperm.xlu0 %2862, %v3077_v16   ;;  %v3079_v34 = vpop.eup %3078 }
 0x2be   :  { %v2797_v31 = vpop.f32.mrb[5].mxu1 }
 0x2bf   :  { %v2798_v10 = vadd.f32 %v2797_v31, %v2796_v23  ;;  %v2799_v11 = vpop.f32.mrb[6].mxu1  ;;  %2309 = vperm.xlu1 %2863, %v3079_v34  }
 0x2c0   :  { %v2800_v39 = vpop.f32.mrb[7].mxu1 }
 0x2c1   :  { %v2801_v32 = vadd.f32 %v2800_v39, %v2799_v11  ;;  %v5380_v58 = vadd.f32 %v2798_v10, %v1803_v55  ;;  %v1743_v10 = vpop.permute.xlu1 %1742  ;;  %v1807_v11 = vmul.f32 0.0, %v1738_v48 }
 0x2c3   :  { %v5382_v49 = vadd.f32 %v2801_v32, %v1804_v28 }
 0x2c5   :  { %3084 = vrcp.f32 %v5382_v49 }
 0x2c6   :  { %3086 = vrcp.f32 %v5380_v58  ;;  %v3081_v25 = vpop.eup %3080 }
 0x2c7   :  { %v2754_v22 = vpop.f32.mrb[8].mxu0  ;;  %2319 = vperm.xlu0 %2862, %v3081_v25   ;;  %v3083_v35 = vpop.eup %3082 }
 0x2c8   :  { %v2755_v37 = vpop.f32.mrb[9].mxu0  ;;  %2314 = vperm.xlu1 %2863, %v3083_v35  }
 0x2c9   :  { %v2756_v3 = vadd.f32 %v2755_v37, %v2754_v22  ;;  %v2757_v63 = vpop.f32.mrb[10].mxu0  ;;  %v1808_v37 = vmul.f32 0.0, %v1743_v10 }
 0x2ca   :  { %v2758_v14 = vpop.f32.mrb[11].mxu0 }
 0x2cb   :  { %v2759_v43 = vadd.f32 %v2758_v14, %v2757_v63  ;;  %v2802_v56 = vpop.f32.mrb[8].mxu1  ;;  %v5388_v57 = vadd.f32 %v2756_v3, %v1789_v38 }
 0x2cc   :  { %v2803_v33 = vpop.f32.mrb[9].mxu1 }
 0x2cd   :  { %v5390_v26 = vadd.f32 %v2759_v43, %v1790_v46  ;;  %v2804_v13 = vadd.f32 %v2803_v33, %v2802_v56  ;;  %v2805_v4 = vpop.f32.mrb[10].mxu1  ;;  %v1793_v46 = vmul.f32 0.0, %v5346_v29  ;;  %v1794_v33 = vmul.f32 0.0, %v5348_v50 }
 0x2ce   :  { %v2806_v30 = vpop.f32.mrb[11].mxu1 }
 0x2cf   :  { %3088 = vrcp.f32 %v5390_v26  ;;  %v2807_v12 = vadd.f32 %v2806_v30, %v2805_v4  ;;  %v5394_v19 = vadd.f32 %v2804_v13, %v1805_v44  ;;  %v3085_v9 = vpop.eup %3084  ;;  %v1748_v13 = vpop.permute.xlu0 %1747 }
 0x2d0   :  { %3090 = vrcp.f32 %v5388_v57  ;;  %v2760_v15 = vpop.f32.mrb[12].mxu0  ;;  %2399 = vperm.xlu0 %2862, %v3085_v9   ;;  %v3087_v31 = vpop.eup %3086 }
 0x2d1   :  { %v5396_v7 = vadd.f32 %v2807_v12, %v1806_v45  ;;  %v2761_v53 = vpop.f32.mrb[13].mxu0  ;;  %2394 = vperm.xlu1 %2863, %v3087_v31   ;;  %v1753_v30 = vpop.permute.xlu1 %1752  ;;  %v1809_v12 = vmul.f32 0.0, %v1748_v13  ;;  %v1797_v13 = vmul.f32 0.0, %v5354_v36 }
 0x2d2   :  { %v2762_v62 = vadd.f32 %v2761_v53, %v2760_v15  ;;  %v2763_v0 = vpop.f32.mrb[14].mxu0 }
 0x2d3   :  { %3092 = vrcp.f32 %v5396_v7  ;;  %v2764_v61 = vpop.f32.mrb[15].mxu0  ;;  %v2808_v17 = vpop.f32.mrb[12].mxu1 }
 0x2d4   :  { %3094 = vrcp.f32 %v5394_v19  ;;  %v5402_v52 = vadd.f32 %v2762_v62, %v1791_v6  ;;  %v2765_v23 = vadd.f32 %v2764_v61, %v2763_v0  ;;  %v2809_v54 = vpop.f32.mrb[13].mxu1  ;;  %v1810_v6 = vmul.f32 0.0, %v1753_v30 }
 0x2d5   :  { %v2810_v55 = vadd.f32 %v2809_v54, %v2808_v17  ;;  %v2811_v28 = vpop.f32.mrb[14].mxu1  ;;  %v1758_v54 = vpop.permute.xlu0 %1757 }
 0x2d6   :  { %v5404_v39 = vadd.f32 %v2765_v23, %v1792_v18  ;;  %3096 = vrcp.f32 %v5402_v52  ;;  %v2812_v32 = vpop.f32.mrb[15].mxu1  ;;  %v1795_v23 = vmul.f32 0.0, %v5350_v5 }
 0x2d7   :  { %v5408_v21 = vadd.f32 %v2810_v55, %v1807_v11  ;;  %v2813_v3 = vadd.f32 %v2812_v32, %v2811_v28  ;;  %v1796_v55 = vmul.f32 0.0, %v5352_v2 }
 0x2d8   :  { %3098 = vrcp.f32 %v5404_v39  ;;  %v2766_v27 = vpop.f32.mrb[16].mxu0 }
 0x2d9   :  { %v3089_v22 = vpop.eup %3088  ;;  %v5410_v38 = vadd.f32 %v2813_v3, %v1808_v37  ;;  %v2767_v14 = vpop.f32.mrb[17].mxu0  ;;  %3100 = vrcp.f32 %v5408_v21 }
 0x2da   :  { %v3091_v63 = vpop.eup %3090  ;;  %2329 = vperm.xlu0 %2862, %v3089_v22   ;;  %v2768_v24 = vadd.f32 %v2767_v14, %v2766_v27  ;;  %v2769_v43 = vpop.f32.mrb[18].mxu0  ;;  %v1811_v27 = vmul.f32 0.0, %v1758_v54 }
 0x2db   :  { %2324 = vperm.xlu1 %2863, %v3091_v63   ;;  %3102 = vrcp.f32 %v5410_v38  ;;  %v2770_v16 = vpop.f32.mrb[19].mxu0  ;;  %v1763_v37 = vpop.permute.xlu1 %1762 }
 0x2dc   :  { %v5416_v4 = vadd.f32 %v2768_v24, %v1793_v46  ;;  %v2771_v34 = vadd.f32 %v2770_v16, %v2769_v43 }
 0x2dd   :  { %v3093_v56 = vpop.eup %3092 }
 0x2de   :  { %v3095_v8 = vpop.eup %3094  ;;  %2409 = vperm.xlu0 %2862, %v3093_v56   ;;  %v2814_v44 = vpop.f32.mrb[16].mxu1  ;;  %3104 = vrcp.f32 %v5416_v4  ;;  %v5419_v29 = vadd.f32 %v2771_v34, %v1794_v33  ;;  %v1812_v56 = vmul.f32 0.0, %v1763_v37 }
 0x2df   :  { %2404 = vperm.xlu1 %2863, %v3095_v8   ;;  %v2815_v45 = vpop.f32.mrb[17].mxu1  ;;  %v1773_v36 = vpop.permute.xlu1 %1772 }
 0x2e0   :  { %v2816_v25 = vadd.f32 %v2815_v45, %v2814_v44  ;;  %v2817_v15 = vpop.f32.mrb[18].mxu1  ;;  %v3097_v35 = vpop.eup %3096  ;;  %3106 = vrcp.f32 %v5419_v29 }
 0x2e1   :  { %v2818_v50 = vpop.f32.mrb[19].mxu1 }
 0x2e2   :  { %v3099_v53 = vpop.eup %3098  ;;  %v5422_v62 = vadd.f32 %v2816_v25, %v1809_v12  ;;  %v2819_v0 = vadd.f32 %v2818_v50, %v2817_v15  ;;  %v1768_v12 = vpop.permute.xlu0 %1767  ;;  %v1798_v15 = vmul.f32 0.0, %v5356_v42 }
 0x2e3   :  { %2334 = vperm.xlu1 %2863, %v3097_v35   ;;  %2339 = vperm.xlu0 %2862, %v3099_v53   ;;  %v3101_v18 = vpop.eup %3100 }
 0x2e4   :  { %3108 = vrcp.f32 %v5422_v62  ;;  %v5425_v48 = vadd.f32 %v2819_v0, %v1810_v6 }
 0x2e5   :  { %v3103_v10 = vpop.eup %3102 }
 0x2e6   :  { %3110 = vrcp.f32 %v5425_v48 }
 0x2e7   :  { %v2772_v9 = vpop.f32.mrb[20].mxu0  ;;  %2414 = vperm.xlu1 %2863, %v3101_v18   ;;  %2419 = vperm.xlu0 %2862, %v3103_v10  }
 0x2e8   :  { %v2773_v61 = vpop.f32.mrb[21].mxu0  ;;  %v3105_v63 = vpop.eup %3104 }
 0x2e9   :  { %v2774_v17 = vadd.f32 %v2773_v61, %v2772_v9  ;;  %v2775_v31 = vpop.f32.mrb[22].mxu0  ;;  %v1813_v9 = vmul.f32 0.0, %v1768_v12 }
 0x2ea   :  { %v2776_v11 = vpop.f32.mrb[23].mxu0  ;;  %v3107_v43 = vpop.eup %3106 }
 0x2eb   :  { %v5430_v28 = vadd.f32 %v2774_v17, %v1795_v23  ;;  %v2777_v32 = vadd.f32 %v2776_v11, %v2775_v31  ;;  %2344 = vperm.xlu1 %2863, %v3105_v63   ;;  %2349 = vperm.xlu0 %2862, %v3107_v43   ;;  %v1814_v31 = vmul.f32 0.0, %v1773_v36 }
 0x2ec   :  { %v2820_v22 = vpop.f32.mrb[20].mxu1 }
 0x2ed   :  { %v2821_v3 = vpop.f32.mrb[21].mxu1  ;;  %3112 = vrcp.f32 %v5430_v28  ;;  %v5433_v5 = vadd.f32 %v2777_v32, %v1796_v55 }
 0x2ee   :  { %v2822_v14 = vadd.f32 %v2821_v3, %v2820_v22  ;;  %v2823_v46 = vpop.f32.mrb[22].mxu1  ;;  %v3109_v45 = vpop.eup %3108  ;;  %v1799_v22 = vmul.f32 0.0, %v5358_v60 }
 0x2ef   :  { %v2824_v24 = vpop.f32.mrb[23].mxu1  ;;  %3114 = vrcp.f32 %v5433_v5  ;;  %2424 = vperm.xlu1 %2863, %v3109_v45  }
 0x2f0   :  { %v5436_v2 = vadd.f32 %v2822_v14, %v1811_v27  ;;  %v2825_v16 = vadd.f32 %v2824_v24, %v2823_v46  ;;  %v3111_v6 = vpop.eup %3110  ;;  %v1778_v27 = vpop.permute.xlu0 %1777  ;;  %v1800_v24 = vmul.f32 0.0, %v5362_v1 }
 0x2f1   :  { %v2778_v8 = vpop.f32.mrb[24].mxu0  ;;  %2429 = vperm.xlu0 %2862, %v3111_v6  }
 0x2f2   :  { %v2779_v33 = vpop.f32.mrb[25].mxu0  ;;  %3116 = vrcp.f32 %v5436_v2  ;;  %v5440_v34 = vadd.f32 %v2825_v16, %v1812_v56 }
 0x2f3   :  { %v2780_v44 = vadd.f32 %v2779_v33, %v2778_v8  ;;  %v2781_v30 = vpop.f32.mrb[26].mxu0  ;;  %v1783_v8 = vpop.permute.xlu1 %1782 }
 0x2f4   :  { %v2782_v25 = vpop.f32.mrb[27].mxu0  ;;  %3118 = vrcp.f32 %v5440_v34 }
 0x2f5   :  { %v5444_v35 = vadd.f32 %v2780_v44, %v1797_v13  ;;  %v2783_v50 = vadd.f32 %v2782_v25, %v2781_v30  ;;  %v2826_v53 = vpop.f32.mrb[24].mxu1  ;;  %v1815_v13 = vmul.f32 0.0, %v1778_v27  ;;  %v1816_v25 = vmul.f32 0.0, %v1783_v8 }
 0x2f6   :  { %v2827_v0 = vpop.f32.mrb[25].mxu1 }
 0x2f7   :  { %3120 = vrcp.f32 %v5444_v35  ;;  %v5447_v61 = vadd.f32 %v2783_v50, %v1798_v15  ;;  %v2828_v18 = vadd.f32 %v2827_v0, %v2826_v53  ;;  %v2829_v23 = vpop.f32.mrb[26].mxu1  ;;  %v3113_v42 = vpop.eup %3112 }
 0x2f8   :  { %v2830_v17 = vpop.f32.mrb[27].mxu1  ;;  %2354 = vperm.xlu1 %2863, %v3113_v42   ;;  %v5473_v42 = vld [vmem:[%s5555_s4] ss:$0 sm:$0xff]  ;;  %s3163_s4 = smov [#allocation4]  }
 0x2f9   :  { %3122 = vrcp.f32 %v5447_v61  ;;  %v5450_v10 = vadd.f32 %v2828_v18, %v1813_v9  ;;  %v2831_v54 = vadd.f32 %v2830_v17, %v2829_v23  ;;  %v2784_v11 = vpop.f32.mrb[28].mxu0  ;;  %v3115_v32 = vpop.eup %3114  ;;  %s2602_s18 = sshll.u32 %s3163_s4, 4  ;;  %s2603_s18 = int_to_ptr.vmem [resolvable:$true] %s2602_s18 }
 0x2fa   :  { %v2785_v55 = vpop.f32.mrb[29].mxu0  ;;  %2359 = vperm.xlu0 %2862, %v3115_v32   ;;  %s3136_s0 = scalar_lea.vmem %s2603_s18, 4096  ;;  %p3141_p1 = scmp.lt.s32.totalorder %s2603_s18, %s2603_s18 }
 0x2fb   :  { %3124 = vrcp.f32 %v5450_v10  ;;  %v5454_v37 = vadd.f32 %v2831_v54, %v1814_v31  ;;  %v2786_v3 = vadd.f32 %v2785_v55, %v2784_v11  ;;  %v2787_v63 = vpop.f32.mrb[30].mxu0  ;;  %p3137_p0 = scmp.ne.s32.totalorder %s2603_s18, %s3136_s0  ;;  %p3142_p2 = scmp.lt.s32.totalorder %s3136_s0, %s3136_s0 }
 0x2fc   :  { %v2788_v14 = vpop.f32.mrb[31].mxu0  ;;  %v3117_v46 = vpop.eup %3116 }
 0x2fd   :  { %3126 = vrcp.f32 %v5454_v37  ;;  %v5458_v43 = vadd.f32 %v2786_v3, %v1799_v22  ;;  %v2789_v56 = vadd.f32 %v2788_v14, %v2787_v63  ;;  %2434 = vperm.xlu1 %2863, %v3117_v46   ;;  %p3143_p3 = por %p3142_p2, %p3141_p1 }
 0x2fe   :  { %v3119_v33 = vpop.eup %3118 }
 0x2ff   :  { %3128 = vrcp.f32 %v5458_v43  ;;  %v5461_v44 = vadd.f32 %v2789_v56, %v1800_v24  ;;  %2439 = vperm.xlu0 %2862, %v3119_v33   ;;  %p3144_p4 = pnand %p3143_p3, %p3137_p0 }
 0x301   :  { %v3121_v1 = vpop.eup %3120  ;;  %3130 = vrcp.f32 %v5461_v44 }
 0x302   :  { %2364 = vperm.xlu1 %2863, %v3121_v1  }
 0x303   :  { %v3123_v53 = vpop.eup %3122 }
 0x304   :  { %2369 = vperm.xlu0 %2862, %v3123_v53  }
 0x305   :  { %v3125_v36 = vpop.eup %3124 }
 0x306   :  { %2444 = vperm.xlu1 %2863, %v3125_v36  }
 0x307   :  { %v2832_v16 = vpop.f32.mrb[28].mxu1  ;;  %v3127_v0 = vpop.eup %3126 }
 0x308   :  { %v2833_v60 = vpop.f32.mrb[29].mxu1  ;;  %2449 = vperm.xlu0 %2862, %v3127_v0  }
 0x309   :  { %v2834_v30 = vadd.f32 %v2833_v60, %v2832_v16  ;;  %v2835_v45 = vpop.f32.mrb[30].mxu1  ;;  %v3129_v9 = vpop.eup %3128 }
 0x30a   :  { %v2836_v12 = vpop.f32.mrb[31].mxu1  ;;  %2374 = vperm.xlu1 %2863, %v3129_v9  }
 0x30b   :  { %v5464_v15 = vadd.f32 %v2834_v30, %v1815_v13  ;;  %v2837_v50 = vadd.f32 %v2836_v12, %v2835_v45  ;;  %v3131_v18 = vpop.eup %3130 }
 0x30c   :  { %2379 = vperm.xlu0 %2862, %v3131_v18  }
 0x30d   :  { %3132 = vrcp.f32 %v5464_v15  ;;  %v5467_v6 = vadd.f32 %v2837_v50, %v1816_v25 }
 0x30f   :  { %3134 = vrcp.f32 %v5467_v6 }
 0x317   :  { %v3133_v23 = vpop.eup %3132 }
 0x318   :  { %2454 = vperm.xlu1 %2863, %v3133_v23  }
 0x319   :  { %v3135_v17 = vpop.eup %3134 }
 0x31a   :  { %2459 = vperm.xlu0 %2862, %v3135_v17  }
 0x337   :  { %v2305_v31 = vpop.permute.xlu0 %2304 }
 0x338   :  { %v2462_v54 = vmul.f32 %v2305_v31, %v5360_v51 }
 0x33a   :  { %v2501_v11 = vadd.f32 %v5473_v42, %v2462_v54  ;;  %v2385_v32 = vpop.permute.xlu1 %2384 }
 0x33b   :  { %v2478_v22 = vmul.f32 %v2385_v32, %v5365_v47 }
 0x33c   :  { %v2533_v55 = vmax.f32 %v2501_v11, 0.0  ;;  %v2390_v3 = vpop.permute.xlu0 %2389 }
 0x33d   :  { %v2517_v63 = vadd.f32 %v5473_v42, %v2478_v22  ;;  %v2479_v27 = vmul.f32 %v2390_v3, %v5370_v40 }
 0x33e   :  { %2565 = vst [vmem:[#allocation4] sm:$0xff] %v2533_v55  ;;  %v2310_v14 = vpop.permute.xlu1 %2309 }
 0x33f   :  { %v2549_v46 = vmax.f32 %v2517_v63, 0.0  ;;  %v2518_v24 = vadd.f32 %v5473_v42, %v2479_v27  ;;  %v2463_v56 = vmul.f32 %v2310_v14, %v5367_v41 }
 0x341   :  { %2581 = vst [vmem:[#allocation4 + $0x80] sm:$0xff] %v2549_v46  ;;  %v2550_v51 = vmax.f32 %v2518_v24, 0.0  ;;  %v2502_v8 = vadd.f32 %v5473_v42, %v2463_v56 }
 0x343   :  { %2582 = vst [vmem:[#allocation4 + $0x88] sm:$0xff] %v2550_v51  ;;  %v2534_v47 = vmax.f32 %v2502_v8, 0.0 }
 0x345   :  { %2566 = vst [vmem:[#allocation4 + $0x8] sm:$0xff] %v2534_v47 }
 0x346   :  { %v2320_v16 = vpop.permute.xlu0 %2319 }
 0x347   :  { %v2465_v60 = vmul.f32 %v2320_v16, %v5376_v20  ;;  %v2315_v33 = vpop.permute.xlu1 %2314 }
 0x348   :  { %v2464_v40 = vmul.f32 %v2315_v33, %v5374_v59 }
 0x349   :  { %v2504_v13 = vadd.f32 %v5473_v42, %v2465_v60 }
 0x34a   :  { %v2503_v12 = vadd.f32 %v5473_v42, %v2464_v40 }
 0x34b   :  { %v2536_v45 = vmax.f32 %v2504_v13, 0.0 }
 0x34c   :  { %v2535_v25 = vmax.f32 %v2503_v12, 0.0 }
 0x34d   :  { %2568 = vst [vmem:[#allocation4 + $0x18] sm:$0xff] %v2536_v45 }
 0x34e   :  { %2567 = vst [vmem:[#allocation4 + $0x10] sm:$0xff] %v2535_v25 }
 0x34f   :  { %v2400_v30 = vpop.permute.xlu0 %2399 }
 0x350   :  { %v2481_v41 = vmul.f32 %v2400_v30, %v5382_v49  ;;  %v2395_v1 = vpop.permute.xlu1 %2394 }
 0x351   :  { %v2480_v20 = vmul.f32 %v2395_v1, %v5380_v58 }
 0x352   :  { %v2520_v50 = vadd.f32 %v5473_v42, %v2481_v41 }
 0x353   :  { %v2519_v36 = vadd.f32 %v5473_v42, %v2480_v20 }
 0x354   :  { %v2552_v53 = vmax.f32 %v2520_v50, 0.0 }
 0x355   :  { %v2551_v18 = vmax.f32 %v2519_v36, 0.0 }
 0x356   :  { %2584 = vst [vmem:[#allocation4 + $0x98] sm:$0xff] %v2552_v53 }
 0x357   :  { %2583 = vst [vmem:[#allocation4 + $0x90] sm:$0xff] %v2551_v18 }
 0x359   :  { %v2330_v0 = vpop.permute.xlu0 %2329 }
 0x35a   :  { %v2467_v59 = vmul.f32 %v2330_v0, %v5390_v26  ;;  %v2325_v9 = vpop.permute.xlu1 %2324 }
 0x35b   :  { %v2466_v23 = vmul.f32 %v2325_v9, %v5388_v57 }
 0x35c   :  { %v2506_v49 = vadd.f32 %v5473_v42, %v2467_v59 }
 0x35d   :  { %v2505_v17 = vadd.f32 %v5473_v42, %v2466_v23  ;;  %v2410_v31 = vpop.permute.xlu0 %2409 }
 0x35e   :  { %v2538_v54 = vmax.f32 %v2506_v49, 0.0  ;;  %v2483_v58 = vmul.f32 %v2410_v31, %v5396_v7  ;;  %v2405_v11 = vpop.permute.xlu1 %2404 }
 0x35f   :  { %v2537_v55 = vmax.f32 %v2505_v17, 0.0  ;;  %v2482_v32 = vmul.f32 %v2405_v11, %v5394_v19 }
 0x360   :  { %2570 = vst [vmem:[#allocation4 + $0x28] sm:$0xff] %v2538_v54  ;;  %v2522_v26 = vadd.f32 %v5473_v42, %v2483_v58 }
 0x361   :  { %2569 = vst [vmem:[#allocation4 + $0x20] sm:$0xff] %v2537_v55  ;;  %v2521_v22 = vadd.f32 %v5473_v42, %v2482_v32 }
 0x362   :  { %v2554_v57 = vmax.f32 %v2522_v26, 0.0  ;;  %v2335_v3 = vpop.permute.xlu1 %2334  ;;  %v2340_v27 = vpop.permute.xlu0 %2339 }
 0x363   :  { %v2553_v63 = vmax.f32 %v2521_v22, 0.0  ;;  %v2468_v14 = vmul.f32 %v2335_v3, %v5402_v52  ;;  %v2469_v46 = vmul.f32 %v2340_v27, %v5404_v39 }
 0x364   :  { %2586 = vst [vmem:[#allocation4 + $0xa8] sm:$0xff] %v2554_v57 }
 0x365   :  { %2585 = vst [vmem:[#allocation4 + $0xa0] sm:$0xff] %v2553_v63  ;;  %v2507_v7 = vadd.f32 %v5473_v42, %v2468_v14  ;;  %v2508_v19 = vadd.f32 %v5473_v42, %v2469_v46 }
 0x366   :  { %v2415_v24 = vpop.permute.xlu1 %2414  ;;  %v2420_v16 = vpop.permute.xlu0 %2419 }
 0x367   :  { %v2539_v56 = vmax.f32 %v2507_v7, 0.0  ;;  %v2484_v51 = vmul.f32 %v2415_v24, %v5408_v21  ;;  %v2540_v8 = vmax.f32 %v2508_v19, 0.0  ;;  %v2485_v60 = vmul.f32 %v2420_v16, %v5410_v38 }
 0x369   :  { %2571 = vst [vmem:[#allocation4 + $0x30] sm:$0xff] %v2539_v56  ;;  %v2523_v33 = vadd.f32 %v5473_v42, %v2484_v51  ;;  %2572 = vst [vmem:[#allocation4 + $0x38] sm:$0xff] %v2540_v8  ;;  %v2524_v52 = vadd.f32 %v5473_v42, %v2485_v60 }
 0x36a   :  { %v2345_v39 = vpop.permute.xlu1 %2344  ;;  %v2350_v30 = vpop.permute.xlu0 %2349 }
 0x36b   :  { %v2555_v47 = vmax.f32 %v2523_v33, 0.0  ;;  %v2470_v13 = vmul.f32 %v2345_v39, %v5416_v4  ;;  %v2556_v40 = vmax.f32 %v2524_v52, 0.0  ;;  %v2471_v45 = vmul.f32 %v2350_v30, %v5419_v29 }
 0x36d   :  { %2587 = vst [vmem:[#allocation4 + $0xb0] sm:$0xff] %v2555_v47  ;;  %v2509_v21 = vadd.f32 %v5473_v42, %v2470_v13  ;;  %2588 = vst [vmem:[#allocation4 + $0xb8] sm:$0xff] %v2556_v40  ;;  %v2510_v38 = vadd.f32 %v5473_v42, %v2471_v45 }
 0x36e   :  { %v2425_v41 = vpop.permute.xlu1 %2424 }
 0x36f   :  { %v2541_v12 = vmax.f32 %v2509_v21, 0.0  ;;  %v2486_v1 = vmul.f32 %v2425_v41, %v5422_v62  ;;  %v2542_v25 = vmax.f32 %v2510_v38, 0.0 }
 0x370   :  { %v2430_v50 = vpop.permute.xlu0 %2429 }
 0x371   :  { %2573 = vst [vmem:[#allocation4 + $0x40] sm:$0xff] %v2541_v12  ;;  %v2487_v20 = vmul.f32 %v2430_v50, %v5425_v48  ;;  %v2525_v4 = vadd.f32 %v5473_v42, %v2486_v1  ;;  %2574 = vst [vmem:[#allocation4 + $0x48] sm:$0xff] %v2542_v25 }
 0x373   :  { %v2526_v53 = vadd.f32 %v5473_v42, %v2487_v20  ;;  %v2557_v29 = vmax.f32 %v2525_v4, 0.0 }
 0x375   :  { %v2558_v59 = vmax.f32 %v2526_v53, 0.0  ;;  %2589 = vst [vmem:[#allocation4 + $0xc0] sm:$0xff] %v2557_v29 }
 0x377   :  { %v2355_v36 = vpop.permute.xlu1 %2354  ;;  %2590 = vst [vmem:[#allocation4 + $0xc8] sm:$0xff] %v2558_v59 }
 0x378   :  { %v2472_v0 = vmul.f32 %v2355_v36, %v5430_v28 }
 0x379   :  { %v2360_v9 = vpop.permute.xlu0 %2359 }
 0x37a   :  { %v2473_v18 = vmul.f32 %v2360_v9, %v5433_v5  ;;  %v2511_v62 = vadd.f32 %v5473_v42, %v2472_v0 }
 0x37c   :  { %v2435_v23 = vpop.permute.xlu1 %2434  ;;  %v2512_v48 = vadd.f32 %v5473_v42, %v2473_v18  ;;  %v2543_v49 = vmax.f32 %v2511_v62, 0.0 }
 0x37d   :  { %v2488_v17 = vmul.f32 %v2435_v23, %v5436_v2 }
 0x37e   :  { %v2440_v31 = vpop.permute.xlu0 %2439  ;;  %v2544_v54 = vmax.f32 %v2512_v48, 0.0  ;;  %2575 = vst [vmem:[#allocation4 + $0x50] sm:$0xff] %v2543_v49 }
 0x37f   :  { %v2489_v58 = vmul.f32 %v2440_v31, %v5440_v34  ;;  %v2527_v28 = vadd.f32 %v5473_v42, %v2488_v17 }
 0x380   :  { %2576 = vst [vmem:[#allocation4 + $0x58] sm:$0xff] %v2544_v54 }
 0x381   :  { %v2365_v11 = vpop.permute.xlu1 %2364  ;;  %v2528_v5 = vadd.f32 %v5473_v42, %v2489_v58  ;;  %v2559_v55 = vmax.f32 %v2527_v28, 0.0 }
 0x382   :  { %v2474_v32 = vmul.f32 %v2365_v11, %v5444_v35 }
 0x383   :  { %v2370_v26 = vpop.permute.xlu0 %2369  ;;  %v2560_v22 = vmax.f32 %v2528_v5, 0.0  ;;  %2591 = vst [vmem:[#allocation4 + $0xd0] sm:$0xff] %v2559_v55 }
 0x384   :  { %v2475_v57 = vmul.f32 %v2370_v26, %v5447_v61  ;;  %v2513_v2 = vadd.f32 %v5473_v42, %v2474_v32 }
 0x385   :  { %v2445_v3 = vpop.permute.xlu1 %2444  ;;  %2592 = vst [vmem:[#allocation4 + $0xd8] sm:$0xff] %v2560_v22 }
 0x386   :  { %v2514_v34 = vadd.f32 %v5473_v42, %v2475_v57  ;;  %v2545_v63 = vmax.f32 %v2513_v2, 0.0  ;;  %v2490_v27 = vmul.f32 %v2445_v3, %v5450_v10 }
 0x387   :  { %v2450_v14 = vpop.permute.xlu0 %2449 }
 0x388   :  { %v2546_v46 = vmax.f32 %v2514_v34, 0.0  ;;  %2577 = vst [vmem:[#allocation4 + $0x60] sm:$0xff] %v2545_v63  ;;  %v2491_v7 = vmul.f32 %v2450_v14, %v5454_v37  ;;  %v2529_v35 = vadd.f32 %v5473_v42, %v2490_v27 }
 0x389   :  { %v2375_v19 = vpop.permute.xlu1 %2374 }
 0x38a   :  { %2578 = vst [vmem:[#allocation4 + $0x68] sm:$0xff] %v2546_v46  ;;  %v2530_v61 = vadd.f32 %v5473_v42, %v2491_v7  ;;  %v2561_v24 = vmax.f32 %v2529_v35, 0.0  ;;  %v2476_v56 = vmul.f32 %v2375_v19, %v5458_v43 }
 0x38b   :  { %v2380_v16 = vpop.permute.xlu0 %2379 }
 0x38c   :  { %v2562_v51 = vmax.f32 %v2530_v61, 0.0  ;;  %2593 = vst [vmem:[#allocation4 + $0xe0] sm:$0xff] %v2561_v24  ;;  %v2477_v8 = vmul.f32 %v2380_v16, %v5461_v44  ;;  %v2515_v10 = vadd.f32 %v5473_v42, %v2476_v56 }
 0x38e   :  { %2594 = vst [vmem:[#allocation4 + $0xe8] sm:$0xff] %v2562_v51  ;;  %v2516_v37 = vadd.f32 %v5473_v42, %v2477_v8  ;;  %v2547_v33 = vmax.f32 %v2515_v10, 0.0 }
 0x390   :  { %v2548_v47 = vmax.f32 %v2516_v37, 0.0  ;;  %2579 = vst [vmem:[#allocation4 + $0x70] sm:$0xff] %v2547_v33 }
 0x392   :  { %2580 = vst [vmem:[#allocation4 + $0x78] sm:$0xff] %v2548_v47 }
 0x397   :  { %v2455_v60 = vpop.permute.xlu1 %2454 }
 0x398   :  { %v2492_v52 = vmul.f32 %v2455_v60, %v5464_v15 }
 0x399   :  { %v2460_v39 = vpop.permute.xlu0 %2459 }
 0x39a   :  { %v2493_v13 = vmul.f32 %v2460_v39, %v5467_v6  ;;  %v2531_v43 = vadd.f32 %v5473_v42, %v2492_v52 }
 0x39c   :  { %v2532_v44 = vadd.f32 %v5473_v42, %v2493_v13  ;;  %v2563_v40 = vmax.f32 %v2531_v43, 0.0 }
 0x39e   :  { %v2564_v30 = vmax.f32 %v2532_v44, 0.0  ;;  %2595 = vst [vmem:[#allocation4 + $0xf0] sm:$0xff] %v2563_v40 }
 0x3a0   :  { %2596 = vst [vmem:[#allocation4 + $0xf8] sm:$0xff] %v2564_v30 }
 0x3a1   :  { %3147 = shalt.err (!%p3144_p4)
}
 0x3a2   :  { %s3148_s21 = scalar_lea.hbm %s5556_s5, 4096 }
 0x3a3   :  { %p3149_p5 = scmp.ne.s32.totalorder %s5556_s5, %s3148_s21  ;;  %p3152_p6 = scmp.lt.u32.totalorder %s3148_s21, %s5556_s5 }
 0x3a5   :  { %p3154_p7 = pnand %p3152_p6, %p3149_p5 }
 0x3a7   :  { %3157 = shalt.err (!%p3154_p7)
}
 0x3a8   :  { %s3164_s25 = smov 128   ;;  %s3165_s26 = smov 8  }
 0x3a9   :  { %2608 = dma.vmem_to_hbm [thread:$0]  %s2603_s18, 4096, %s5556_s5, [#allocation5], %s3164_s25, %s3164_s25, %s3165_s26  }
 0x3aa   :  { %3158 = dma.done.wait [#allocation5], 4096  }
 0x3ab   :  { %3159 = vsyncadd [#allocation5], 4294963200 }
 0x3ac   :  { %2612 = vsyncpa [#allocation5], 1 }

</bundles_post_ra>
